<compile_context>
chip_gen: v7x
topology: tpu7x:2x2x1
jax: 0.10.0
libtpu: 0.0.40
codegen_flags: <defaults>
</compile_context>

<pallas_src>
import functools

import jax
import jax.numpy as jnp
import numpy as np
from jax.experimental import pallas as pl
from jax.experimental.pallas import tpu as pltpu

_VMEM_LIMIT = 16 * 1024 * 1024   # ~3x worst-case per-step need; safe on v5e/v6e/v7x
_EPS = 1e-5


# ------------------------------- small helpers -------------------------------

def _round_up(x, m):
    return (x + m - 1) // m * m


def _pick_tm(m):
    """Row-tile size: large tiles amortize the ~0.35us/step overhead; even 2048
    rows x 576 K in bf16 is ~2.3 MB per buffer (double-buffered << 64 MiB VMEM)."""
    for t in (2048, 1024, 512, 256, 128, 64, 32, 16, 8):
        if m >= t:
            return t
    return 8


def _im2col(x, kh, kw, stride):
    """NHWC (bf16) -> (N*Ho*Wo, kh*kw*Cin) bf16 patches with 'same' padding.
    The activation is already bf16, so the 9x-expanded buffer is built in bf16."""
    n, h, w, cin = x.shape
    ph, pw = kh // 2, kw // 2
    ho = (h + 2 * ph - kh) // stride + 1
    wo = (w + 2 * pw - kw) // stride + 1
    xp = jnp.pad(x, ((0, 0), (ph, ph), (pw, pw), (0, 0)))
    cols = [xp[:, i:i + stride * ho:stride, j:j + stride * wo:stride, :]
            for i in range(kh) for j in range(kw)]
    patches = jnp.concatenate(cols, axis=-1)            # (N, Ho, Wo, kh*kw*Cin)
    return patches.reshape(n * ho * wo, kh * kw * cin), ho, wo


# --------------------------------- kernels -----------------------------------

def _conv_bias_kernel(x_ref, w_ref, b_ref, o_ref, *, relu):
    """One MXU matmul tile + bias (+ ReLU). bf16 operands, f32 accumulate."""
    acc = jnp.dot(x_ref[...], w_ref[...], preferred_element_type=jnp.float32)
    acc = acc + b_ref[...]
    if relu:
        acc = jnp.maximum(acc, 0.0)
    o_ref[...] = acc.astype(o_ref.dtype)


def _conv_stats_kernel(x_ref, w_ref, b_ref, y_ref, p_ref):
    """Conv tile + per-tile BN partials.

    The partial sums are taken over the *bias-free* f32 accumulator so that
    zero-padded rows contribute exactly nothing; the mean shift by the bias is
    applied analytically in the wrapper.  Partials go to their own (1, 2, Cout)
    output block, so the grid axis is fully parallel (v7x megacore)."""
    acc = jnp.dot(x_ref[...], w_ref[...], preferred_element_type=jnp.float32)
    p_ref[0] = jnp.concatenate(
        [jnp.sum(acc, axis=0, keepdims=True),
         jnp.sum(acc * acc, axis=0, keepdims=True)], axis=0)
    y_ref[...] = (acc + b_ref[...]).astype(y_ref.dtype)


def _bn_epilogue_kernel(y_ref, ss_ref, *rest, relu, has_res):
    """Lane-dense elementwise epilogue: y*scale + shift (+ residual) (+ ReLU).
    scale/shift are precomputed per channel in the wrapper."""
    if has_res:
        r_ref, o_ref = rest
    else:
        (o_ref,) = rest
    scale = ss_ref[0:1, :]
    shift = ss_ref[1:2, :]
    out = y_ref[...].astype(jnp.float32) * scale + shift
    if has_res:
        out = out + r_ref[...].astype(jnp.float32)
    if relu:
        out = jnp.maximum(out, 0.0)
    o_ref[...] = out.astype(o_ref.dtype)


# ----------------------------- pallas_call wrappers ---------------------------

def _conv_pallas(x2d, w2d, bias, *, relu=False, collect_stats=False,
                 out_dtype=jnp.bfloat16):
    """Tiled (M, K) x (K, Cout) conv-as-matmul.  x2d is bf16 (built by _im2col).
    Returns the output padded to a multiple of the row tile; with collect_stats,
    also per-tile (sum, sumsq) BN partials."""
    m, k = x2d.shape
    cout = w2d.shape[1]
    tm = _pick_tm(m)
    m_pad = _round_up(m, tm)
    if m_pad != m:
        x2d = jnp.pad(x2d, ((0, m_pad - m), (0, 0)))     # zero rows: contribute 0
    wb = w2d.astype(jnp.bfloat16)
    b2 = bias.reshape(1, cout).astype(jnp.float32)
    grid = (m_pad // tm,)

    x_spec = pl.BlockSpec((tm, k), lambda i: (i, 0))
    w_spec = pl.BlockSpec((k, cout), lambda i: (0, 0))
    b_spec = pl.BlockSpec((1, cout), lambda i: (0, 0))
    y_spec = pl.BlockSpec((tm, cout), lambda i: (i, 0))

    if collect_stats:
        p_spec = pl.BlockSpec((1, 2, cout), lambda i: (i, 0, 0))
        y, parts = pl.pallas_call(
            _conv_stats_kernel,
            out_shape=(jax.ShapeDtypeStruct((m_pad, cout), jnp.bfloat16),
                       jax.ShapeDtypeStruct((m_pad // tm, 2, cout), jnp.float32)),
            grid=grid,
            in_specs=[x_spec, w_spec, b_spec],
            out_specs=(y_spec, p_spec),
            compiler_params=pltpu.CompilerParams(
                dimension_semantics=("parallel",),       # per-tile partials -> no race
                vmem_limit_bytes=_VMEM_LIMIT),
        )(x2d, wb, b2)
        return y, parts, m_pad, tm

    y = pl.pallas_call(
        functools.partial(_conv_bias_kernel, relu=relu),
        out_shape=jax.ShapeDtypeStruct((m_pad, cout), out_dtype),
        grid=grid,
        in_specs=[x_spec, w_spec, b_spec],
        out_specs=y_spec,
        compiler_params=pltpu.CompilerParams(
            dimension_semantics=("parallel",),
            vmem_limit_bytes=_VMEM_LIMIT),
    )(x2d, wb, b2)
    return y, m_pad, tm


def _bn_epilogue(y_pad, scale, shift, tm, *, residual2d=None, relu=True):
    """Apply precomputed BN scale/shift (+ residual + ReLU) over the padded conv
    output.  Rows are folded into the lane dim (g rows -> g*Cout >= 128 lanes,
    a free row-major reshape) so stores run on full vregs.  Output is bf16."""
    m_pad, cout = y_pad.shape
    num_tiles = m_pad // tm

    g = max(1, 128 // cout)
    while g > 1 and tm % (8 * g) != 0:
        g //= 2
    c2 = g * cout
    tm2 = tm // g

    y2 = y_pad.reshape(m_pad // g, c2)
    ss = jnp.stack([jnp.tile(scale, g), jnp.tile(shift, g)], axis=0)   # (2, c2) f32

    tile_spec = pl.BlockSpec((tm2, c2), lambda i: (i, 0))
    ss_spec = pl.BlockSpec((2, c2), lambda i: (0, 0))
    in_specs = [tile_spec, ss_spec]
    args = [y2, ss]

    has_res = residual2d is not None
    if has_res:
        args.append(residual2d.reshape(m_pad // g, c2))
        in_specs.append(tile_spec)

    out = pl.pallas_call(
        functools.partial(_bn_epilogue_kernel, relu=relu, has_res=has_res),
        out_shape=jax.ShapeDtypeStruct((m_pad // g, c2), jnp.bfloat16),
        grid=(num_tiles,),
        in_specs=in_specs,
        out_specs=tile_spec,
        compiler_params=pltpu.CompilerParams(
            dimension_semantics=("parallel",),
            vmem_limit_bytes=_VMEM_LIMIT),
    )(*args)
    return out.reshape(m_pad, cout)


# ------------------------------ layer helpers ---------------------------------

def _conv2d(x, w, b, *, stride=1, relu=False, out_dtype=jnp.bfloat16):
    """'same' Conv2d + bias (+ ReLU), no BN.  x is bf16 NHWC."""
    n = x.shape[0]
    kh, kw, cin, cout = w.shape
    x2d, ho, wo = _im2col(x, kh, kw, stride)
    m = x2d.shape[0]
    y, _, _ = _conv_pallas(x2d, w.reshape(kh * kw * cin, cout), b,
                           relu=relu, out_dtype=out_dtype)
    return y[:m].reshape(n, ho, wo, cout)


def _conv2d_bn(x, w, b, gamma, beta, *, residual=None, relu=True):
    """'same' Conv2d + train-mode BatchNorm2d (+ residual + ReLU).  x is bf16 NHWC;
    output is bf16 NHWC."""
    n = x.shape[0]
    kh, kw, cin, cout = w.shape
    x2d, ho, wo = _im2col(x, kh, kw, 1)
    m = x2d.shape[0]
    y, parts, m_pad, tm = _conv_pallas(x2d, w.reshape(kh * kw * cin, cout), b,
                                       collect_stats=True)

    # Finalize batch stats from per-tile partials and fold the BN affine into a
    # per-channel scale/shift (2*Cout scalars, done in plain JAX).
    tot = jnp.sum(parts, axis=0)                         # (2, Cout) f32
    inv_m = 1.0 / float(m)
    mean_nb = tot[0] * inv_m                             # mean of bias-free conv
    var = tot[1] * inv_m - mean_nb * mean_nb             # bias shift leaves var unchanged
    mean = mean_nb + b.astype(jnp.float32)               # mean including the conv bias
    rstd = jax.lax.rsqrt(var + _EPS)
    scale = gamma.astype(jnp.float32) * rstd
    shift = beta.astype(jnp.float32) - mean * scale

    r2d = None
    if residual is not None:
        r2d = residual.reshape(m, cout)
        if m_pad != m:
            r2d = jnp.pad(r2d, ((0, m_pad - m), (0, 0)))

    out = _bn_epilogue(y, scale, shift, tm, residual2d=r2d, relu=relu)
    return out[:m].reshape(n, ho, wo, cout)


# ----------------------------- Encoder forward --------------------------------

def encoder_forward(params, b_n_nchw, f_n_1=None, blocks=4):
    assert b_n_nchw.ndim == 4, "Input blurry frame should be in 4 dims!"
    x = jnp.transpose(b_n_nchw, (0, 2, 3, 1)).astype(jnp.bfloat16)   # NCHW -> NHWC bf16

    # feature_extract: Conv5x5 s1 p2 + ReLU, Conv3x3 s2 p1 + ReLU
    x = _conv2d(x, params['fe1_w'], params['fe1_b'], stride=1, relu=True)
    feats = _conv2d(x, params['fe2_w'], params['fe2_b'], stride=2, relu=True)
    half = feats.shape[-1]

    if f_n_1 is None:
        # Zero channels contribute exactly nothing to conv1 of the first block;
        # only the residual path needs the concatenated tensor.
        x_cat = jnp.concatenate([feats, jnp.zeros_like(feats)], axis=-1)
        first_input, first_in_ch = feats, half
    else:
        f_prev = jnp.transpose(f_n_1, (0, 2, 3, 1)).astype(jnp.bfloat16)
        x_cat = jnp.concatenate([feats, f_prev], axis=-1)
        first_input, first_in_ch = x_cat, x_cat.shape[-1]

    x = x_cat
    for i in range(blocks):
        p = params['blocks'][i]
        if i == 0:
            c1_in = first_input
            c1_w = p['c1_w'][:, :, :first_in_ch, :]
        else:
            c1_in = x
            c1_w = p['c1_w']
        out = _conv2d_bn(c1_in, c1_w, p['c1_b'], p['bn1_g'], p['bn1_b'], relu=True)
        x = _conv2d_bn(out, p['c2_w'], p['c2_b'], p['bn2_g'], p['bn2_b'],
                       residual=x, relu=True)

    h = _conv2d(x, params['ff_w'], params['ff_b'], stride=1, relu=False,
                out_dtype=jnp.float32)
    return jnp.transpose(h, (0, 3, 1, 2))                 # NHWC -> NCHW (f32)


# -------------------------- deterministic parameters --------------------------

def init_params(key, in_ch, inner, blocks):
    keys = iter(jax.random.split(key, 64))

    def conv_w(cin, cout, k):
        fan_in = k * k * cin
        return jax.random.normal(next(keys), (k, k, cin, cout),
                                 jnp.float32) * (2.0 / fan_in) ** 0.5

    def conv_b(cout):
        return jax.random.normal(next(keys), (cout,), jnp.float32) * 0.01

    params = {
        'fe1_w': conv_w(in_ch, inner, 5), 'fe1_b': conv_b(inner),
        'fe2_w': conv_w(inner, inner // 2, 3), 'fe2_b': conv_b(inner // 2),
        'blocks': [],
        'ff_w': conv_w(inner, inner, 3), 'ff_b': conv_b(inner),
    }
    for _ in range(blocks):
        params['blocks'].append(dict(
            c1_w=conv_w(inner, inner, 3), c1_b=conv_b(inner),
            bn1_g=1.0 + 0.1 * jax.random.normal(next(keys), (inner,), jnp.float32),
            bn1_b=0.1 * jax.random.normal(next(keys), (inner,), jnp.float32),
            c2_w=conv_w(inner, inner, 3), c2_b=conv_b(inner),
            bn2_g=1.0 + 0.1 * jax.random.normal(next(keys), (inner,), jnp.float32),
            bn2_b=0.1 * jax.random.normal(next(keys), (inner,), jnp.float32),
        ))
    return params


# --------------------------- pure-JAX reference -------------------------------
# Same precision policy as the kernels (bf16 patches/weights/stored activations,
# f32 accumulation and BN math) expressed with plain JAX ops, so the comparison
# isolates kernel correctness rather than algorithm-level bf16 drift.

def _ref_conv(x_bf16, w, b, stride=1):
    kh, kw, cin, cout = w.shape
    x2d, ho, wo = _im2col(x_bf16, kh, kw, stride)
    y = jnp.dot(x2d, w.reshape(kh * kw * cin, cout).astype(jnp.bfloat16),
                preferred_element_type=jnp.float32)
    y = y + b.astype(jnp.float32)
    return y.reshape(x_bf16.shape[0], ho, wo, cout)


def _ref_conv_bn(x_bf16, w, b, gamma, beta, residual=None, relu=True, eps=_EPS):
    y = _ref_conv(x_bf16, w, b, 1)                              # f32
    mean = y.mean(axis=(0, 1, 2))
    var = ((y - mean) ** 2).mean(axis=(0, 1, 2))
    y_bf = y.astype(jnp.bfloat16).astype(jnp.float32)           # stored activation is bf16
    out = (y_bf - mean) * jax.lax.rsqrt(var + eps) * gamma + beta
    if residual is not None:
        out = out + residual.astype(jnp.float32)
    if relu:
        out = jnp.maximum(out, 0.0)
    return out.astype(jnp.bfloat16)


def ref_encoder(params, b_n, blocks=4):
    x = jnp.transpose(b_n, (0, 2, 3, 1)).astype(jnp.bfloat16)
    x = jnp.maximum(_ref_conv(x, params['fe1_w'], params['fe1_b'], 1),
                    0.0).astype(jnp.bfloat16)
    x = jnp.maximum(_ref_conv(x, params['fe2_w'], params['fe2_b'], 2),
                    0.0).astype(jnp.bfloat16)
    x = jnp.concatenate([x, jnp.zeros_like(x)], axis=-1)
    for i in range(blocks):
        p = params['blocks'][i]
        out = _ref_conv_bn(x, p['c1_w'], p['c1_b'], p['bn1_g'], p['bn1_b'])
        x = _ref_conv_bn(out, p['c2_w'], p['c2_b'], p['bn2_g'], p['bn2_b'],
                         residual=x)
    y = _ref_conv(x, params['ff_w'], params['ff_b'], 1)         # f32
    return jnp.transpose(y, (0, 3, 1, 2))


# ----------------------------------- main --------------------------------------

if __name__ == "__main__":
    in_ch, inner, blocks = 3, 32, 4
    key = jax.random.PRNGKey(0)
    pkey, xkey = jax.random.split(key)

    params = init_params(pkey, in_ch, inner, blocks)
    b_n = jax.random.normal(xkey, (2, in_ch, 16, 16), jnp.float32)   # NCHW input

    fwd = jax.jit(encoder_forward, static_argnames=("blocks",))
    h_n = jax.block_until_ready(fwd(params, b_n, blocks=blocks))

    assert h_n.shape == (2, inner, 8, 8), h_n.shape
    ref = ref_encoder(params, b_n, blocks=blocks)
    np.testing.assert_allclose(np.asarray(h_n), np.asarray(ref),
                               rtol=1e-2, atol=1e-2)
    print("KERNEL_OK")
</pallas_src>

<mosaic_0001>
module attributes {stable_mosaic.version = 11 : i64} {
  func.func @_conv_bias_kernel(%arg0: i32, %arg1: memref<512x75xbf16, #tpu.memory_space<vmem>>, %arg2: memref<75x32xbf16, #tpu.memory_space<vmem>>, %arg3: memref<1x32xf32, #tpu.memory_space<vmem>>, %arg4: memref<512x32xbf16, #tpu.memory_space<vmem>>) attributes {dimension_semantics = [#tpu.dimension_semantics<parallel>], iteration_bounds = array<i64: 1>, scalar_prefetch = 0 : i64, scratch_operands = 0 : i64, tpu.core_type = #tpu.core_type<tc>, window_params = [{transform_indices = @transform_0, window_bounds = array<i64: 512, 75>}, {pipeline_mode = #tpu.pipeline_mode<synchronous>, transform_indices = @transform_1, window_bounds = array<i64: 75, 32>}, {pipeline_mode = #tpu.pipeline_mode<synchronous>, transform_indices = @transform_2, window_bounds = array<i64: 1, 32>}, {transform_indices = @transform_3, window_bounds = array<i64: 512, 32>}]} {
    %c0 = arith.constant 0 : index
    %c0_0 = arith.constant 0 : index
    %0 = vector.load %arg1[%c0, %c0_0] : memref<512x75xbf16, #tpu.memory_space<vmem>>, vector<512x75xbf16>
    %c0_1 = arith.constant 0 : index
    %c0_2 = arith.constant 0 : index
    %1 = vector.load %arg2[%c0_1, %c0_2] : memref<75x32xbf16, #tpu.memory_space<vmem>>, vector<75x32xbf16>
    %cst = arith.constant dense<0.000000e+00> : vector<512x32xf32>
    %2 = tpu.matmul %0, %1, %cst {dimension_numbers = #tpu.dot_dimension_numbers<[1], [0], [0], [1], [0, 0, 1, 1], [], []>} : vector<512x75xbf16>, vector<75x32xbf16>, vector<512x32xf32> -> vector<512x32xf32>
    %c0_3 = arith.constant 0 : index
    %c0_4 = arith.constant 0 : index
    %3 = vector.load %arg3[%c0_3, %c0_4] : memref<1x32xf32, #tpu.memory_space<vmem>>, vector<1x32xf32>
    %4 = vector.broadcast %3 : vector<1x32xf32> to vector<512x32xf32>
    %5 = arith.addf %2, %4 : vector<512x32xf32>
    %cst_5 = arith.constant 0.000000e+00 : f32
    %6 = vector.broadcast %cst_5 : f32 to vector<512x32xf32>
    %7 = arith.maximumf %5, %6 : vector<512x32xf32>
    %8 = arith.truncf %7 : vector<512x32xf32> to vector<512x32xbf16>
    %c0_6 = arith.constant 0 : index
    %c0_7 = arith.constant 0 : index
    %9 = vector.load %arg4[%c0_6, %c0_7] : memref<512x32xbf16, #tpu.memory_space<vmem>>, vector<512x32xbf16>
    tpu.vector_store %arg4[%c0_6, %c0_7], %8 {strides = array<i32>} : memref<512x32xbf16, #tpu.memory_space<vmem>>, vector<512x32xbf16>,
    return
  }
  func.func @transform_0(%arg0: i32) -> (i32, i32) {
    %c0_i32 = arith.constant 0 : i32
    %c0_i32_0 = arith.constant 0 : i32
    return %arg0, %c0_i32 : i32, i32
  }
  func.func @transform_1(%arg0: i32) -> (i32, i32) {
    %c0_i32 = arith.constant 0 : i32
    %c0_i32_0 = arith.constant 0 : i32
    %c0_i32_1 = arith.constant 0 : i32
    return %c0_i32, %c0_i32_0 : i32, i32
  }
  func.func @transform_2(%arg0: i32) -> (i32, i32) {
    %c0_i32 = arith.constant 0 : i32
    %c0_i32_0 = arith.constant 0 : i32
    %c0_i32_1 = arith.constant 0 : i32
    return %c0_i32, %c0_i32_0 : i32, i32
  }
  func.func @transform_3(%arg0: i32) -> (i32, i32) {
    %c0_i32 = arith.constant 0 : i32
    %c0_i32_0 = arith.constant 0 : i32
    return %arg0, %c0_i32 : i32, i32
  }
}

module attributes {stable_mosaic.version = 11 : i64} {
  func.func @_conv_bias_kernel(%arg0: i32, %arg1: memref<128x288xbf16, #tpu.memory_space<vmem>>, %arg2: memref<288x16xbf16, #tpu.memory_space<vmem>>, %arg3: memref<1x16xf32, #tpu.memory_space<vmem>>, %arg4: memref<128x16xbf16, #tpu.memory_space<vmem>>) attributes {dimension_semantics = [#tpu.dimension_semantics<parallel>], iteration_bounds = array<i64: 1>, scalar_prefetch = 0 : i64, scratch_operands = 0 : i64, tpu.core_type = #tpu.core_type<tc>, window_params = [{transform_indices = @transform_0, window_bounds = array<i64: 128, 288>}, {pipeline_mode = #tpu.pipeline_mode<synchronous>, transform_indices = @transform_1, window_bounds = array<i64: 288, 16>}, {pipeline_mode = #tpu.pipeline_mode<synchronous>, transform_indices = @transform_2, window_bounds = array<i64: 1, 16>}, {transform_indices = @transform_3, window_bounds = array<i64: 128, 16>}]} {
    %c0 = arith.constant 0 : index
    %c0_0 = arith.constant 0 : index
    %0 = vector.load %arg1[%c0, %c0_0] : memref<128x288xbf16, #tpu.memory_space<vmem>>, vector<128x288xbf16>
    %c0_1 = arith.constant 0 : index
    %c0_2 = arith.constant 0 : index
    %1 = vector.load %arg2[%c0_1, %c0_2] : memref<288x16xbf16, #tpu.memory_space<vmem>>, vector<288x16xbf16>
    %cst = arith.constant dense<0.000000e+00> : vector<128x16xf32>
    %2 = tpu.matmul %0, %1, %cst {dimension_numbers = #tpu.dot_dimension_numbers<[1], [0], [0], [1], [0, 0, 1, 1], [], []>} : vector<128x288xbf16>, vector<288x16xbf16>, vector<128x16xf32> -> vector<128x16xf32>
    %c0_3 = arith.constant 0 : index
    %c0_4 = arith.constant 0 : index
    %3 = vector.load %arg3[%c0_3, %c0_4] : memref<1x16xf32, #tpu.memory_space<vmem>>, vector<1x16xf32>
    %4 = vector.broadcast %3 : vector<1x16xf32> to vector<128x16xf32>
    %5 = arith.addf %2, %4 : vector<128x16xf32>
    %cst_5 = arith.constant 0.000000e+00 : f32
    %6 = vector.broadcast %cst_5 : f32 to vector<128x16xf32>
    %7 = arith.maximumf %5, %6 : vector<128x16xf32>
    %8 = arith.truncf %7 : vector<128x16xf32> to vector<128x16xbf16>
    %c0_6 = arith.constant 0 : index
    %c0_7 = arith.constant 0 : index
    %9 = vector.load %arg4[%c0_6, %c0_7] : memref<128x16xbf16, #tpu.memory_space<vmem>>, vector<128x16xbf16>
    tpu.vector_store %arg4[%c0_6, %c0_7], %8 {strides = array<i32>} : memref<128x16xbf16, #tpu.memory_space<vmem>>, vector<128x16xbf16>,
    return
  }
  func.func @transform_0(%arg0: i32) -> (i32, i32) {
    %c0_i32 = arith.constant 0 : i32
    %c0_i32_0 = arith.constant 0 : i32
    return %arg0, %c0_i32 : i32, i32
  }
  func.func @transform_1(%arg0: i32) -> (i32, i32) {
    %c0_i32 = arith.constant 0 : i32
    %c0_i32_0 = arith.constant 0 : i32
    %c0_i32_1 = arith.constant 0 : i32
    return %c0_i32, %c0_i32_0 : i32, i32
  }
  func.func @transform_2(%arg0: i32) -> (i32, i32) {
    %c0_i32 = arith.constant 0 : i32
    %c0_i32_0 = arith.constant 0 : i32
    %c0_i32_1 = arith.constant 0 : i32
    return %c0_i32, %c0_i32_0 : i32, i32
  }
  func.func @transform_3(%arg0: i32) -> (i32, i32) {
    %c0_i32 = arith.constant 0 : i32
    %c0_i32_0 = arith.constant 0 : i32
    return %arg0, %c0_i32 : i32, i32
  }
}

module attributes {stable_mosaic.version = 11 : i64} {
  func.func @_conv_stats_kernel(%arg0: i32, %arg1: memref<128x144xbf16, #tpu.memory_space<vmem>>, %arg2: memref<144x32xbf16, #tpu.memory_space<vmem>>, %arg3: memref<1x32xf32, #tpu.memory_space<vmem>>, %arg4: memref<128x32xbf16, #tpu.memory_space<vmem>>, %arg5: memref<1x2x32xf32, #tpu.memory_space<vmem>>) attributes {dimension_semantics = [#tpu.dimension_semantics<parallel>], iteration_bounds = array<i64: 1>, scalar_prefetch = 0 : i64, scratch_operands = 0 : i64, tpu.core_type = #tpu.core_type<tc>, window_params = [{transform_indices = @transform_0, window_bounds = array<i64: 128, 144>}, {pipeline_mode = #tpu.pipeline_mode<synchronous>, transform_indices = @transform_1, window_bounds = array<i64: 144, 32>}, {pipeline_mode = #tpu.pipeline_mode<synchronous>, transform_indices = @transform_2, window_bounds = array<i64: 1, 32>}, {transform_indices = @transform_3, window_bounds = array<i64: 128, 32>}, {transform_indices = @transform_4, window_bounds = array<i64: 1, 2, 32>}]} {
    %c0 = arith.constant 0 : index
    %c0_0 = arith.constant 0 : index
    %0 = vector.load %arg1[%c0, %c0_0] : memref<128x144xbf16, #tpu.memory_space<vmem>>, vector<128x144xbf16>
    %c0_1 = arith.constant 0 : index
    %c0_2 = arith.constant 0 : index
    %1 = vector.load %arg2[%c0_1, %c0_2] : memref<144x32xbf16, #tpu.memory_space<vmem>>, vector<144x32xbf16>
    %cst = arith.constant dense<0.000000e+00> : vector<128x32xf32>
    %2 = tpu.matmul %0, %1, %cst {dimension_numbers = #tpu.dot_dimension_numbers<[1], [0], [0], [1], [0, 0, 1, 1], [], []>} : vector<128x144xbf16>, vector<144x32xbf16>, vector<128x32xf32> -> vector<128x32xf32>
    %cst_3 = arith.constant dense<0.000000e+00> : vector<32xf32>
    %3 = vector.multi_reduction <add>, %2, %cst_3 [0] : vector<128x32xf32> to vector<32xf32>
    %4 = vector.shape_cast %3 : vector<32xf32> to vector<1x32xf32>
    %5 = arith.mulf %2, %2 : vector<128x32xf32>
    %cst_4 = arith.constant dense<0.000000e+00> : vector<32xf32>
    %6 = vector.multi_reduction <add>, %5, %cst_4 [0] : vector<128x32xf32> to vector<32xf32>
    %7 = vector.shape_cast %6 : vector<32xf32> to vector<1x32xf32>
    %8 = tpu.concatenate %4, %7 in 0 : vector<1x32xf32>, vector<1x32xf32> -> vector<2x32xf32>
    %c0_5 = arith.constant 0 : index
    %c0_6 = arith.constant 0 : index
    %c0_7 = arith.constant 0 : index
    %9 = vector.load %arg5[%c0_5, %c0_6, %c0_7] : memref<1x2x32xf32, #tpu.memory_space<vmem>>, vector<1x2x32xf32>
    %10 = vector.shape_cast %9 : vector<1x2x32xf32> to vector<2x32xf32>
    %11 = vector.shape_cast %8 : vector<2x32xf32> to vector<1x2x32xf32>
    tpu.vector_store %arg5[%c0_5, %c0_6, %c0_7], %11 {strides = array<i32>} : memref<1x2x32xf32, #tpu.memory_space<vmem>>, vector<1x2x32xf32>,
    %c0_8 = arith.constant 0 : index
    %c0_9 = arith.constant 0 : index
    %12 = vector.load %arg3[%c0_8, %c0_9] : memref<1x32xf32, #tpu.memory_space<vmem>>, vector<1x32xf32>
    %13 = vector.broadcast %12 : vector<1x32xf32> to vector<128x32xf32>
    %14 = arith.addf %2, %13 : vector<128x32xf32>
    %15 = arith.truncf %14 : vector<128x32xf32> to vector<128x32xbf16>
    %c0_10 = arith.constant 0 : index
    %c0_11 = arith.constant 0 : index
    %16 = vector.load %arg4[%c0_10, %c0_11] : memref<128x32xbf16, #tpu.memory_space<vmem>>, vector<128x32xbf16>
    tpu.vector_store %arg4[%c0_10, %c0_11], %15 {strides = array<i32>} : memref<128x32xbf16, #tpu.memory_space<vmem>>, vector<128x32xbf16>,
    return
  }
  func.func @transform_0(%arg0: i32) -> (i32, i32) {
    %c0_i32 = arith.constant 0 : i32
    %c0_i32_0 = arith.constant 0 : i32
    return %arg0, %c0_i32 : i32, i32
  }
  func.func @transform_1(%arg0: i32) -> (i32, i32) {
    %c0_i32 = arith.constant 0 : i32
    %c0_i32_0 = arith.constant 0 : i32
    %c0_i32_1 = arith.constant 0 : i32
    return %c0_i32, %c0_i32_0 : i32, i32
  }
  func.func @transform_2(%arg0: i32) -> (i32, i32) {
    %c0_i32 = arith.constant 0 : i32
    %c0_i32_0 = arith.constant 0 : i32
    %c0_i32_1 = arith.constant 0 : i32
    return %c0_i32, %c0_i32_0 : i32, i32
  }
  func.func @transform_3(%arg0: i32) -> (i32, i32) {
    %c0_i32 = arith.constant 0 : i32
    %c0_i32_0 = arith.constant 0 : i32
    return %arg0, %c0_i32 : i32, i32
  }
  func.func @transform_4(%arg0: i32) -> (i32, i32, i32) {
    %c0_i32 = arith.constant 0 : i32
    %c0_i32_0 = arith.constant 0 : i32
    %c0_i32_1 = arith.constant 0 : i32
    return %arg0, %c0_i32, %c0_i32_0 : i32, i32, i32
  }
}

module attributes {stable_mosaic.version = 11 : i64} {
  func.func @_bn_epilogue_kernel(%arg0: i32, %arg1: memref<32x128xbf16, #tpu.memory_space<vmem>>, %arg2: memref<2x128xf32, #tpu.memory_space<vmem>>, %arg3: memref<32x128xbf16, #tpu.memory_space<vmem>>) attributes {dimension_semantics = [#tpu.dimension_semantics<parallel>], iteration_bounds = array<i64: 1>, scalar_prefetch = 0 : i64, scratch_operands = 0 : i64, tpu.core_type = #tpu.core_type<tc>, window_params = [{transform_indices = @transform_0, window_bounds = array<i64: 32, 128>}, {pipeline_mode = #tpu.pipeline_mode<synchronous>, transform_indices = @transform_1, window_bounds = array<i64: 2, 128>}, {transform_indices = @transform_2, window_bounds = array<i64: 32, 128>}]} {
    %c0 = arith.constant 0 : index
    %c0_0 = arith.constant 0 : index
    %0 = vector.load %arg2[%c0, %c0_0] : memref<2x128xf32, #tpu.memory_space<vmem>>, vector<1x128xf32>
    %c1 = arith.constant 1 : index
    %c0_1 = arith.constant 0 : index
    %1 = vector.load %arg2[%c1, %c0_1] : memref<2x128xf32, #tpu.memory_space<vmem>>, vector<1x128xf32>
    %c0_2 = arith.constant 0 : index
    %c0_3 = arith.constant 0 : index
    %2 = vector.load %arg1[%c0_2, %c0_3] : memref<32x128xbf16, #tpu.memory_space<vmem>>, vector<32x128xbf16>
    %3 = arith.extf %2 : vector<32x128xbf16> to vector<32x128xf32>
    %4 = vector.broadcast %0 : vector<1x128xf32> to vector<32x128xf32>
    %5 = arith.mulf %3, %4 : vector<32x128xf32>
    %6 = vector.broadcast %1 : vector<1x128xf32> to vector<32x128xf32>
    %7 = arith.addf %5, %6 : vector<32x128xf32>
    %cst = arith.constant 0.000000e+00 : f32
    %8 = vector.broadcast %cst : f32 to vector<32x128xf32>
    %9 = arith.maximumf %7, %8 : vector<32x128xf32>
    %10 = arith.truncf %9 : vector<32x128xf32> to vector<32x128xbf16>
    %c0_4 = arith.constant 0 : index
    %c0_5 = arith.constant 0 : index
    %11 = vector.load %arg3[%c0_4, %c0_5] : memref<32x128xbf16, #tpu.memory_space<vmem>>, vector<32x128xbf16>
    tpu.vector_store %arg3[%c0_4, %c0_5], %10 {strides = array<i32>} : memref<32x128xbf16, #tpu.memory_space<vmem>>, vector<32x128xbf16>,
    return
  }
  func.func @transform_0(%arg0: i32) -> (i32, i32) {
    %c0_i32 = arith.constant 0 : i32
    %c0_i32_0 = arith.constant 0 : i32
    return %arg0, %c0_i32 : i32, i32
  }
  func.func @transform_1(%arg0: i32) -> (i32, i32) {
    %c0_i32 = arith.constant 0 : i32
    %c0_i32_0 = arith.constant 0 : i32
    %c0_i32_1 = arith.constant 0 : i32
    return %c0_i32, %c0_i32_0 : i32, i32
  }
  func.func @transform_2(%arg0: i32) -> (i32, i32) {
    %c0_i32 = arith.constant 0 : i32
    %c0_i32_0 = arith.constant 0 : i32
    return %arg0, %c0_i32 : i32, i32
  }
}

module attributes {stable_mosaic.version = 11 : i64} {
  func.func @_conv_stats_kernel(%arg0: i32, %arg1: memref<128x288xbf16, #tpu.memory_space<vmem>>, %arg2: memref<288x32xbf16, #tpu.memory_space<vmem>>, %arg3: memref<1x32xf32, #tpu.memory_space<vmem>>, %arg4: memref<128x32xbf16, #tpu.memory_space<vmem>>, %arg5: memref<1x2x32xf32, #tpu.memory_space<vmem>>) attributes {dimension_semantics = [#tpu.dimension_semantics<parallel>], iteration_bounds = array<i64: 1>, scalar_prefetch = 0 : i64, scratch_operands = 0 : i64, tpu.core_type = #tpu.core_type<tc>, window_params = [{transform_indices = @transform_0, window_bounds = array<i64: 128, 288>}, {pipeline_mode = #tpu.pipeline_mode<synchronous>, transform_indices = @transform_1, window_bounds = array<i64: 288, 32>}, {pipeline_mode = #tpu.pipeline_mode<synchronous>, transform_indices = @transform_2, window_bounds = array<i64: 1, 32>}, {transform_indices = @transform_3, window_bounds = array<i64: 128, 32>}, {transform_indices = @transform_4, window_bounds = array<i64: 1, 2, 32>}]} {
    %c0 = arith.constant 0 : index
    %c0_0 = arith.constant 0 : index
    %0 = vector.load %arg1[%c0, %c0_0] : memref<128x288xbf16, #tpu.memory_space<vmem>>, vector<128x288xbf16>
    %c0_1 = arith.constant 0 : index
    %c0_2 = arith.constant 0 : index
    %1 = vector.load %arg2[%c0_1, %c0_2] : memref<288x32xbf16, #tpu.memory_space<vmem>>, vector<288x32xbf16>
    %cst = arith.constant dense<0.000000e+00> : vector<128x32xf32>
    %2 = tpu.matmul %0, %1, %cst {dimension_numbers = #tpu.dot_dimension_numbers<[1], [0], [0], [1], [0, 0, 1, 1], [], []>} : vector<128x288xbf16>, vector<288x32xbf16>, vector<128x32xf32> -> vector<128x32xf32>
    %cst_3 = arith.constant dense<0.000000e+00> : vector<32xf32>
    %3 = vector.multi_reduction <add>, %2, %cst_3 [0] : vector<128x32xf32> to vector<32xf32>
    %4 = vector.shape_cast %3 : vector<32xf32> to vector<1x32xf32>
    %5 = arith.mulf %2, %2 : vector<128x32xf32>
    %cst_4 = arith.constant dense<0.000000e+00> : vector<32xf32>
    %6 = vector.multi_reduction <add>, %5, %cst_4 [0] : vector<128x32xf32> to vector<32xf32>
    %7 = vector.shape_cast %6 : vector<32xf32> to vector<1x32xf32>
    %8 = tpu.concatenate %4, %7 in 0 : vector<1x32xf32>, vector<1x32xf32> -> vector<2x32xf32>
    %c0_5 = arith.constant 0 : index
    %c0_6 = arith.constant 0 : index
    %c0_7 = arith.constant 0 : index
    %9 = vector.load %arg5[%c0_5, %c0_6, %c0_7] : memref<1x2x32xf32, #tpu.memory_space<vmem>>, vector<1x2x32xf32>
    %10 = vector.shape_cast %9 : vector<1x2x32xf32> to vector<2x32xf32>
    %11 = vector.shape_cast %8 : vector<2x32xf32> to vector<1x2x32xf32>
    tpu.vector_store %arg5[%c0_5, %c0_6, %c0_7], %11 {strides = array<i32>} : memref<1x2x32xf32, #tpu.memory_space<vmem>>, vector<1x2x32xf32>,
    %c0_8 = arith.constant 0 : index
    %c0_9 = arith.constant 0 : index
    %12 = vector.load %arg3[%c0_8, %c0_9] : memref<1x32xf32, #tpu.memory_space<vmem>>, vector<1x32xf32>
    %13 = vector.broadcast %12 : vector<1x32xf32> to vector<128x32xf32>
    %14 = arith.addf %2, %13 : vector<128x32xf32>
    %15 = arith.truncf %14 : vector<128x32xf32> to vector<128x32xbf16>
    %c0_10 = arith.constant 0 : index
    %c0_11 = arith.constant 0 : index
    %16 = vector.load %arg4[%c0_10, %c0_11] : memref<128x32xbf16, #tpu.memory_space<vmem>>, vector<128x32xbf16>
    tpu.vector_store %arg4[%c0_10, %c0_11], %15 {strides = array<i32>} : memref<128x32xbf16, #tpu.memory_space<vmem>>, vector<128x32xbf16>,
    return
  }
  func.func @transform_0(%arg0: i32) -> (i32, i32) {
    %c0_i32 = arith.constant 0 : i32
    %c0_i32_0 = arith.constant 0 : i32
    return %arg0, %c0_i32 : i32, i32
  }
  func.func @transform_1(%arg0: i32) -> (i32, i32) {
    %c0_i32 = arith.constant 0 : i32
    %c0_i32_0 = arith.constant 0 : i32
    %c0_i32_1 = arith.constant 0 : i32
    return %c0_i32, %c0_i32_0 : i32, i32
  }
  func.func @transform_2(%arg0: i32) -> (i32, i32) {
    %c0_i32 = arith.constant 0 : i32
    %c0_i32_0 = arith.constant 0 : i32
    %c0_i32_1 = arith.constant 0 : i32
    return %c0_i32, %c0_i32_0 : i32, i32
  }
  func.func @transform_3(%arg0: i32) -> (i32, i32) {
    %c0_i32 = arith.constant 0 : i32
    %c0_i32_0 = arith.constant 0 : i32
    return %arg0, %c0_i32 : i32, i32
  }
  func.func @transform_4(%arg0: i32) -> (i32, i32, i32) {
    %c0_i32 = arith.constant 0 : i32
    %c0_i32_0 = arith.constant 0 : i32
    %c0_i32_1 = arith.constant 0 : i32
    return %arg0, %c0_i32, %c0_i32_0 : i32, i32, i32
  }
}

module attributes {stable_mosaic.version = 11 : i64} {
  func.func @_bn_epilogue_kernel(%arg0: i32, %arg1: memref<32x128xbf16, #tpu.memory_space<vmem>>, %arg2: memref<2x128xf32, #tpu.memory_space<vmem>>, %arg3: memref<32x128xbf16, #tpu.memory_space<vmem>>, %arg4: memref<32x128xbf16, #tpu.memory_space<vmem>>) attributes {dimension_semantics = [#tpu.dimension_semantics<parallel>], iteration_bounds = array<i64: 1>, scalar_prefetch = 0 : i64, scratch_operands = 0 : i64, tpu.core_type = #tpu.core_type<tc>, window_params = [{transform_indices = @transform_0, window_bounds = array<i64: 32, 128>}, {pipeline_mode = #tpu.pipeline_mode<synchronous>, transform_indices = @transform_1, window_bounds = array<i64: 2, 128>}, {transform_indices = @transform_2, window_bounds = array<i64: 32, 128>}, {transform_indices = @transform_3, window_bounds = array<i64: 32, 128>}]} {
    %c0 = arith.constant 0 : index
    %c0_0 = arith.constant 0 : index
    %0 = vector.load %arg2[%c0, %c0_0] : memref<2x128xf32, #tpu.memory_space<vmem>>, vector<1x128xf32>
    %c1 = arith.constant 1 : index
    %c0_1 = arith.constant 0 : index
    %1 = vector.load %arg2[%c1, %c0_1] : memref<2x128xf32, #tpu.memory_space<vmem>>, vector<1x128xf32>
    %c0_2 = arith.constant 0 : index
    %c0_3 = arith.constant 0 : index
    %2 = vector.load %arg1[%c0_2, %c0_3] : memref<32x128xbf16, #tpu.memory_space<vmem>>, vector<32x128xbf16>
    %3 = arith.extf %2 : vector<32x128xbf16> to vector<32x128xf32>
    %4 = vector.broadcast %0 : vector<1x128xf32> to vector<32x128xf32>
    %5 = arith.mulf %3, %4 : vector<32x128xf32>
    %6 = vector.broadcast %1 : vector<1x128xf32> to vector<32x128xf32>
    %7 = arith.addf %5, %6 : vector<32x128xf32>
    %c0_4 = arith.constant 0 : index
    %c0_5 = arith.constant 0 : index
    %8 = vector.load %arg3[%c0_4, %c0_5] : memref<32x128xbf16, #tpu.memory_space<vmem>>, vector<32x128xbf16>
    %9 = arith.extf %8 : vector<32x128xbf16> to vector<32x128xf32>
    %10 = arith.addf %7, %9 : vector<32x128xf32>
    %cst = arith.constant 0.000000e+00 : f32
    %11 = vector.broadcast %cst : f32 to vector<32x128xf32>
    %12 = arith.maximumf %10, %11 : vector<32x128xf32>
    %13 = arith.truncf %12 : vector<32x128xf32> to vector<32x128xbf16>
    %c0_6 = arith.constant 0 : index
    %c0_7 = arith.constant 0 : index
    %14 = vector.load %arg4[%c0_6, %c0_7] : memref<32x128xbf16, #tpu.memory_space<vmem>>, vector<32x128xbf16>
    tpu.vector_store %arg4[%c0_6, %c0_7], %13 {strides = array<i32>} : memref<32x128xbf16, #tpu.memory_space<vmem>>, vector<32x128xbf16>,
    return
  }
  func.func @transform_0(%arg0: i32) -> (i32, i32) {
    %c0_i32 = arith.constant 0 : i32
    %c0_i32_0 = arith.constant 0 : i32
    return %arg0, %c0_i32 : i32, i32
  }
  func.func @transform_1(%arg0: i32) -> (i32, i32) {
    %c0_i32 = arith.constant 0 : i32
    %c0_i32_0 = arith.constant 0 : i32
    %c0_i32_1 = arith.constant 0 : i32
    return %c0_i32, %c0_i32_0 : i32, i32
  }
  func.func @transform_2(%arg0: i32) -> (i32, i32) {
    %c0_i32 = arith.constant 0 : i32
    %c0_i32_0 = arith.constant 0 : i32
    return %arg0, %c0_i32 : i32, i32
  }
  func.func @transform_3(%arg0: i32) -> (i32, i32) {
    %c0_i32 = arith.constant 0 : i32
    %c0_i32_0 = arith.constant 0 : i32
    return %arg0, %c0_i32 : i32, i32
  }
}

module attributes {stable_mosaic.version = 11 : i64} {
  func.func @_conv_bias_kernel(%arg0: i32, %arg1: memref<128x288xbf16, #tpu.memory_space<vmem>>, %arg2: memref<288x32xbf16, #tpu.memory_space<vmem>>, %arg3: memref<1x32xf32, #tpu.memory_space<vmem>>, %arg4: memref<128x32xf32, #tpu.memory_space<vmem>>) attributes {dimension_semantics = [#tpu.dimension_semantics<parallel>], iteration_bounds = array<i64: 1>, scalar_prefetch = 0 : i64, scratch_operands = 0 : i64, tpu.core_type = #tpu.core_type<tc>, window_params = [{transform_indices = @transform_0, window_bounds = array<i64: 128, 288>}, {pipeline_mode = #tpu.pipeline_mode<synchronous>, transform_indices = @transform_1, window_bounds = array<i64: 288, 32>}, {pipeline_mode = #tpu.pipeline_mode<synchronous>, transform_indices = @transform_2, window_bounds = array<i64: 1, 32>}, {transform_indices = @transform_3, window_bounds = array<i64: 128, 32>}]} {
    %c0 = arith.constant 0 : index
    %c0_0 = arith.constant 0 : index
    %0 = vector.load %arg1[%c0, %c0_0] : memref<128x288xbf16, #tpu.memory_space<vmem>>, vector<128x288xbf16>
    %c0_1 = arith.constant 0 : index
    %c0_2 = arith.constant 0 : index
    %1 = vector.load %arg2[%c0_1, %c0_2] : memref<288x32xbf16, #tpu.memory_space<vmem>>, vector<288x32xbf16>
    %cst = arith.constant dense<0.000000e+00> : vector<128x32xf32>
    %2 = tpu.matmul %0, %1, %cst {dimension_numbers = #tpu.dot_dimension_numbers<[1], [0], [0], [1], [0, 0, 1, 1], [], []>} : vector<128x288xbf16>, vector<288x32xbf16>, vector<128x32xf32> -> vector<128x32xf32>
    %c0_3 = arith.constant 0 : index
    %c0_4 = arith.constant 0 : index
    %3 = vector.load %arg3[%c0_3, %c0_4] : memref<1x32xf32, #tpu.memory_space<vmem>>, vector<1x32xf32>
    %4 = vector.broadcast %3 : vector<1x32xf32> to vector<128x32xf32>
    %5 = arith.addf %2, %4 : vector<128x32xf32>
    %c0_5 = arith.constant 0 : index
    %c0_6 = arith.constant 0 : index
    %6 = vector.load %arg4[%c0_5, %c0_6] : memref<128x32xf32, #tpu.memory_space<vmem>>, vector<128x32xf32>
    tpu.vector_store %arg4[%c0_5, %c0_6], %5 {strides = array<i32>} : memref<128x32xf32, #tpu.memory_space<vmem>>, vector<128x32xf32>,
    return
  }
  func.func @transform_0(%arg0: i32) -> (i32, i32) {
    %c0_i32 = arith.constant 0 : i32
    %c0_i32_0 = arith.constant 0 : i32
    return %arg0, %c0_i32 : i32, i32
  }
  func.func @transform_1(%arg0: i32) -> (i32, i32) {
    %c0_i32 = arith.constant 0 : i32
    %c0_i32_0 = arith.constant 0 : i32
    %c0_i32_1 = arith.constant 0 : i32
    return %c0_i32, %c0_i32_0 : i32, i32
  }
  func.func @transform_2(%arg0: i32) -> (i32, i32) {
    %c0_i32 = arith.constant 0 : i32
    %c0_i32_0 = arith.constant 0 : i32
    %c0_i32_1 = arith.constant 0 : i32
    return %c0_i32, %c0_i32_0 : i32, i32
  }
  func.func @transform_3(%arg0: i32) -> (i32, i32) {
    %c0_i32 = arith.constant 0 : i32
    %c0_i32_0 = arith.constant 0 : i32
    return %arg0, %c0_i32 : i32, i32
  }
}

</mosaic_0001>

<bundles_post_ra>
// kernel: encoder_forward.19
= control target key start
LH: loop header
LB: loop body
LE: loop exit
PB: predicated region body
PF: predicated region fallthrough
CT: control target
= control target key end

     0   :  { %vm382_vm0 = vcmask 1044480   ;;  %vm383_vm1 = vcmask 1045504   ;;  %vm285_vm2 = vcmask 613376   ;;  %v1424_v4 = vmov 65535   ;;  %s1913_s1 = inlined_call_operand.vmem [shape: bf16[75,32], index: 1, kind: input, shape index: {}]   ;;  %s1914_s0 = inlined_call_operand.vmem [shape: bf16[512,75], index: 0, kind: input, shape index: {}]   ;;  %s1915_s2 = inlined_call_operand.vmem [shape: f32[1,32], index: 2, kind: input, shape index: {}]   ;;  %s1916_s3 = inlined_call_operand.vmem [shape: bf16[512,32], index: 3, kind: output, shape index: {}]  }
   0x1   :  { %v1387_v0 = vld [vmem:[%s1913_s1] sm:$0xff]   ;;  %v1388_v1 = vld [vmem:[%s1913_s1 + $0x8] sm:$0xff]   ;;  %v1389_v2 = vld [vmem:[%s1913_s1 + $0x10] sm:$0xff]   ;;  %v384_v5 = vsel %vm382_vm0, 4294967295, %v1424_v4  ;;  %vm998_vm3 = vcmask 257024  }
   0x2   :  { %1302 = vmatprep.subr.bf16.mxu0 %v1387_v0  ;;  %1376 = vmatprep.subr.bf16.mxu1 %v1387_v0  ;;  %v1392_v3 = vld [vmem:[%s1914_s0] sm:$0xff]   ;;  %v1390_v7 = vld [vmem:[%s1913_s1 + $0x18] sm:$0xff]   ;;  %v385_v9 = vsel %vm383_vm1, %v384_v5, 0  ;;  %v1394_v11 = vld [vmem:[%s1914_s0 + $0x8] sm:$0xff]  }
   0x3   :  { %1303 = vmatpush3.bf16.msra.mxu0 %v1387_v0  ;;  %1381 = vmatpush3.bf16.msra.mxu1 %v1387_v0  ;;  %v1393_v6 = vld [vmem:[%s1914_s0 + $0x80] sm:$0xff]   ;;  %v1395_v12 = vld [vmem:[%s1914_s0 + $0x88] sm:$0xff]   ;;  %v1396_v13 = vld [vmem:[%s1914_s0 + $0x10] sm:$0xff]  }
   0x4   :  { %1304 = vmatprep.subr.bf16.mxu0 %v1388_v1  ;;  %1377 = vmatprep.subr.bf16.mxu1 %v1388_v1  ;;  %v1391_v8 = vld [vmem:[%s1913_s1 + $0x20] sm:$0x3f]   ;;  %v1397_v14 = vld [vmem:[%s1914_s0 + $0x90] sm:$0xff]   ;;  %v1398_v15 = vld [vmem:[%s1914_s0 + $0x18] sm:$0xff]  }
   0x5   :  { %1312 = vmatprep.mubr.msk.bf16.mxu0 %vm285_vm2, %v1392_v3  ;;  %1344 = vmatprep.mubr.msk.bf16.mxu1 %vm285_vm2, %v1393_v6  ;;  %v387_v10 = vand.u32 %v1391_v8, %v385_v9  ;;  %v1399_v16 = vld [vmem:[%s1914_s0 + $0x98] sm:$0xff]   ;;  %v1400_v17 = vld [vmem:[%s1914_s0 + $0x20] sm:$0xff]   ;;  %v1402_v19 = vld [vmem:[%s1914_s0 + $0x28] sm:$0xff]  }
   0x6   :  { %v1401_v18 = vld [vmem:[%s1914_s0 + $0xa0] sm:$0xff]   ;;  %v1403_v20 = vld [vmem:[%s1914_s0 + $0xa8] sm:$0xff]   ;;  %v1404_v21 = vld [vmem:[%s1914_s0 + $0x30] sm:$0xff]  }
   0x7   :  { %1305 = vmatpush3.bf16.msra.mxu0 %v1388_v1  ;;  %1382 = vmatpush3.bf16.msra.mxu1 %v1388_v1  ;;  %v1405_v22 = vld [vmem:[%s1914_s0 + $0xb0] sm:$0xff]   ;;  %v1406_v23 = vld [vmem:[%s1914_s0 + $0x38] sm:$0xff]   ;;  %v1408_v25 = vld [vmem:[%s1914_s0 + $0x40] sm:$0xff]  }
   0x8   :  { %1306 = vmatprep.subr.bf16.mxu0 %v1389_v2  ;;  %1378 = vmatprep.subr.bf16.mxu1 %v1389_v2  ;;  %v1407_v24 = vld [vmem:[%s1914_s0 + $0xb8] sm:$0xff]   ;;  %v1409_v26 = vld [vmem:[%s1914_s0 + $0xc0] sm:$0xff]   ;;  %v1410_v27 = vld [vmem:[%s1914_s0 + $0x48] sm:$0xff]  }
   0x9   :  { %v1411_v28 = vld [vmem:[%s1914_s0 + $0xc8] sm:$0xff]   ;;  %v1412_v29 = vld [vmem:[%s1914_s0 + $0x50] sm:$0xff]   ;;  %v1414_v31 = vld [vmem:[%s1914_s0 + $0x58] sm:$0xff]  }
   0xa   :  { %v1413_v30 = vld [vmem:[%s1914_s0 + $0xd0] sm:$0xff]   ;;  %v1415_v32 = vld [vmem:[%s1914_s0 + $0xd8] sm:$0xff]   ;;  %v1416_v33 = vld [vmem:[%s1914_s0 + $0x60] sm:$0xff]  }
   0xb   :  { %1307 = vmatpush3.bf16.msra.mxu0 %v1389_v2  ;;  %1383 = vmatpush3.bf16.msra.mxu1 %v1389_v2  ;;  %v1417_v34 = vld [vmem:[%s1914_s0 + $0xe0] sm:$0xff]   ;;  %v1418_v35 = vld [vmem:[%s1914_s0 + $0x68] sm:$0xff]   ;;  %v1420_v37 = vld [vmem:[%s1914_s0 + $0x70] sm:$0xff]  }
   0xc   :  { %1308 = vmatprep.subr.bf16.mxu0 %v1390_v7  ;;  %1379 = vmatprep.subr.bf16.mxu1 %v1390_v7  ;;  %v1419_v36 = vld [vmem:[%s1914_s0 + $0xe8] sm:$0xff]   ;;  %v1421_v38 = vld [vmem:[%s1914_s0 + $0xf0] sm:$0xff]   ;;  %v1422_v39 = vld [vmem:[%s1914_s0 + $0x78] sm:$0xff]  }
   0xd   :  { %v1423_v40 = vld [vmem:[%s1914_s0 + $0xf8] sm:$0xff]   ;;  %v1591_v41 = vld [vmem:[%s1915_s2] ss:$0 sm:$0xff] }
   0xf   :  { %1309 = vmatpush3.bf16.msra.mxu0 %v1390_v7  ;;  %1384 = vmatpush3.bf16.msra.mxu1 %v1390_v7 }
  0x10   :  { %1310 = vmatprep.subr.bf16.mxu0 %v387_v10  ;;  %1380 = vmatprep.subr.bf16.mxu1 %v387_v10 }
  0x13   :  { %1311 = vmatpush3.bf16.msra.mxu0 %v387_v10  ;;  %1385 = vmatpush3.bf16.msra.mxu1 %v387_v10 }
  0x16   :  { %1313 = vmatmul.mubr.msk.bf16.vlgmr.msra.gmra.mrb[0].mxu0 %vm285_vm2, %v1394_v11  ;;  %1345 = vmatmul.mubr.msk.bf16.vlgmr.msra.gmra.mrb[0].mxu1 %vm285_vm2, %v1395_v12 }
  0x17   :  { %1316 = vmatprep.mubr.msk.bf16.mxu0 %vm285_vm2, %v1396_v13  ;;  %1348 = vmatprep.mubr.msk.bf16.mxu1 %vm285_vm2, %v1397_v14 }
  0x1e   :  { %1317 = vmatmul.mubr.msk.bf16.gmra.mrb[4].mxu0 %vm285_vm2, %v1398_v15  ;;  %1349 = vmatmul.mubr.msk.bf16.gmra.mrb[4].mxu1 %vm285_vm2, %v1399_v16 }
  0x1f   :  { %1320 = vmatprep.mubr.msk.bf16.mxu0 %vm285_vm2, %v1400_v17  ;;  %1352 = vmatprep.mubr.msk.bf16.mxu1 %vm285_vm2, %v1401_v18 }
  0x26   :  { %1321 = vmatmul.mubr.msk.bf16.gmra.mrb[8].mxu0 %vm285_vm2, %v1402_v19  ;;  %1353 = vmatmul.mubr.msk.bf16.gmra.mrb[8].mxu1 %vm285_vm2, %v1403_v20 }
  0x27   :  { %1324 = vmatprep.mubr.msk.bf16.mxu0 %vm285_vm2, %v1404_v21  ;;  %1356 = vmatprep.mubr.msk.bf16.mxu1 %vm285_vm2, %v1405_v22 }
  0x2e   :  { %1325 = vmatmul.mubr.msk.bf16.gmra.mrb[12].mxu0 %vm285_vm2, %v1406_v23  ;;  %1357 = vmatmul.mubr.msk.bf16.gmra.mrb[12].mxu1 %vm285_vm2, %v1407_v24 }
  0x2f   :  { %1328 = vmatprep.mubr.msk.bf16.mxu0 %vm285_vm2, %v1408_v25  ;;  %1360 = vmatprep.mubr.msk.bf16.mxu1 %vm285_vm2, %v1409_v26 }
  0x36   :  { %1329 = vmatmul.mubr.msk.bf16.gmra.mrb[16].mxu0 %vm285_vm2, %v1410_v27  ;;  %1361 = vmatmul.mubr.msk.bf16.gmra.mrb[16].mxu1 %vm285_vm2, %v1411_v28 }
  0x37   :  { %1332 = vmatprep.mubr.msk.bf16.mxu0 %vm285_vm2, %v1412_v29  ;;  %1364 = vmatprep.mubr.msk.bf16.mxu1 %vm285_vm2, %v1413_v30 }
  0x3e   :  { %1333 = vmatmul.mubr.msk.bf16.gmra.mrb[20].mxu0 %vm285_vm2, %v1414_v31  ;;  %1365 = vmatmul.mubr.msk.bf16.gmra.mrb[20].mxu1 %vm285_vm2, %v1415_v32 }
  0x3f   :  { %1336 = vmatprep.mubr.msk.bf16.mxu0 %vm285_vm2, %v1416_v33  ;;  %1368 = vmatprep.mubr.msk.bf16.mxu1 %vm285_vm2, %v1417_v34 }
  0x46   :  { %1337 = vmatmul.mubr.msk.bf16.gmra.mrb[24].mxu0 %vm285_vm2, %v1418_v35  ;;  %1369 = vmatmul.mubr.msk.bf16.gmra.mrb[24].mxu1 %vm285_vm2, %v1419_v36 }
  0x47   :  { %1340 = vmatprep.mubr.msk.bf16.mxu0 %vm285_vm2, %v1420_v37  ;;  %1372 = vmatprep.mubr.msk.bf16.mxu1 %vm285_vm2, %v1421_v38 }
  0x4e   :  { %1341 = vmatmul.mubr.msk.bf16.gmra.mrb[28].mxu0 %vm285_vm2, %v1422_v39  ;;  %1373 = vmatmul.mubr.msk.bf16.gmra.mrb[28].mxu1 %vm285_vm2, %v1423_v40 }
  0xe9   :  { %v1314_v42 = vpop.f32.mrb[0].mxu0  ;;  %v1346_v43 = vpop.f32.mrb[0].mxu1 }
  0xea   :  { %v432_v44 = vadd.f32 %v1314_v42, %v1591_v41  ;;  %v560_v45 = vadd.f32 %v1346_v43, %v1591_v41  ;;  %v423_v46 = vpop.f32.mrb[1].mxu0  ;;  %v551_v47 = vpop.f32.mrb[1].mxu1 }
  0xeb   :  { %v424_v48 = vadd.f32 %v1591_v41, %v423_v46  ;;  %v552_v49 = vadd.f32 %v1591_v41, %v551_v47  ;;  %v1315_v50 = vpop.f32.mrb[2].mxu0  ;;  %v1347_v51 = vpop.f32.mrb[2].mxu1 }
  0xec   :  { %v680_v52 = vmax.f32 %v432_v44, 0.0  ;;  %v712_v53 = vmax.f32 %v560_v45, 0.0  ;;  %v435_v54 = vadd.f32 %v1315_v50, %v1591_v41  ;;  %v563_v55 = vadd.f32 %v1347_v51, %v1591_v41  ;;  %v426_v56 = vpop.f32.mrb[3].mxu0  ;;  %v554_v57 = vpop.f32.mrb[3].mxu1 }
  0xed   :  { %v678_v58 = vmax.f32 %v424_v48, 0.0  ;;  %v710_v59 = vmax.f32 %v552_v49, 0.0  ;;  %v427_v60 = vadd.f32 %v1591_v41, %v426_v56  ;;  %v555_v61 = vadd.f32 %v1591_v41, %v554_v57 }
  0xee   :  { %v1203_v62 = vpack.c.bf16 %v680_v52, %v680_v52  ;;  %v1235_v63 = vpack.c.bf16 %v712_v53, %v712_v53  ;;  %v681_v0 = vmax.f32 %v435_v54, 0.0  ;;  %v713_v1 = vmax.f32 %v563_v55, 0.0 }
  0xef   :  { %v1201_v2 = vpack.c.bf16 %v678_v58, %v678_v58  ;;  %v1233_v3 = vpack.c.bf16 %v710_v59, %v710_v59  ;;  %v679_v4 = vmax.f32 %v427_v60, 0.0  ;;  %v711_v5 = vmax.f32 %v555_v61, 0.0 }
  0xf0   :  { %1001 = vst.msk [vmem:[%s1916_s3 + $0x8] sm:$0xf] %vm998_vm3, %v1203_v62  ;;  %1033 = vst.msk [vmem:[%s1916_s3 + $0x88] sm:$0xf] %vm998_vm3, %v1235_v63  ;;  %v1204_v6 = vpack.c.bf16 %v681_v0, %v681_v0  ;;  %v1236_v7 = vpack.c.bf16 %v713_v1, %v713_v1 }
  0xf1   :  { %999 = vst.msk [vmem:[%s1916_s3] sm:$0xf] %vm998_vm3, %v1201_v2  ;;  %1031 = vst.msk [vmem:[%s1916_s3 + $0x80] sm:$0xf] %vm998_vm3, %v1233_v3  ;;  %v1202_v8 = vpack.c.bf16 %v679_v4, %v679_v4  ;;  %v1234_v9 = vpack.c.bf16 %v711_v5, %v711_v5  ;;  %v1318_v10 = vpop.f32.mrb[4].mxu0  ;;  %v1350_v11 = vpop.f32.mrb[4].mxu1 }
  0xf2   :  { %1002 = vst.msk [vmem:[%s1916_s3 + $0xc] sm:$0xf] %vm998_vm3, %v1204_v6  ;;  %1034 = vst.msk [vmem:[%s1916_s3 + $0x8c] sm:$0xf] %vm998_vm3, %v1236_v7  ;;  %v448_v12 = vadd.f32 %v1318_v10, %v1591_v41  ;;  %v576_v13 = vadd.f32 %v1350_v11, %v1591_v41  ;;  %v439_v14 = vpop.f32.mrb[5].mxu0  ;;  %v567_v15 = vpop.f32.mrb[5].mxu1 }
  0xf3   :  { %1000 = vst.msk [vmem:[%s1916_s3 + $0x4] sm:$0xf] %vm998_vm3, %v1202_v8  ;;  %1032 = vst.msk [vmem:[%s1916_s3 + $0x84] sm:$0xf] %vm998_vm3, %v1234_v9  ;;  %v440_v16 = vadd.f32 %v1591_v41, %v439_v14  ;;  %v568_v17 = vadd.f32 %v1591_v41, %v567_v15  ;;  %v1319_v18 = vpop.f32.mrb[6].mxu0  ;;  %v1351_v19 = vpop.f32.mrb[6].mxu1 }
  0xf4   :  { %v684_v20 = vmax.f32 %v448_v12, 0.0  ;;  %v716_v21 = vmax.f32 %v576_v13, 0.0  ;;  %v451_v22 = vadd.f32 %v1319_v18, %v1591_v41  ;;  %v579_v23 = vadd.f32 %v1351_v19, %v1591_v41  ;;  %v442_v24 = vpop.f32.mrb[7].mxu0  ;;  %v570_v25 = vpop.f32.mrb[7].mxu1 }
  0xf5   :  { %v682_v26 = vmax.f32 %v440_v16, 0.0  ;;  %v714_v27 = vmax.f32 %v568_v17, 0.0  ;;  %v443_v28 = vadd.f32 %v1591_v41, %v442_v24  ;;  %v571_v29 = vadd.f32 %v1591_v41, %v570_v25 }
  0xf6   :  { %v1207_v30 = vpack.c.bf16 %v684_v20, %v684_v20  ;;  %v1239_v31 = vpack.c.bf16 %v716_v21, %v716_v21  ;;  %v685_v32 = vmax.f32 %v451_v22, 0.0  ;;  %v717_v33 = vmax.f32 %v579_v23, 0.0 }
  0xf7   :  { %v1205_v34 = vpack.c.bf16 %v682_v26, %v682_v26  ;;  %v1237_v35 = vpack.c.bf16 %v714_v27, %v714_v27  ;;  %v683_v36 = vmax.f32 %v443_v28, 0.0  ;;  %v715_v37 = vmax.f32 %v571_v29, 0.0 }
  0xf8   :  { %1005 = vst.msk [vmem:[%s1916_s3 + $0x18] sm:$0xf] %vm998_vm3, %v1207_v30  ;;  %1037 = vst.msk [vmem:[%s1916_s3 + $0x98] sm:$0xf] %vm998_vm3, %v1239_v31  ;;  %v1208_v38 = vpack.c.bf16 %v685_v32, %v685_v32  ;;  %v1240_v39 = vpack.c.bf16 %v717_v33, %v717_v33 }
  0xf9   :  { %1003 = vst.msk [vmem:[%s1916_s3 + $0x10] sm:$0xf] %vm998_vm3, %v1205_v34  ;;  %1035 = vst.msk [vmem:[%s1916_s3 + $0x90] sm:$0xf] %vm998_vm3, %v1237_v35  ;;  %v1206_v40 = vpack.c.bf16 %v683_v36, %v683_v36  ;;  %v1238_v42 = vpack.c.bf16 %v715_v37, %v715_v37  ;;  %v1322_v43 = vpop.f32.mrb[8].mxu0  ;;  %v1354_v44 = vpop.f32.mrb[8].mxu1 }
  0xfa   :  { %1006 = vst.msk [vmem:[%s1916_s3 + $0x1c] sm:$0xf] %vm998_vm3, %v1208_v38  ;;  %1038 = vst.msk [vmem:[%s1916_s3 + $0x9c] sm:$0xf] %vm998_vm3, %v1240_v39  ;;  %v464_v45 = vadd.f32 %v1322_v43, %v1591_v41  ;;  %v592_v46 = vadd.f32 %v1354_v44, %v1591_v41  ;;  %v455_v47 = vpop.f32.mrb[9].mxu0  ;;  %v583_v48 = vpop.f32.mrb[9].mxu1 }
  0xfb   :  { %1004 = vst.msk [vmem:[%s1916_s3 + $0x14] sm:$0xf] %vm998_vm3, %v1206_v40  ;;  %1036 = vst.msk [vmem:[%s1916_s3 + $0x94] sm:$0xf] %vm998_vm3, %v1238_v42  ;;  %v456_v49 = vadd.f32 %v1591_v41, %v455_v47  ;;  %v584_v50 = vadd.f32 %v1591_v41, %v583_v48  ;;  %v1323_v51 = vpop.f32.mrb[10].mxu0  ;;  %v1355_v52 = vpop.f32.mrb[10].mxu1 }
  0xfc   :  { %v688_v53 = vmax.f32 %v464_v45, 0.0  ;;  %v720_v54 = vmax.f32 %v592_v46, 0.0  ;;  %v467_v55 = vadd.f32 %v1323_v51, %v1591_v41  ;;  %v595_v56 = vadd.f32 %v1355_v52, %v1591_v41  ;;  %v458_v57 = vpop.f32.mrb[11].mxu0  ;;  %v586_v58 = vpop.f32.mrb[11].mxu1 }
  0xfd   :  { %v686_v59 = vmax.f32 %v456_v49, 0.0  ;;  %v718_v60 = vmax.f32 %v584_v50, 0.0  ;;  %v459_v61 = vadd.f32 %v1591_v41, %v458_v57  ;;  %v587_v62 = vadd.f32 %v1591_v41, %v586_v58 }
  0xfe   :  { %v1211_v63 = vpack.c.bf16 %v688_v53, %v688_v53  ;;  %v1243_v0 = vpack.c.bf16 %v720_v54, %v720_v54  ;;  %v689_v1 = vmax.f32 %v467_v55, 0.0  ;;  %v721_v2 = vmax.f32 %v595_v56, 0.0 }
  0xff   :  { %v1209_v3 = vpack.c.bf16 %v686_v59, %v686_v59  ;;  %v1241_v4 = vpack.c.bf16 %v718_v60, %v718_v60  ;;  %v687_v5 = vmax.f32 %v459_v61, 0.0  ;;  %v719_v6 = vmax.f32 %v587_v62, 0.0 }
 0x100   :  { %1009 = vst.msk [vmem:[%s1916_s3 + $0x28] sm:$0xf] %vm998_vm3, %v1211_v63  ;;  %1041 = vst.msk [vmem:[%s1916_s3 + $0xa8] sm:$0xf] %vm998_vm3, %v1243_v0  ;;  %v1212_v7 = vpack.c.bf16 %v689_v1, %v689_v1  ;;  %v1244_v8 = vpack.c.bf16 %v721_v2, %v721_v2 }
 0x101   :  { %1007 = vst.msk [vmem:[%s1916_s3 + $0x20] sm:$0xf] %vm998_vm3, %v1209_v3  ;;  %1039 = vst.msk [vmem:[%s1916_s3 + $0xa0] sm:$0xf] %vm998_vm3, %v1241_v4  ;;  %v1210_v9 = vpack.c.bf16 %v687_v5, %v687_v5  ;;  %v1242_v10 = vpack.c.bf16 %v719_v6, %v719_v6  ;;  %v1326_v11 = vpop.f32.mrb[12].mxu0  ;;  %v1358_v12 = vpop.f32.mrb[12].mxu1 }
 0x102   :  { %1010 = vst.msk [vmem:[%s1916_s3 + $0x2c] sm:$0xf] %vm998_vm3, %v1212_v7  ;;  %1042 = vst.msk [vmem:[%s1916_s3 + $0xac] sm:$0xf] %vm998_vm3, %v1244_v8  ;;  %v480_v13 = vadd.f32 %v1326_v11, %v1591_v41  ;;  %v608_v14 = vadd.f32 %v1358_v12, %v1591_v41  ;;  %v471_v15 = vpop.f32.mrb[13].mxu0  ;;  %v599_v16 = vpop.f32.mrb[13].mxu1 }
 0x103   :  { %1008 = vst.msk [vmem:[%s1916_s3 + $0x24] sm:$0xf] %vm998_vm3, %v1210_v9  ;;  %1040 = vst.msk [vmem:[%s1916_s3 + $0xa4] sm:$0xf] %vm998_vm3, %v1242_v10  ;;  %v472_v17 = vadd.f32 %v1591_v41, %v471_v15  ;;  %v600_v18 = vadd.f32 %v1591_v41, %v599_v16  ;;  %v1327_v19 = vpop.f32.mrb[14].mxu0  ;;  %v1359_v20 = vpop.f32.mrb[14].mxu1 }
 0x104   :  { %v692_v21 = vmax.f32 %v480_v13, 0.0  ;;  %v724_v22 = vmax.f32 %v608_v14, 0.0  ;;  %v483_v23 = vadd.f32 %v1327_v19, %v1591_v41  ;;  %v611_v24 = vadd.f32 %v1359_v20, %v1591_v41  ;;  %v474_v25 = vpop.f32.mrb[15].mxu0  ;;  %v602_v26 = vpop.f32.mrb[15].mxu1 }
 0x105   :  { %v690_v27 = vmax.f32 %v472_v17, 0.0  ;;  %v722_v28 = vmax.f32 %v600_v18, 0.0  ;;  %v475_v29 = vadd.f32 %v1591_v41, %v474_v25  ;;  %v603_v30 = vadd.f32 %v1591_v41, %v602_v26 }
 0x106   :  { %v1215_v31 = vpack.c.bf16 %v692_v21, %v692_v21  ;;  %v1247_v32 = vpack.c.bf16 %v724_v22, %v724_v22  ;;  %v693_v33 = vmax.f32 %v483_v23, 0.0  ;;  %v725_v34 = vmax.f32 %v611_v24, 0.0 }
 0x107   :  { %v1213_v35 = vpack.c.bf16 %v690_v27, %v690_v27  ;;  %v1245_v36 = vpack.c.bf16 %v722_v28, %v722_v28  ;;  %v691_v37 = vmax.f32 %v475_v29, 0.0  ;;  %v723_v38 = vmax.f32 %v603_v30, 0.0 }
 0x108   :  { %1013 = vst.msk [vmem:[%s1916_s3 + $0x38] sm:$0xf] %vm998_vm3, %v1215_v31  ;;  %1045 = vst.msk [vmem:[%s1916_s3 + $0xb8] sm:$0xf] %vm998_vm3, %v1247_v32  ;;  %v1216_v39 = vpack.c.bf16 %v693_v33, %v693_v33  ;;  %v1248_v40 = vpack.c.bf16 %v725_v34, %v725_v34 }
 0x109   :  { %1011 = vst.msk [vmem:[%s1916_s3 + $0x30] sm:$0xf] %vm998_vm3, %v1213_v35  ;;  %1043 = vst.msk [vmem:[%s1916_s3 + $0xb0] sm:$0xf] %vm998_vm3, %v1245_v36  ;;  %v1214_v42 = vpack.c.bf16 %v691_v37, %v691_v37  ;;  %v1246_v43 = vpack.c.bf16 %v723_v38, %v723_v38  ;;  %v1330_v44 = vpop.f32.mrb[16].mxu0  ;;  %v1362_v45 = vpop.f32.mrb[16].mxu1 }
 0x10a   :  { %1014 = vst.msk [vmem:[%s1916_s3 + $0x3c] sm:$0xf] %vm998_vm3, %v1216_v39  ;;  %1046 = vst.msk [vmem:[%s1916_s3 + $0xbc] sm:$0xf] %vm998_vm3, %v1248_v40  ;;  %v496_v46 = vadd.f32 %v1330_v44, %v1591_v41  ;;  %v624_v47 = vadd.f32 %v1362_v45, %v1591_v41  ;;  %v487_v48 = vpop.f32.mrb[17].mxu0  ;;  %v615_v49 = vpop.f32.mrb[17].mxu1 }
 0x10b   :  { %1012 = vst.msk [vmem:[%s1916_s3 + $0x34] sm:$0xf] %vm998_vm3, %v1214_v42  ;;  %1044 = vst.msk [vmem:[%s1916_s3 + $0xb4] sm:$0xf] %vm998_vm3, %v1246_v43  ;;  %v488_v50 = vadd.f32 %v1591_v41, %v487_v48  ;;  %v616_v51 = vadd.f32 %v1591_v41, %v615_v49  ;;  %v1331_v52 = vpop.f32.mrb[18].mxu0  ;;  %v1363_v53 = vpop.f32.mrb[18].mxu1 }
 0x10c   :  { %v696_v54 = vmax.f32 %v496_v46, 0.0  ;;  %v728_v55 = vmax.f32 %v624_v47, 0.0  ;;  %v499_v56 = vadd.f32 %v1331_v52, %v1591_v41  ;;  %v627_v57 = vadd.f32 %v1363_v53, %v1591_v41  ;;  %v490_v58 = vpop.f32.mrb[19].mxu0  ;;  %v618_v59 = vpop.f32.mrb[19].mxu1 }
 0x10d   :  { %v694_v60 = vmax.f32 %v488_v50, 0.0  ;;  %v726_v61 = vmax.f32 %v616_v51, 0.0  ;;  %v491_v62 = vadd.f32 %v1591_v41, %v490_v58  ;;  %v619_v63 = vadd.f32 %v1591_v41, %v618_v59 }
 0x10e   :  { %v1219_v0 = vpack.c.bf16 %v696_v54, %v696_v54  ;;  %v1251_v1 = vpack.c.bf16 %v728_v55, %v728_v55  ;;  %v697_v2 = vmax.f32 %v499_v56, 0.0  ;;  %v729_v3 = vmax.f32 %v627_v57, 0.0 }
 0x10f   :  { %v1217_v4 = vpack.c.bf16 %v694_v60, %v694_v60  ;;  %v1249_v5 = vpack.c.bf16 %v726_v61, %v726_v61  ;;  %v695_v6 = vmax.f32 %v491_v62, 0.0  ;;  %v727_v7 = vmax.f32 %v619_v63, 0.0 }
 0x110   :  { %1017 = vst.msk [vmem:[%s1916_s3 + $0x48] sm:$0xf] %vm998_vm3, %v1219_v0  ;;  %1049 = vst.msk [vmem:[%s1916_s3 + $0xc8] sm:$0xf] %vm998_vm3, %v1251_v1  ;;  %v1220_v8 = vpack.c.bf16 %v697_v2, %v697_v2  ;;  %v1252_v9 = vpack.c.bf16 %v729_v3, %v729_v3 }
 0x111   :  { %1015 = vst.msk [vmem:[%s1916_s3 + $0x40] sm:$0xf] %vm998_vm3, %v1217_v4  ;;  %1047 = vst.msk [vmem:[%s1916_s3 + $0xc0] sm:$0xf] %vm998_vm3, %v1249_v5  ;;  %v1218_v10 = vpack.c.bf16 %v695_v6, %v695_v6  ;;  %v1250_v11 = vpack.c.bf16 %v727_v7, %v727_v7  ;;  %v1334_v12 = vpop.f32.mrb[20].mxu0  ;;  %v1366_v13 = vpop.f32.mrb[20].mxu1 }
 0x112   :  { %1018 = vst.msk [vmem:[%s1916_s3 + $0x4c] sm:$0xf] %vm998_vm3, %v1220_v8  ;;  %1050 = vst.msk [vmem:[%s1916_s3 + $0xcc] sm:$0xf] %vm998_vm3, %v1252_v9  ;;  %v512_v14 = vadd.f32 %v1334_v12, %v1591_v41  ;;  %v640_v15 = vadd.f32 %v1366_v13, %v1591_v41  ;;  %v503_v16 = vpop.f32.mrb[21].mxu0  ;;  %v631_v17 = vpop.f32.mrb[21].mxu1 }
 0x113   :  { %1016 = vst.msk [vmem:[%s1916_s3 + $0x44] sm:$0xf] %vm998_vm3, %v1218_v10  ;;  %1048 = vst.msk [vmem:[%s1916_s3 + $0xc4] sm:$0xf] %vm998_vm3, %v1250_v11  ;;  %v504_v18 = vadd.f32 %v1591_v41, %v503_v16  ;;  %v632_v19 = vadd.f32 %v1591_v41, %v631_v17  ;;  %v1335_v20 = vpop.f32.mrb[22].mxu0  ;;  %v1367_v21 = vpop.f32.mrb[22].mxu1 }
 0x114   :  { %v700_v22 = vmax.f32 %v512_v14, 0.0  ;;  %v732_v23 = vmax.f32 %v640_v15, 0.0  ;;  %v515_v24 = vadd.f32 %v1335_v20, %v1591_v41  ;;  %v643_v25 = vadd.f32 %v1367_v21, %v1591_v41  ;;  %v506_v26 = vpop.f32.mrb[23].mxu0  ;;  %v634_v27 = vpop.f32.mrb[23].mxu1 }
 0x115   :  { %v698_v28 = vmax.f32 %v504_v18, 0.0  ;;  %v730_v29 = vmax.f32 %v632_v19, 0.0  ;;  %v507_v30 = vadd.f32 %v1591_v41, %v506_v26  ;;  %v635_v31 = vadd.f32 %v1591_v41, %v634_v27 }
 0x116   :  { %v1223_v32 = vpack.c.bf16 %v700_v22, %v700_v22  ;;  %v1255_v33 = vpack.c.bf16 %v732_v23, %v732_v23  ;;  %v701_v34 = vmax.f32 %v515_v24, 0.0  ;;  %v733_v35 = vmax.f32 %v643_v25, 0.0 }
 0x117   :  { %v1221_v36 = vpack.c.bf16 %v698_v28, %v698_v28  ;;  %v1253_v37 = vpack.c.bf16 %v730_v29, %v730_v29  ;;  %v699_v38 = vmax.f32 %v507_v30, 0.0  ;;  %v731_v39 = vmax.f32 %v635_v31, 0.0 }
 0x118   :  { %1021 = vst.msk [vmem:[%s1916_s3 + $0x58] sm:$0xf] %vm998_vm3, %v1223_v32  ;;  %1053 = vst.msk [vmem:[%s1916_s3 + $0xd8] sm:$0xf] %vm998_vm3, %v1255_v33  ;;  %v1224_v40 = vpack.c.bf16 %v701_v34, %v701_v34  ;;  %v1256_v42 = vpack.c.bf16 %v733_v35, %v733_v35 }
 0x119   :  { %1019 = vst.msk [vmem:[%s1916_s3 + $0x50] sm:$0xf] %vm998_vm3, %v1221_v36  ;;  %1051 = vst.msk [vmem:[%s1916_s3 + $0xd0] sm:$0xf] %vm998_vm3, %v1253_v37  ;;  %v1222_v43 = vpack.c.bf16 %v699_v38, %v699_v38  ;;  %v1254_v44 = vpack.c.bf16 %v731_v39, %v731_v39  ;;  %v1338_v45 = vpop.f32.mrb[24].mxu0  ;;  %v1370_v46 = vpop.f32.mrb[24].mxu1 }
 0x11a   :  { %1022 = vst.msk [vmem:[%s1916_s3 + $0x5c] sm:$0xf] %vm998_vm3, %v1224_v40  ;;  %1054 = vst.msk [vmem:[%s1916_s3 + $0xdc] sm:$0xf] %vm998_vm3, %v1256_v42  ;;  %v528_v47 = vadd.f32 %v1338_v45, %v1591_v41  ;;  %v656_v48 = vadd.f32 %v1370_v46, %v1591_v41  ;;  %v519_v49 = vpop.f32.mrb[25].mxu0  ;;  %v647_v50 = vpop.f32.mrb[25].mxu1 }
 0x11b   :  { %1020 = vst.msk [vmem:[%s1916_s3 + $0x54] sm:$0xf] %vm998_vm3, %v1222_v43  ;;  %1052 = vst.msk [vmem:[%s1916_s3 + $0xd4] sm:$0xf] %vm998_vm3, %v1254_v44  ;;  %v520_v51 = vadd.f32 %v1591_v41, %v519_v49  ;;  %v648_v52 = vadd.f32 %v1591_v41, %v647_v50  ;;  %v1339_v53 = vpop.f32.mrb[26].mxu0  ;;  %v1371_v54 = vpop.f32.mrb[26].mxu1 }
 0x11c   :  { %v704_v55 = vmax.f32 %v528_v47, 0.0  ;;  %v736_v56 = vmax.f32 %v656_v48, 0.0  ;;  %v531_v57 = vadd.f32 %v1339_v53, %v1591_v41  ;;  %v659_v58 = vadd.f32 %v1371_v54, %v1591_v41  ;;  %v522_v59 = vpop.f32.mrb[27].mxu0  ;;  %v650_v60 = vpop.f32.mrb[27].mxu1 }
 0x11d   :  { %v702_v61 = vmax.f32 %v520_v51, 0.0  ;;  %v734_v62 = vmax.f32 %v648_v52, 0.0  ;;  %v523_v63 = vadd.f32 %v1591_v41, %v522_v59  ;;  %v651_v0 = vadd.f32 %v1591_v41, %v650_v60 }
 0x11e   :  { %v1227_v1 = vpack.c.bf16 %v704_v55, %v704_v55  ;;  %v1259_v2 = vpack.c.bf16 %v736_v56, %v736_v56  ;;  %v705_v3 = vmax.f32 %v531_v57, 0.0  ;;  %v737_v4 = vmax.f32 %v659_v58, 0.0 }
 0x11f   :  { %v1225_v5 = vpack.c.bf16 %v702_v61, %v702_v61  ;;  %v1257_v6 = vpack.c.bf16 %v734_v62, %v734_v62  ;;  %v703_v7 = vmax.f32 %v523_v63, 0.0  ;;  %v735_v8 = vmax.f32 %v651_v0, 0.0 }
 0x120   :  { %1025 = vst.msk [vmem:[%s1916_s3 + $0x68] sm:$0xf] %vm998_vm3, %v1227_v1  ;;  %1057 = vst.msk [vmem:[%s1916_s3 + $0xe8] sm:$0xf] %vm998_vm3, %v1259_v2  ;;  %v1228_v9 = vpack.c.bf16 %v705_v3, %v705_v3  ;;  %v1260_v10 = vpack.c.bf16 %v737_v4, %v737_v4 }
 0x121   :  { %1023 = vst.msk [vmem:[%s1916_s3 + $0x60] sm:$0xf] %vm998_vm3, %v1225_v5  ;;  %1055 = vst.msk [vmem:[%s1916_s3 + $0xe0] sm:$0xf] %vm998_vm3, %v1257_v6  ;;  %v1226_v11 = vpack.c.bf16 %v703_v7, %v703_v7  ;;  %v1258_v12 = vpack.c.bf16 %v735_v8, %v735_v8  ;;  %v1342_v13 = vpop.f32.mrb[28].mxu0  ;;  %v1374_v14 = vpop.f32.mrb[28].mxu1 }
 0x122   :  { %1026 = vst.msk [vmem:[%s1916_s3 + $0x6c] sm:$0xf] %vm998_vm3, %v1228_v9  ;;  %1058 = vst.msk [vmem:[%s1916_s3 + $0xec] sm:$0xf] %vm998_vm3, %v1260_v10  ;;  %v544_v15 = vadd.f32 %v1342_v13, %v1591_v41  ;;  %v672_v16 = vadd.f32 %v1374_v14, %v1591_v41  ;;  %v535_v17 = vpop.f32.mrb[29].mxu0  ;;  %v663_v18 = vpop.f32.mrb[29].mxu1 }
 0x123   :  { %1024 = vst.msk [vmem:[%s1916_s3 + $0x64] sm:$0xf] %vm998_vm3, %v1226_v11  ;;  %1056 = vst.msk [vmem:[%s1916_s3 + $0xe4] sm:$0xf] %vm998_vm3, %v1258_v12  ;;  %v536_v19 = vadd.f32 %v1591_v41, %v535_v17  ;;  %v664_v20 = vadd.f32 %v1591_v41, %v663_v18  ;;  %v1343_v21 = vpop.f32.mrb[30].mxu0  ;;  %v1375_v22 = vpop.f32.mrb[30].mxu1 }
 0x124   :  { %v708_v23 = vmax.f32 %v544_v15, 0.0  ;;  %v740_v24 = vmax.f32 %v672_v16, 0.0  ;;  %v547_v25 = vadd.f32 %v1343_v21, %v1591_v41  ;;  %v675_v26 = vadd.f32 %v1375_v22, %v1591_v41  ;;  %v538_v27 = vpop.f32.mrb[31].mxu0  ;;  %v666_v28 = vpop.f32.mrb[31].mxu1 }
 0x125   :  { %v706_v29 = vmax.f32 %v536_v19, 0.0  ;;  %v738_v30 = vmax.f32 %v664_v20, 0.0  ;;  %v539_v31 = vadd.f32 %v1591_v41, %v538_v27  ;;  %v667_v32 = vadd.f32 %v1591_v41, %v666_v28 }
 0x126   :  { %v1231_v33 = vpack.c.bf16 %v708_v23, %v708_v23  ;;  %v1263_v34 = vpack.c.bf16 %v740_v24, %v740_v24  ;;  %v709_v35 = vmax.f32 %v547_v25, 0.0  ;;  %v741_v36 = vmax.f32 %v675_v26, 0.0 }
 0x127   :  { %v1229_v37 = vpack.c.bf16 %v706_v29, %v706_v29  ;;  %v1261_v38 = vpack.c.bf16 %v738_v30, %v738_v30  ;;  %v707_v39 = vmax.f32 %v539_v31, 0.0  ;;  %v739_v40 = vmax.f32 %v667_v32, 0.0 }
 0x128   :  { %1029 = vst.msk [vmem:[%s1916_s3 + $0x78] sm:$0xf] %vm998_vm3, %v1231_v33  ;;  %1061 = vst.msk [vmem:[%s1916_s3 + $0xf8] sm:$0xf] %vm998_vm3, %v1263_v34  ;;  %v1232_v42 = vpack.c.bf16 %v709_v35, %v709_v35  ;;  %v1264_v41 = vpack.c.bf16 %v741_v36, %v741_v36 }
 0x129   :  { %1027 = vst.msk [vmem:[%s1916_s3 + $0x70] sm:$0xf] %vm998_vm3, %v1229_v37  ;;  %1059 = vst.msk [vmem:[%s1916_s3 + $0xf0] sm:$0xf] %vm998_vm3, %v1261_v38  ;;  %v1230_v43 = vpack.c.bf16 %v707_v39, %v707_v39  ;;  %v1262_v44 = vpack.c.bf16 %v739_v40, %v739_v40 }
 0x12a   :  { %1030 = vst.msk [vmem:[%s1916_s3 + $0x7c] sm:$0xf] %vm998_vm3, %v1232_v42  ;;  %1062 = vst.msk [vmem:[%s1916_s3 + $0xfc] sm:$0xf] %vm998_vm3, %v1264_v41 }
 0x12b   :  { %1028 = vst.msk [vmem:[%s1916_s3 + $0x74] sm:$0xf] %vm998_vm3, %v1230_v43  ;;  %1060 = vst.msk [vmem:[%s1916_s3 + $0xf4] sm:$0xf] %vm998_vm3, %v1262_v44 }

// kernel: encoder_forward.20
= control target key start
LH: loop header
LB: loop body
LE: loop exit
PB: predicated region body
PF: predicated region fallthrough
CT: control target
= control target key end

     0   :  { %vm318_vm0 = vcmask 261120   ;;  %vm617_vm1 = vcmask 125952   ;;  %s1132_s1 = inlined_call_operand.vmem [shape: bf16[288,16], index: 1, kind: input, shape index: {}]   ;;  %s1133_s0 = inlined_call_operand.vmem [shape: bf16[128,288], index: 0, kind: input, shape index: {}]   ;;  %s1134_s2 = inlined_call_operand.vmem [shape: f32[1,16], index: 2, kind: input, shape index: {}]   ;;  %s1135_s3 = inlined_call_operand.vmem [shape: bf16[128,16], index: 3, kind: output, shape index: {}]  }
   0x1   :  { %v831_v0 = vld [vmem:[%s1132_s1 + $0x40] sm:$0xff]   ;;  %v833_v2 = vld [vmem:[%s1132_s1 + $0x48] sm:$0xff]   ;;  %v835_v4 = vld [vmem:[%s1132_s1 + $0x50] sm:$0xff]  }
   0x2   :  { %v832_v1 = vld [vmem:[%s1132_s1] sm:$0xff]   ;;  %721 = vmatprep.subr.bf16.mxu0 %v831_v0  ;;  %815 = vmatprep.subr.bf16.mxu1 %v831_v0  ;;  %v834_v3 = vld [vmem:[%s1132_s1 + $0x8] sm:$0xff]   ;;  %v836_v5 = vld [vmem:[%s1132_s1 + $0x10] sm:$0xff]  }
   0x3   :  { %722 = vmatpush3.bf16.msra.mxu0 %v832_v1  ;;  %823 = vmatpush3.bf16.msra.mxu1 %v832_v1  ;;  %v837_v6 = vld [vmem:[%s1132_s1 + $0x58] sm:$0xff]   ;;  %v839_v8 = vld [vmem:[%s1132_s1 + $0x60] sm:$0xff]   ;;  %v841_v10 = vld [vmem:[%s1132_s1 + $0x68] sm:$0xff]  }
   0x4   :  { %723 = vmatprep.subr.bf16.mxu0 %v833_v2  ;;  %816 = vmatprep.subr.bf16.mxu1 %v833_v2  ;;  %v838_v7 = vld [vmem:[%s1132_s1 + $0x18] sm:$0xff]   ;;  %v840_v9 = vld [vmem:[%s1132_s1 + $0x20] sm:$0xff]   ;;  %v842_v13 = vld [vmem:[%s1132_s1 + $0x28] sm:$0xff]  }
   0x5   :  { %v849_v11 = vld [vmem:[%s1133_s0 + $0x4] ss:$12 sps:$4 sm:$0xff]   ;;  %v852_v12 = vld [vmem:[%s1133_s0 + $0x94] ss:$12 sps:$4 sm:$0xff]   ;;  %v845_v16 = vld [vmem:[%s1132_s1 + $0x78] sm:$0xff]  }
   0x6   :  { %v843_v14 = vld [vmem:[%s1132_s1 + $0x70] sm:$0xff]   ;;  %375 = vmatprep.mubr.bf16.mxu0 %v849_v11  ;;  %423 = vmatprep.mubr.bf16.mxu1 %v852_v12  ;;  %v846_v17 = vld [vmem:[%s1132_s1 + $0x38] sm:$0xff]   ;;  %v847_v18 = vld [vmem:[%s1133_s0] ss:$12 sps:$4 sm:$0xff]  }
   0x7   :  { %724 = vmatpush3.bf16.msra.mxu0 %v834_v3  ;;  %824 = vmatpush3.bf16.msra.mxu1 %v834_v3  ;;  %v844_v15 = vld [vmem:[%s1132_s1 + $0x30] sm:$0xff]   ;;  %v853_v19 = vld [vmem:[%s1132_s1 + $0x80] sm:$0xff]   ;;  %v854_v21 = vld [vmem:[%s1133_s0 + $0x1c] ss:$12 sps:$4 sm:$0xff]  }
   0x8   :  { %725 = vmatprep.subr.bf16.mxu0 %v835_v4  ;;  %817 = vmatprep.subr.bf16.mxu1 %v835_v4  ;;  %v850_v20 = vld [vmem:[%s1133_s0 + $0x90] ss:$12 sps:$4 sm:$0xff]   ;;  %v856_v22 = vld [vmem:[%s1133_s0 + $0xac] ss:$12 sps:$4 sm:$0xff]   ;;  %v859_v25 = vld [vmem:[%s1133_s0 + $0xa8] ss:$12 sps:$4 sm:$0xff]  }
   0x9   :  { %v860_v23 = vld [vmem:[%s1132_s1 + $0x88] sm:$0xff]   ;;  %v858_v24 = vld [vmem:[%s1133_s0 + $0x18] ss:$12 sps:$4 sm:$0xff]   ;;  %v861_v26 = vld [vmem:[%s1133_s0 + $0x34] ss:$12 sps:$4 sm:$0xff]  }
   0xa   :  { %v863_v27 = vld [vmem:[%s1133_s0 + $0x8] ss:$12 sps:$4 sm:$0xff]   ;;  %v864_v28 = vld [vmem:[%s1133_s0 + $0x30] ss:$12 sps:$4 sm:$0xff]   ;;  %v865_v29 = vld [vmem:[%s1133_s0 + $0x20] ss:$12 sps:$4 sm:$0xff]  }
   0xb   :  { %726 = vmatpush3.bf16.msra.mxu0 %v836_v5  ;;  %825 = vmatpush3.bf16.msra.mxu1 %v836_v5  ;;  %v866_v30 = vld [vmem:[%s1133_s0 + $0x4c] ss:$12 sps:$4 sm:$0xff]   ;;  %v869_v32 = vld [vmem:[%s1133_s0 + $0x48] ss:$12 sps:$4 sm:$0xff]   ;;  %v870_v33 = vld [vmem:[%s1133_s0 + $0x50] ss:$12 sps:$4 sm:$0xff]  }
   0xc   :  { %727 = vmatprep.subr.bf16.mxu0 %v837_v6  ;;  %818 = vmatprep.subr.bf16.mxu1 %v837_v6  ;;  %v868_v31 = vld [vmem:[%s1133_s0 + $0x38] ss:$12 sps:$4 sm:$0xff]   ;;  %v873_v35 = vld [vmem:[%s1133_s0 + $0x68] ss:$12 sps:$4 sm:$0xff]   ;;  %v874_v36 = vld [vmem:[%s1133_s0 + $0x60] ss:$12 sps:$4 sm:$0xff]  }
   0xd   :  { %v871_v34 = vld [vmem:[%s1133_s0 + $0x64] ss:$12 sps:$4 sm:$0xff]   ;;  %v875_v37 = vld [vmem:[%s1133_s0 + $0x80] ss:$12 sps:$4 sm:$0xff]   ;;  %v876_v38 = vld [vmem:[%s1133_s0 + $0x7c] ss:$12 sps:$4 sm:$0xff]  }
   0xe   :  { %v878_v39 = vld [vmem:[%s1133_s0 + $0x98] ss:$12 sps:$4 sm:$0xff]   ;;  %v880_v41 = vld [vmem:[%s1133_s0 + $0xb0] ss:$12 sps:$4 sm:$0xff]   ;;  %v1046_v2 = vld [vmem:[%s1134_s2] ss:$0 sm:$0xff] }
   0xf   :  { %728 = vmatpush3.bf16.msra.mxu0 %v838_v7  ;;  %826 = vmatpush3.bf16.msra.mxu1 %v838_v7  ;;  %v879_v40 = vld [vmem:[%s1133_s0 + $0x78] ss:$12 sps:$4 sm:$0xff]  }
  0x10   :  { %729 = vmatprep.subr.bf16.mxu0 %v839_v8  ;;  %819 = vmatprep.subr.bf16.mxu1 %v839_v8 }
  0x13   :  { %730 = vmatpush3.bf16.msra.mxu0 %v840_v9  ;;  %827 = vmatpush3.bf16.msra.mxu1 %v840_v9 }
  0x14   :  { %731 = vmatprep.subr.bf16.mxu0 %v841_v10  ;;  %820 = vmatprep.subr.bf16.mxu1 %v841_v10 }
  0x17   :  { %732 = vmatpush3.bf16.msra.mxu0 %v842_v13  ;;  %828 = vmatpush3.bf16.msra.mxu1 %v842_v13 }
  0x18   :  { %733 = vmatprep.subr.bf16.mxu0 %v843_v14  ;;  %821 = vmatprep.subr.bf16.mxu1 %v843_v14 }
  0x1b   :  { %734 = vmatpush3.bf16.msra.mxu0 %v844_v15  ;;  %829 = vmatpush3.bf16.msra.mxu1 %v844_v15 }
  0x1c   :  { %735 = vmatprep.subr.bf16.mxu0 %v845_v16  ;;  %822 = vmatprep.subr.bf16.mxu1 %v845_v16 }
  0x1f   :  { %736 = vmatpush3.bf16.msra.mxu0 %v846_v17  ;;  %830 = vmatpush3.bf16.msra.mxu1 %v846_v17 }
  0x20   :  { %795 = vmatprep.subr.bf16.mxu1 %v853_v19 }
  0x22   :  { %376 = vmatmul.mubr.bf16.vlgmr.msra.gmra.mrb[0].mxu0 %v847_v18  ;;  %424 = vmatmul.mubr.bf16.vlgmr.msra.gmra.mrb[0].mxu1 %v850_v20 }
  0x23   :  { %796 = vmatpush3.bf16.msra.mxu1 %v853_v19  ;;  %383 = vmatprep.mubr.bf16.mxu0 %v854_v21 }
  0x24   :  { %431 = vmatprep.mubr.bf16.mxu1 %v856_v22  ;;  %797 = vmatprep.subr.bf16.mxu1 %v860_v23 }
  0x27   :  { %798 = vmatpush3.bf16.msra.mxu1 %v860_v23 }
  0x2a   :  { %384 = vmatmul.mubr.bf16.gmra.mrb[4].mxu0 %v858_v24  ;;  %432 = vmatmul.mubr.bf16.gmra.mrb[4].mxu1 %v859_v25 }
  0x2b   :  { %391 = vmatprep.mubr.bf16.mxu0 %v861_v26  ;;  %799 = vmatprep.mubr.msk.bf16.mxu1 %vm318_vm0, %v863_v27 }
  0x32   :  { %392 = vmatmul.mubr.bf16.gmra.mrb[8].mxu0 %v864_v28  ;;  %800 = vmatmul.mubr.msk.bf16.vlgmr.msra.gmra.mrb[8].mxu1 %vm318_vm0, %v865_v29 }
  0x33   :  { %399 = vmatprep.mubr.bf16.mxu0 %v866_v30  ;;  %803 = vmatprep.mubr.msk.bf16.mxu1 %vm318_vm0, %v868_v31 }
  0x3a   :  { %400 = vmatmul.mubr.bf16.gmra.mrb[12].mxu0 %v869_v32  ;;  %804 = vmatmul.mubr.msk.bf16.gmra.mrb[12].mxu1 %vm318_vm0, %v870_v33 }
  0x3b   :  { %407 = vmatprep.mubr.bf16.mxu0 %v871_v34  ;;  %807 = vmatprep.mubr.msk.bf16.mxu1 %vm318_vm0, %v873_v35 }
  0x42   :  { %408 = vmatmul.mubr.bf16.gmra.mrb[16].mxu0 %v874_v36  ;;  %808 = vmatmul.mubr.msk.bf16.gmra.mrb[16].mxu1 %vm318_vm0, %v875_v37 }
  0x43   :  { %415 = vmatprep.mubr.bf16.mxu0 %v876_v38  ;;  %811 = vmatprep.mubr.msk.bf16.mxu1 %vm318_vm0, %v878_v39 }
  0x4a   :  { %416 = vmatmul.mubr.bf16.gmra.mrb[20].mxu0 %v879_v40  ;;  %812 = vmatmul.mubr.msk.bf16.gmra.mrb[20].mxu1 %vm318_vm0, %v880_v41 }
  0xf5   :  { %v737_v42 = vpop.f32.mrb[0].mxu0  ;;  %v773_v43 = vpop.f32.mrb[0].mxu1 }
  0xf6   :  { %v738_v44 = vpop.f32.mrb[1].mxu0  ;;  %v774_v45 = vpop.f32.mrb[1].mxu1 }
  0xf7   :  { %v739_v46 = vadd.f32 %v738_v44, %v737_v42  ;;  %v740_v47 = vpop.f32.mrb[2].mxu0  ;;  %v1035_v48 = vadd.f32 %v774_v45, %v773_v43  ;;  %v776_v49 = vpop.f32.mrb[2].mxu1 }
  0xf8   :  { %v741_v50 = vpop.f32.mrb[3].mxu0  ;;  %v777_v51 = vpop.f32.mrb[3].mxu1 }
  0xf9   :  { %v742_v52 = vadd.f32 %v741_v50, %v740_v47  ;;  %v1037_v53 = vadd.f32 %v777_v51, %v776_v49  ;;  %v378_v6 = vadd.f32 %v739_v46, %v1046_v2 }
  0xfb   :  { %v381_v15 = vadd.f32 %v742_v52, %v1046_v2 }
  0xfd   :  { %v743_v54 = vpop.f32.mrb[4].mxu0  ;;  %v779_v55 = vpop.f32.mrb[4].mxu1 }
  0xfe   :  { %v744_v56 = vpop.f32.mrb[5].mxu0  ;;  %v780_v57 = vpop.f32.mrb[5].mxu1 }
  0xff   :  { %v745_v58 = vadd.f32 %v744_v56, %v743_v54  ;;  %v746_v59 = vpop.f32.mrb[6].mxu0  ;;  %v1039_v60 = vadd.f32 %v780_v57, %v779_v55  ;;  %v782_v61 = vpop.f32.mrb[6].mxu1 }
 0x100   :  { %v747_v62 = vpop.f32.mrb[7].mxu0  ;;  %v783_v63 = vpop.f32.mrb[7].mxu1 }
 0x101   :  { %v748_v0 = vadd.f32 %v747_v62, %v746_v59  ;;  %v1041_v1 = vadd.f32 %v783_v63, %v782_v61  ;;  %v386_v3 = vadd.f32 %v745_v58, %v1046_v2 }
 0x103   :  { %v389_v10 = vadd.f32 %v748_v0, %v1046_v2 }
 0x105   :  { %v749_v4 = vpop.f32.mrb[8].mxu0  ;;  %v801_v5 = vpop.f32.mrb[8].mxu1 }
 0x106   :  { %v483_v7 = vadd.f32 %v801_v5, %v386_v3  ;;  %v750_v8 = vpop.f32.mrb[9].mxu0  ;;  %v474_v9 = vpop.f32.mrb[9].mxu1 }
 0x107   :  { %v751_v11 = vadd.f32 %v750_v8, %v749_v4  ;;  %v475_v12 = vadd.f32 %v474_v9, %v378_v6  ;;  %v752_v13 = vpop.f32.mrb[10].mxu0  ;;  %v802_v14 = vpop.f32.mrb[10].mxu1  ;;  %v434_v9 = vadd.f32 %v1039_v60, %v1046_v2 }
 0x108   :  { %v539_v16 = vmax.f32 %v483_v7, 0.0  ;;  %v486_v17 = vadd.f32 %v802_v14, %v389_v10  ;;  %v753_v18 = vpop.f32.mrb[11].mxu0  ;;  %v477_v19 = vpop.f32.mrb[11].mxu1  ;;  %v426_v14 = vadd.f32 %v1035_v48, %v1046_v2 }
 0x109   :  { %v537_v20 = vmax.f32 %v475_v12, 0.0  ;;  %v754_v21 = vadd.f32 %v753_v18, %v752_v13  ;;  %v478_v22 = vadd.f32 %v477_v19, %v381_v15  ;;  %v394_v31 = vadd.f32 %v751_v11, %v1046_v2 }
 0x10a   :  { %v707_v23 = vpack.c.bf16 %v539_v16, %v539_v16  ;;  %v540_v24 = vmax.f32 %v486_v17, 0.0  ;;  %v437_v18 = vadd.f32 %v1041_v1, %v1046_v2 }
 0x10b   :  { %v705_v25 = vpack.c.bf16 %v537_v20, %v537_v20  ;;  %v538_v26 = vmax.f32 %v478_v22, 0.0  ;;  %v397_v38 = vadd.f32 %v754_v21, %v1046_v2 }
 0x10c   :  { %620 = vst.msk [vmem:[%s1135_s3 + $0x8] sm:$0xf] %vm617_vm1, %v707_v23  ;;  %v708_v27 = vpack.c.bf16 %v540_v24, %v540_v24 }
 0x10d   :  { %618 = vst.msk [vmem:[%s1135_s3] sm:$0xf] %vm617_vm1, %v705_v25  ;;  %v706_v28 = vpack.c.bf16 %v538_v26, %v538_v26  ;;  %v755_v29 = vpop.f32.mrb[12].mxu0  ;;  %v805_v30 = vpop.f32.mrb[12].mxu1 }
 0x10e   :  { %621 = vst.msk [vmem:[%s1135_s3 + $0xc] sm:$0xf] %vm617_vm1, %v708_v27  ;;  %v756_v32 = vpop.f32.mrb[13].mxu0  ;;  %v490_v33 = vpop.f32.mrb[13].mxu1  ;;  %v429_v27 = vadd.f32 %v1037_v53, %v1046_v2 }
 0x10f   :  { %619 = vst.msk [vmem:[%s1135_s3 + $0x4] sm:$0xf] %vm617_vm1, %v706_v28  ;;  %v757_v34 = vadd.f32 %v756_v32, %v755_v29  ;;  %v491_v35 = vadd.f32 %v490_v33, %v394_v31  ;;  %v758_v36 = vpop.f32.mrb[14].mxu0  ;;  %v806_v37 = vpop.f32.mrb[14].mxu1 }
 0x110   :  { %v759_v39 = vpop.f32.mrb[15].mxu0  ;;  %v493_v40 = vpop.f32.mrb[15].mxu1 }
 0x111   :  { %v402_v41 = vadd.f32 %v757_v34, %v1046_v2  ;;  %v541_v42 = vmax.f32 %v491_v35, 0.0  ;;  %v760_v43 = vadd.f32 %v759_v39, %v758_v36  ;;  %v494_v44 = vadd.f32 %v493_v40, %v397_v38 }
 0x113   :  { %v499_v45 = vadd.f32 %v805_v30, %v402_v41  ;;  %v709_v46 = vpack.c.bf16 %v541_v42, %v541_v42  ;;  %v405_v47 = vadd.f32 %v760_v43, %v1046_v2  ;;  %v542_v49 = vmax.f32 %v494_v44, 0.0 }
 0x115   :  { %v543_v50 = vmax.f32 %v499_v45, 0.0  ;;  %622 = vst.msk [vmem:[%s1135_s3 + $0x10] sm:$0xf] %vm617_vm1, %v709_v46  ;;  %v502_v51 = vadd.f32 %v806_v37, %v405_v47  ;;  %v710_v52 = vpack.c.bf16 %v542_v49, %v542_v49  ;;  %v761_v54 = vpop.f32.mrb[16].mxu0  ;;  %v809_v55 = vpop.f32.mrb[16].mxu1 }
 0x116   :  { %v762_v56 = vpop.f32.mrb[17].mxu0  ;;  %v506_v57 = vpop.f32.mrb[17].mxu1 }
 0x117   :  { %v711_v58 = vpack.c.bf16 %v543_v50, %v543_v50  ;;  %v544_v59 = vmax.f32 %v502_v51, 0.0  ;;  %623 = vst.msk [vmem:[%s1135_s3 + $0x14] sm:$0xf] %vm617_vm1, %v710_v52  ;;  %v763_v61 = vadd.f32 %v762_v56, %v761_v54  ;;  %v764_v62 = vpop.f32.mrb[18].mxu0  ;;  %v810_v63 = vpop.f32.mrb[18].mxu1 }
 0x118   :  { %v765_v0 = vpop.f32.mrb[19].mxu0  ;;  %v509_v3 = vpop.f32.mrb[19].mxu1 }
 0x119   :  { %624 = vst.msk [vmem:[%s1135_s3 + $0x18] sm:$0xf] %vm617_vm1, %v711_v58  ;;  %v712_v4 = vpack.c.bf16 %v544_v59, %v544_v59  ;;  %v410_v5 = vadd.f32 %v763_v61, %v1046_v2  ;;  %v766_v6 = vadd.f32 %v765_v0, %v764_v62 }
 0x11b   :  { %625 = vst.msk [vmem:[%s1135_s3 + $0x1c] sm:$0xf] %vm617_vm1, %v712_v4  ;;  %v507_v7 = vadd.f32 %v506_v57, %v410_v5  ;;  %v413_v8 = vadd.f32 %v766_v6, %v1046_v2 }
 0x11d   :  { %v545_v10 = vmax.f32 %v507_v7, 0.0  ;;  %v510_v11 = vadd.f32 %v509_v3, %v413_v8  ;;  %v767_v12 = vpop.f32.mrb[20].mxu0  ;;  %v813_v13 = vpop.f32.mrb[20].mxu1 }
 0x11e   :  { %v531_v15 = vadd.f32 %v813_v13, %v434_v9  ;;  %v768_v16 = vpop.f32.mrb[21].mxu0  ;;  %v522_v17 = vpop.f32.mrb[21].mxu1 }
 0x11f   :  { %v713_v19 = vpack.c.bf16 %v545_v10, %v545_v10  ;;  %v546_v20 = vmax.f32 %v510_v11, 0.0  ;;  %v769_v21 = vadd.f32 %v768_v16, %v767_v12  ;;  %v523_v22 = vadd.f32 %v522_v17, %v426_v14  ;;  %v770_v23 = vpop.f32.mrb[22].mxu0  ;;  %v814_v24 = vpop.f32.mrb[22].mxu1 }
 0x120   :  { %v551_v60 = vmax.f32 %v531_v15, 0.0  ;;  %v534_v25 = vadd.f32 %v814_v24, %v437_v18  ;;  %v771_v26 = vpop.f32.mrb[23].mxu0  ;;  %v525_v28 = vpop.f32.mrb[23].mxu1 }
 0x121   :  { %626 = vst.msk [vmem:[%s1135_s3 + $0x20] sm:$0xf] %vm617_vm1, %v713_v19  ;;  %v714_v48 = vpack.c.bf16 %v546_v20, %v546_v20  ;;  %v418_v1 = vadd.f32 %v769_v21, %v1046_v2  ;;  %v549_v29 = vmax.f32 %v523_v22, 0.0  ;;  %v772_v30 = vadd.f32 %v771_v26, %v770_v23 }
 0x122   :  { %v719_v31 = vpack.c.bf16 %v551_v60, %v551_v60  ;;  %v552_v32 = vmax.f32 %v534_v25, 0.0  ;;  %v526_v33 = vadd.f32 %v525_v28, %v429_v27 }
 0x123   :  { %627 = vst.msk [vmem:[%s1135_s3 + $0x24] sm:$0xf] %vm617_vm1, %v714_v48  ;;  %v515_v53 = vadd.f32 %v809_v55, %v418_v1  ;;  %v717_v34 = vpack.c.bf16 %v549_v29, %v549_v29  ;;  %v421_v35 = vadd.f32 %v772_v30, %v1046_v2 }
 0x124   :  { %632 = vst.msk [vmem:[%s1135_s3 + $0x38] sm:$0xf] %vm617_vm1, %v719_v31  ;;  %v720_v36 = vpack.c.bf16 %v552_v32, %v552_v32  ;;  %v550_v37 = vmax.f32 %v526_v33, 0.0 }
 0x125   :  { %v547_v38 = vmax.f32 %v515_v53, 0.0  ;;  %630 = vst.msk [vmem:[%s1135_s3 + $0x30] sm:$0xf] %vm617_vm1, %v717_v34  ;;  %v518_v39 = vadd.f32 %v810_v63, %v421_v35 }
 0x126   :  { %633 = vst.msk [vmem:[%s1135_s3 + $0x3c] sm:$0xf] %vm617_vm1, %v720_v36  ;;  %v718_v2 = vpack.c.bf16 %v550_v37, %v550_v37 }
 0x127   :  { %v715_v40 = vpack.c.bf16 %v547_v38, %v547_v38  ;;  %v548_v41 = vmax.f32 %v518_v39, 0.0 }
 0x128   :  { %631 = vst.msk [vmem:[%s1135_s3 + $0x34] sm:$0xf] %vm617_vm1, %v718_v2 }
 0x129   :  { %628 = vst.msk [vmem:[%s1135_s3 + $0x28] sm:$0xf] %vm617_vm1, %v715_v40  ;;  %v716_v42 = vpack.c.bf16 %v548_v41, %v548_v41 }
 0x12b   :  { %629 = vst.msk [vmem:[%s1135_s3 + $0x2c] sm:$0xf] %vm617_vm1, %v716_v42 }

// kernel: tile.83
= control target key start
LH: loop header
LB: loop body
LE: loop exit
PB: predicated region body
PF: predicated region fallthrough
CT: control target
= control target key end

     0   :  { %s22_s0 = inlined_call_operand.vmem [shape: f32[32], index: 0, kind: input, shape index: {}]   ;;  %s23_s1 = inlined_call_operand.vmem [shape: f32[4,32], index: 1, kind: output, shape index: {}]  }
   0x1   :  { %v4_v0 = vld [vmem:[%s22_s0] ss:$0 sm:$0xff] }
   0x2   :  { %5 = vst [vmem:[%s23_s1] sm:$0xf] %v4_v0 }

// kernel: tile.88
= control target key start
LH: loop header
LB: loop body
LE: loop exit
PB: predicated region body
PF: predicated region fallthrough
CT: control target
= control target key end

     0   :  { %vm7_vm0 = vcmask 261120   ;;  %s37_s8 = smov 32   ;;  %s38_s9 = smov 64   ;;  %vm13_vm1 = vcmask 1048320   ;;  %vm19_vm2 = vcmask 785920   ;;  %vm25_vm3 = vcmask 523520   ;;  %s55_s0 = inlined_call_operand.vmem [shape: f32[4,32], index: 0, kind: input, shape index: {}]   ;;  %s56_s1 = inlined_call_operand.vmem [shape: f32[1,128], index: 1, kind: output, shape index: {}]  }
   0x1   :  { %v4_v0 = vld [vmem:[%s55_s0] sm:$0xf]  ;;  %s36_s0 = smov 96  }
   0x2   :  { %5 = vst [vmem:[#allocation1] sm:$0xf] %v4_v0 }
   0x9   :  { %v10_v1 = vld [vmem:[#allocation1 + $0x3] sm:$0x1]   ;;  %v22_v2 = vld [vmem:[#allocation1 + $0x1] sm:$0x1]   ;;  %v6_v3 = vld [vmem:[#allocation1] sm:$0x1]  }
   0xa   :  { %11 = vrot.lane.b32.xlu0 %v10_v1, %s36_s0  ;;  %23 = vrot.lane.b32.xlu1 %v22_v2, %s37_s8  ;;  %v16_v4 = vld [vmem:[#allocation1 + $0x2] sm:$0x1]   ;;  %8 = vst.msk [vmem:[#allocation0] sm:$0x1] %vm7_vm0, %v6_v3  }
   0xe   :  { %17 = vrot.lane.b32.xlu0 %v16_v4, %s38_s9 }
  0x7c   :  { %v12_v5 = vpop.permute.xlu0 %11   ;;  %v24_v6 = vpop.permute.xlu1 %23  }
  0x7d   :  { %14 = vst.msk [vmem:[#allocation0] sm:$0x1] %vm13_vm1, %v12_v5  }
  0x80   :  { %v18_v7 = vpop.permute.xlu0 %17  }
  0x81   :  { %20 = vst.msk [vmem:[#allocation0] sm:$0x1] %vm19_vm2, %v18_v7  }
  0x82   :  { %26 = vst.msk [vmem:[#allocation0] sm:$0x1] %vm25_vm3, %v24_v6  }
  0x89   :  { %v30_v8 = vld [vmem:[#allocation0] sm:$0x1] }
  0x8a   :  { %32 = vst [vmem:[%s56_s1] sm:$0x1] %v30_v8 }

// kernel: encoder_forward.21
= control target key start
LH: loop header
LB: loop body
LE: loop exit
PB: predicated region body
PF: predicated region fallthrough
CT: control target
= control target key end

     0   :  { %v624_v0 = vmov 0   ;;  %vm177_vm0 = vcmask 130048   ;;  %vm299_vm1 = vcmask 261120   ;;  %vm481_vm2 = vcmask 257024   ;;  %s889_s1 = inlined_call_operand.vmem [shape: bf16[144,32], index: 1, kind: input, shape index: {}]   ;;  %s890_s0 = inlined_call_operand.vmem [shape: bf16[128,144], index: 0, kind: input, shape index: {}]   ;;  %s891_s2 = inlined_call_operand.vmem [shape: f32[1,32], index: 2, kind: input, shape index: {}]   ;;  %s892_s3 = inlined_call_operand.vmem [shape: bf16[128,32], index: 3, kind: output, shape index: {0}]   ;;  %s893_s4 = inlined_call_operand.vmem [shape: f32[1,2,32], index: 4, kind: output, shape index: {1}]  }
   0x1   :  { %202 = vmatprep.subr.bf16.mxu0 %v624_v0  ;;  %v591_v1 = vld [vmem:[%s889_s1] sm:$0xff]   ;;  %572 = vmatprep.subr.bf16.mxu1 %v624_v0  ;;  %v592_v2 = vld [vmem:[%s889_s1 + $0x8] sm:$0xff]   ;;  %v593_v3 = vld [vmem:[%s889_s1 + $0x10] sm:$0xff]   ;;  %vm390_vm3 = vcmask 1040384   ;;  %vm392_vm4 = vcmask 254976  }
   0x2   :  { %203 = vmatpush1.bf16.msra.mxu0 %v591_v1  ;;  %581 = vmatpush1.bf16.msra.mxu1 %v591_v1  ;;  %v594_v4 = vld [vmem:[%s889_s1 + $0x18] sm:$0xff]   ;;  %v602_v5 = vld [vmem:[%s890_s0 + $0x4] ss:$8 sps:$4 sm:$0xff]   ;;  %v597_v9 = vld [vmem:[%s889_s1 + $0x30] sm:$0xff]  }
   0x3   :  { %204 = vmatprep.subr.bf16.mxu0 %v624_v0  ;;  %573 = vmatprep.subr.bf16.mxu1 %v624_v0  ;;  %v608_v6 = vld [vmem:[%s890_s0 + $0x44] ss:$8 sps:$4 sm:$0xff]   ;;  %v598_v10 = vld [vmem:[%s889_s1 + $0x38] sm:$0xff]   ;;  %v600_v12 = vld [vmem:[%s890_s0] ss:$8 sps:$4 sm:$0xff]  }
   0x4   :  { %531 = vmatprep.mubr.msk.bf16.mxu0 %vm177_vm0, %v602_v5  ;;  %v595_v7 = vld [vmem:[%s889_s1 + $0x20] sm:$0xff]   ;;  %535 = vmatprep.mubr.msk.bf16.mxu1 %vm177_vm0, %v608_v6  ;;  %v596_v8 = vld [vmem:[%s889_s1 + $0x28] sm:$0xff]   ;;  %v603_v14 = vld [vmem:[%s890_s0 + $0x14] ss:$8 sps:$4 sm:$0xff]  }
   0x5   :  { %v599_v11 = vld [vmem:[%s889_s1 + $0x40] sm:$0xff]   ;;  %v612_v15 = vld [vmem:[%s890_s0 + $0x54] ss:$8 sps:$4 sm:$0xff]   ;;  %v605_v16 = vld [vmem:[%s890_s0 + $0x10] ss:$8 sps:$4 sm:$0xff]  }
   0x6   :  { %205 = vmatpush1.bf16.msra.mxu0 %v592_v2  ;;  %582 = vmatpush1.bf16.msra.mxu1 %v592_v2  ;;  %v606_v13 = vld [vmem:[%s890_s0 + $0x40] ss:$8 sps:$4 sm:$0xff]   ;;  %v614_v17 = vld [vmem:[%s890_s0 + $0x50] ss:$8 sps:$4 sm:$0xff]   ;;  %v609_v18 = vld [vmem:[%s890_s0 + $0x24] ss:$8 sps:$4 sm:$0xff]  }
   0x7   :  { %206 = vmatprep.subr.bf16.mxu0 %v624_v0  ;;  %574 = vmatprep.subr.bf16.mxu1 %v624_v0  ;;  %v618_v19 = vld [vmem:[%s890_s0 + $0x64] ss:$8 sps:$4 sm:$0xff]   ;;  %v611_v20 = vld [vmem:[%s890_s0 + $0x20] ss:$8 sps:$4 sm:$0xff]   ;;  %v615_v22 = vld [vmem:[%s890_s0 + $0x34] ss:$8 sps:$4 sm:$0xff]  }
   0x8   :  { %v620_v21 = vld [vmem:[%s890_s0 + $0x60] ss:$8 sps:$4 sm:$0xff]   ;;  %v621_v23 = vld [vmem:[%s890_s0 + $0x74] ss:$8 sps:$4 sm:$0xff]   ;;  %v617_v24 = vld [vmem:[%s890_s0 + $0x30] ss:$8 sps:$4 sm:$0xff]  }
   0x9   :  { %v623_v25 = vld [vmem:[%s890_s0 + $0x70] ss:$8 sps:$4 sm:$0xff]   ;;  %v736_v26 = vld [vmem:[%s891_s2] ss:$0 sm:$0xff] }
   0xa   :  { %207 = vmatpush1.bf16.msra.mxu0 %v593_v3  ;;  %583 = vmatpush1.bf16.msra.mxu1 %v593_v3 }
   0xb   :  { %208 = vmatprep.subr.bf16.mxu0 %v624_v0  ;;  %575 = vmatprep.subr.bf16.mxu1 %v624_v0 }
   0xe   :  { %209 = vmatpush1.bf16.msra.mxu0 %v594_v4  ;;  %584 = vmatpush1.bf16.msra.mxu1 %v594_v4 }
   0xf   :  { %210 = vmatprep.subr.bf16.mxu0 %v624_v0  ;;  %576 = vmatprep.subr.bf16.mxu1 %v624_v0 }
  0x12   :  { %211 = vmatpush1.bf16.msra.mxu0 %v595_v7  ;;  %585 = vmatpush1.bf16.msra.mxu1 %v595_v7 }
  0x13   :  { %212 = vmatprep.subr.bf16.mxu0 %v624_v0  ;;  %577 = vmatprep.subr.bf16.mxu1 %v624_v0 }
  0x16   :  { %213 = vmatpush1.bf16.msra.mxu0 %v596_v8  ;;  %586 = vmatpush1.bf16.msra.mxu1 %v596_v8 }
  0x17   :  { %214 = vmatprep.subr.bf16.mxu0 %v624_v0  ;;  %578 = vmatprep.subr.bf16.mxu1 %v624_v0 }
  0x1a   :  { %215 = vmatpush1.bf16.msra.mxu0 %v597_v9  ;;  %587 = vmatpush1.bf16.msra.mxu1 %v597_v9 }
  0x1b   :  { %216 = vmatprep.subr.bf16.mxu0 %v624_v0  ;;  %579 = vmatprep.subr.bf16.mxu1 %v624_v0 }
  0x1e   :  { %217 = vmatpush1.bf16.msra.mxu0 %v598_v10  ;;  %588 = vmatpush1.bf16.msra.mxu1 %v598_v10 }
  0x1f   :  { %218 = vmatprep.subr.bf16.mxu0 %v624_v0  ;;  %580 = vmatprep.subr.bf16.mxu1 %v624_v0 }
  0x22   :  { %219 = vmatpush1.bf16.msra.mxu0 %v599_v11  ;;  %589 = vmatpush1.bf16.msra.mxu1 %v599_v11 }
  0x25   :  { %235 = vmatmul.mubr.bf16.vlgmr.msra.gmra.mrb[0].mxu0 %v600_v12  ;;  %267 = vmatmul.mubr.bf16.vlgmr.msra.gmra.mrb[0].mxu1 %v606_v13 }
  0x26   :  { %532 = vmatprep.mubr.msk.bf16.mxu0 %vm177_vm0, %v603_v14  ;;  %536 = vmatprep.mubr.msk.bf16.mxu1 %vm177_vm0, %v612_v15 }
  0x2d   :  { %243 = vmatmul.mubr.bf16.gmra.mrb[4].mxu0 %v605_v16  ;;  %275 = vmatmul.mubr.bf16.gmra.mrb[4].mxu1 %v614_v17 }
  0x2e   :  { %533 = vmatprep.mubr.msk.bf16.mxu0 %vm177_vm0, %v609_v18  ;;  %537 = vmatprep.mubr.msk.bf16.mxu1 %vm177_vm0, %v618_v19 }
  0x35   :  { %251 = vmatmul.mubr.bf16.gmra.mrb[8].mxu0 %v611_v20  ;;  %283 = vmatmul.mubr.bf16.gmra.mrb[8].mxu1 %v620_v21 }
  0x36   :  { %534 = vmatprep.mubr.msk.bf16.mxu0 %vm177_vm0, %v615_v22  ;;  %538 = vmatprep.mubr.msk.bf16.mxu1 %vm177_vm0, %v621_v23 }
  0x3d   :  { %259 = vmatmul.mubr.bf16.gmra.mrb[12].mxu0 %v617_v24  ;;  %291 = vmatmul.mubr.bf16.gmra.mrb[12].mxu1 %v623_v25 }
  0xf8   :  { %v236_v27 = vpop.f32.mrb[0].mxu0  ;;  %v738_v28 = vpop.f32.mrb[0].mxu1 }
  0xf9   :  { %v337_v29 = vmul.f32 %v236_v27, %v236_v27  ;;  %v401_v30 = vadd.f32 %v736_v26, %v236_v27  ;;  %v238_v31 = vpop.f32.mrb[1].mxu0  ;;  %v270_v32 = vpop.f32.mrb[1].mxu1  ;;  %v409_v34 = vadd.f32 %v736_v26, %v738_v28  ;;  %v300_v36 = vsel %vm299_vm1, %v236_v27, 0.0 }
  0xfa   :  { %v239_v33 = vpop.f32.mrb[2].mxu0  ;;  %v743_v35 = vpop.f32.mrb[2].mxu1 }
  0xfb   :  { %v556_v37 = vpack.c.bf16 %v401_v30, %v401_v30  ;;  %v301_v38 = vsel %vm299_vm1, %v239_v33, 0.0  ;;  %v338_v39 = vmul.f32 %v239_v33, %v239_v33  ;;  %v241_v40 = vpop.f32.mrb[3].mxu0  ;;  %v273_v41 = vpop.f32.mrb[3].mxu1  ;;  %v402_v43 = vadd.f32 %v736_v26, %v239_v33 }
  0xfc   :  { %v302_v42 = vadd.f32 %v301_v38, %v300_v36  ;;  %v564_v44 = vpack.c.bf16 %v409_v34, %v409_v34  ;;  %v353_v45 = vsel %vm299_vm1, %v337_v29, 0.0  ;;  %v410_v47 = vadd.f32 %v736_v26, %v743_v35 }
  0xfd   :  { %482 = vst.msk [vmem:[%s892_s3] sm:$0xf] %vm481_vm2, %v556_v37  ;;  %v354_v46 = vsel %vm299_vm1, %v338_v39, 0.0  ;;  %v557_v49 = vpack.c.bf16 %v402_v43, %v402_v43 }
  0xfe   :  { %v355_v48 = vadd.f32 %v354_v46, %v353_v45  ;;  %490 = vst.msk [vmem:[%s892_s3 + $0x20] sm:$0xf] %vm481_vm2, %v564_v44  ;;  %v565_v50 = vpack.c.bf16 %v410_v47, %v410_v47 }
  0xff   :  { %483 = vst.msk [vmem:[%s892_s3 + $0x4] sm:$0xf] %vm481_vm2, %v557_v49  ;;  %v345_v49 = vmul.f32 %v738_v28, %v738_v28 }
 0x100   :  { %v244_v51 = vpop.f32.mrb[4].mxu0  ;;  %v764_v52 = vpop.f32.mrb[4].mxu1  ;;  %491 = vst.msk [vmem:[%s892_s3 + $0x24] sm:$0xf] %vm481_vm2, %v565_v50 }
 0x101   :  { %v303_v53 = vsel %vm299_vm1, %v244_v51, 0.0  ;;  %v339_v54 = vmul.f32 %v244_v51, %v244_v51  ;;  %v403_v55 = vadd.f32 %v736_v26, %v244_v51  ;;  %v246_v56 = vpop.f32.mrb[5].mxu0  ;;  %v278_v57 = vpop.f32.mrb[5].mxu1  ;;  %v411_v60 = vadd.f32 %v736_v26, %v764_v52 }
 0x102   :  { %v304_v58 = vadd.f32 %v303_v53, %v302_v42  ;;  %v247_v59 = vpop.f32.mrb[6].mxu0  ;;  %v774_v61 = vpop.f32.mrb[6].mxu1 }
 0x103   :  { %v356_v62 = vsel %vm299_vm1, %v339_v54, 0.0  ;;  %v558_v63 = vpack.c.bf16 %v403_v55, %v403_v55  ;;  %v305_v0 = vsel %vm299_vm1, %v247_v59, 0.0  ;;  %v340_v1 = vmul.f32 %v247_v59, %v247_v59  ;;  %v249_v2 = vpop.f32.mrb[7].mxu0  ;;  %v281_v3 = vpop.f32.mrb[7].mxu1 }
 0x104   :  { %v357_v4 = vadd.f32 %v356_v62, %v355_v48  ;;  %v306_v5 = vadd.f32 %v305_v0, %v304_v58  ;;  %v404_v6 = vadd.f32 %v736_v26, %v247_v59  ;;  %v566_v8 = vpack.c.bf16 %v411_v60, %v411_v60 }
 0x105   :  { %484 = vst.msk [vmem:[%s892_s3 + $0x8] sm:$0xf] %vm481_vm2, %v558_v63  ;;  %v358_v7 = vsel %vm299_vm1, %v340_v1, 0.0  ;;  %v412_v11 = vadd.f32 %v736_v26, %v774_v61  ;;  %v315_v1 = vsel %vm299_vm1, %v738_v28, 0.0  ;;  %v346_v2 = vmul.f32 %v743_v35, %v743_v35 }
 0x106   :  { %v359_v9 = vadd.f32 %v358_v7, %v357_v4  ;;  %v559_v10 = vpack.c.bf16 %v404_v6, %v404_v6  ;;  %492 = vst.msk [vmem:[%s892_s3 + $0x28] sm:$0xf] %vm481_vm2, %v566_v8  ;;  %v317_v28 = vsel %vm299_vm1, %v743_v35, 0.0  ;;  %v319_v35 = vsel %vm299_vm1, %v764_v52, 0.0 }
 0x107   :  { %v567_v13 = vpack.c.bf16 %v412_v11, %v412_v11 }
 0x108   :  { %485 = vst.msk [vmem:[%s892_s3 + $0xc] sm:$0xf] %vm481_vm2, %v559_v10  ;;  %v252_v12 = vpop.f32.mrb[8].mxu0  ;;  %v794_v14 = vpop.f32.mrb[8].mxu1  ;;  %v347_v10 = vmul.f32 %v764_v52, %v764_v52 }
 0x109   :  { %v307_v15 = vsel %vm299_vm1, %v252_v12, 0.0  ;;  %v341_v16 = vmul.f32 %v252_v12, %v252_v12  ;;  %v405_v17 = vadd.f32 %v736_v26, %v252_v12  ;;  %v254_v18 = vpop.f32.mrb[9].mxu0  ;;  %v286_v19 = vpop.f32.mrb[9].mxu1  ;;  %493 = vst.msk [vmem:[%s892_s3 + $0x2c] sm:$0xf] %vm481_vm2, %v567_v13  ;;  %v413_v22 = vadd.f32 %v736_v26, %v794_v14 }
 0x10a   :  { %v308_v20 = vadd.f32 %v307_v15, %v306_v5  ;;  %v255_v21 = vpop.f32.mrb[10].mxu0  ;;  %v804_v23 = vpop.f32.mrb[10].mxu1  ;;  %v370_v13 = vsel %vm299_vm1, %v346_v2, 0.0  ;;  %v348_v15 = vmul.f32 %v774_v61, %v774_v61  ;;  %v372_v18 = vsel %vm299_vm1, %v347_v10, 0.0 }
 0x10b   :  { %v360_v24 = vsel %vm299_vm1, %v341_v16, 0.0  ;;  %v560_v25 = vpack.c.bf16 %v405_v17, %v405_v17  ;;  %v309_v27 = vsel %vm299_vm1, %v255_v21, 0.0  ;;  %v342_v29 = vmul.f32 %v255_v21, %v255_v21  ;;  %v257_v30 = vpop.f32.mrb[11].mxu0  ;;  %v289_v31 = vpop.f32.mrb[11].mxu1 }
 0x10c   :  { %v361_v32 = vadd.f32 %v360_v24, %v359_v9  ;;  %v310_v33 = vadd.f32 %v309_v27, %v308_v20  ;;  %v406_v34 = vadd.f32 %v736_v26, %v255_v21  ;;  %v568_v37 = vpack.c.bf16 %v413_v22, %v413_v22 }
 0x10d   :  { %486 = vst.msk [vmem:[%s892_s3 + $0x10] sm:$0xf] %vm481_vm2, %v560_v25  ;;  %v362_v36 = vsel %vm299_vm1, %v342_v29, 0.0  ;;  %v414_v40 = vadd.f32 %v736_v26, %v804_v23  ;;  %v368_v9 = vsel %vm299_vm1, %v345_v49, 0.0  ;;  %v321_v19 = vsel %vm299_vm1, %v774_v61, 0.0 }
 0x10e   :  { %v363_v38 = vadd.f32 %v362_v36, %v361_v32  ;;  %v561_v39 = vpack.c.bf16 %v406_v34, %v406_v34  ;;  %494 = vst.msk [vmem:[%s892_s3 + $0x30] sm:$0xf] %vm481_vm2, %v568_v37  ;;  %v349_v20 = vmul.f32 %v794_v14, %v794_v14  ;;  %v374_v22 = vsel %vm299_vm1, %v348_v15, 0.0 }
 0x10f   :  { %v569_v42 = vpack.c.bf16 %v414_v40, %v414_v40  ;;  %v323_v24 = vsel %vm299_vm1, %v794_v14, 0.0  ;;  %v350_v25 = vmul.f32 %v804_v23, %v804_v23  ;;  %v325_v61 = vsel %vm299_vm1, %v804_v23, 0.0 }
 0x110   :  { %487 = vst.msk [vmem:[%s892_s3 + $0x14] sm:$0xf] %vm481_vm2, %v561_v39  ;;  %v260_v41 = vpop.f32.mrb[12].mxu0  ;;  %v292_v43 = vpop.f32.mrb[12].mxu1  ;;  %v376_v31 = vsel %vm299_vm1, %v349_v20, 0.0 }
 0x111   :  { %v311_v44 = vsel %vm299_vm1, %v260_v41, 0.0  ;;  %v343_v45 = vmul.f32 %v260_v41, %v260_v41  ;;  %v407_v46 = vadd.f32 %v736_v26, %v260_v41  ;;  %v262_v47 = vpop.f32.mrb[13].mxu0  ;;  %v294_v48 = vpop.f32.mrb[13].mxu1  ;;  %495 = vst.msk [vmem:[%s892_s3 + $0x34] sm:$0xf] %vm481_vm2, %v569_v42  ;;  %v415_v53 = vadd.f32 %v736_v26, %v292_v43 }
 0x112   :  { %v312_v50 = vadd.f32 %v311_v44, %v310_v33  ;;  %v263_v51 = vpop.f32.mrb[14].mxu0  ;;  %v295_v54 = vpop.f32.mrb[14].mxu1  ;;  %v351_v27 = vmul.f32 %v292_v43, %v292_v43  ;;  %v327_v32 = vsel %vm299_vm1, %v292_v43, 0.0  ;;  %v378_v36 = vsel %vm299_vm1, %v350_v25, 0.0 }
 0x113   :  { %v364_v55 = vsel %vm299_vm1, %v343_v45, 0.0  ;;  %v562_v56 = vpack.c.bf16 %v407_v46, %v407_v46  ;;  %v313_v57 = vsel %vm299_vm1, %v263_v51, 0.0  ;;  %v344_v58 = vmul.f32 %v263_v51, %v263_v51  ;;  %v265_v59 = vpop.f32.mrb[15].mxu0  ;;  %v297_v60 = vpop.f32.mrb[15].mxu1 }
 0x114   :  { %v365_v62 = vadd.f32 %v364_v55, %v363_v38  ;;  %v314_v63 = vadd.f32 %v313_v57, %v312_v50  ;;  %v408_v0 = vadd.f32 %v736_v26, %v263_v51  ;;  %v570_v4 = vpack.c.bf16 %v415_v53, %v415_v53 }
 0x115   :  { %488 = vst.msk [vmem:[%s892_s3 + $0x18] sm:$0xf] %vm481_vm2, %v562_v56  ;;  %v366_v3 = vsel %vm299_vm1, %v344_v58, 0.0  ;;  %v416_v8 = vadd.f32 %v736_v26, %v295_v54  ;;  %v380_v37 = vsel %vm299_vm1, %v351_v27, 0.0  ;;  %v352_v14 = vmul.f32 %v295_v54, %v295_v54 }
 0x116   :  { %v316_v5 = vadd.f32 %v315_v1, %v314_v63  ;;  %v367_v6 = vadd.f32 %v366_v3, %v365_v62  ;;  %v563_v7 = vpack.c.bf16 %v408_v0, %v408_v0  ;;  %496 = vst.msk [vmem:[%s892_s3 + $0x38] sm:$0xf] %vm481_vm2, %v570_v4  ;;  %v329_v40 = vsel %vm299_vm1, %v295_v54, 0.0 }
 0x117   :  { %v571_v26 = vpack.c.bf16 %v416_v8, %v416_v8  ;;  %v382_v44 = vsel %vm299_vm1, %v352_v14, 0.0 }
 0x118   :  { %v318_v11 = vadd.f32 %v317_v28, %v316_v5  ;;  %v369_v12 = vadd.f32 %v368_v9, %v367_v6  ;;  %489 = vst.msk [vmem:[%s892_s3 + $0x1c] sm:$0xf] %vm481_vm2, %v563_v7 }
 0x119   :  { %497 = vst.msk [vmem:[%s892_s3 + $0x3c] sm:$0xf] %vm481_vm2, %v571_v26 }
 0x11a   :  { %v371_v16 = vadd.f32 %v370_v13, %v369_v12  ;;  %v320_v17 = vadd.f32 %v319_v35, %v318_v11 }
 0x11c   :  { %v322_v21 = vadd.f32 %v321_v19, %v320_v17  ;;  %v373_v52 = vadd.f32 %v372_v18, %v371_v16 }
 0x11e   :  { %v324_v29 = vadd.f32 %v323_v24, %v322_v21  ;;  %v375_v30 = vadd.f32 %v374_v22, %v373_v52 }
 0x120   :  { %v377_v33 = vadd.f32 %v376_v31, %v375_v30  ;;  %v326_v34 = vadd.f32 %v325_v61, %v324_v29 }
 0x122   :  { %v379_v38 = vadd.f32 %v378_v36, %v377_v33  ;;  %v328_v39 = vadd.f32 %v327_v32, %v326_v34 }
 0x124   :  { %v381_v41 = vadd.f32 %v380_v37, %v379_v38  ;;  %v330_v42 = vadd.f32 %v329_v40, %v328_v39 }
 0x126   :  { %v331_v45 = vrot.slane %v330_v42, 4  ;;  %v383_v46 = vadd.f32 %v382_v44, %v381_v41 }
 0x128   :  { %v332_v23 = vadd.f32 %v331_v45, %v330_v42  ;;  %v384_v47 = vrot.slane %v383_v46, 4 }
 0x12a   :  { %v333_v43 = vrot.slane %v332_v23, 2  ;;  %v385_v48 = vadd.f32 %v384_v47, %v383_v46 }
 0x12c   :  { %v334_v49 = vadd.f32 %v333_v43, %v332_v23  ;;  %v386_v50 = vrot.slane %v385_v48, 2 }
 0x12e   :  { %v335_v51 = vrot.slane %v334_v49, 1  ;;  %v387_v53 = vadd.f32 %v386_v50, %v385_v48 }
 0x130   :  { %v388_v55 = vrot.slane %v387_v53, 1  ;;  %v336_v56 = vadd.f32 %v335_v51, %v334_v49 }
 0x132   :  { %v389_v57 = vadd.f32 %v388_v55, %v387_v53 }
 0x134   :  { %v391_v54 = vsel %vm390_vm3, %v336_v56, %v389_v57 }
 0x135   :  { %393 = vst.msk [vmem:[%s893_s4] sm:$0x3] %vm392_vm4, %v391_v54 }

// kernel: encoder_forward.22
= control target key start
LH: loop header
LB: loop body
LE: loop exit
PB: predicated region body
PF: predicated region fallthrough
CT: control target
= control target key end

     0   :  { %s128_s0 = inlined_call_operand.vmem [shape: bf16[32,128], index: 0, kind: input, shape index: {}]   ;;  %s129_s1 = inlined_call_operand.vmem [shape: f32[2,128], index: 1, kind: input, shape index: {}]   ;;  %s130_s2 = inlined_call_operand.vmem [shape: bf16[32,128], index: 2, kind: output, shape index: {}]  }
   0x1   :  { %v65_v0 = vld [vmem:[%s129_s1] ss:$0 sm:$0xff]  ;;  %v93_v4 = vld [vmem:[%s128_s0 + $0x8] sm:$0xff]   ;;  %v66_v5 = vld [vmem:[%s129_s1 + $0x1] ss:$0 sm:$0xff] }
   0x2   :  { %v76_v1 = vld [vmem:[%s128_s0] sm:$0xff]   ;;  %v81_v6 = vunpack.c.l.bf16 %v93_v4  ;;  %v82_v7 = vunpack.c.h.bf16 %v93_v4 }
   0x3   :  { %v77_v2 = vunpack.c.l.bf16 %v76_v1  ;;  %v78_v3 = vunpack.c.h.bf16 %v76_v1 }
   0x4   :  { %v27_v10 = vmul.f32 %v81_v6, %v65_v0  ;;  %v28_v11 = vmul.f32 %v82_v7, %v65_v0 }
   0x5   :  { %v25_v8 = vmul.f32 %v77_v2, %v65_v0  ;;  %v26_v9 = vmul.f32 %v78_v3, %v65_v0 }
   0x6   :  { %v35_v14 = vadd.f32 %v66_v5, %v27_v10  ;;  %v36_v15 = vadd.f32 %v66_v5, %v28_v11 }
   0x7   :  { %v33_v12 = vadd.f32 %v66_v5, %v25_v8  ;;  %v34_v13 = vadd.f32 %v66_v5, %v26_v9 }
   0x8   :  { %v39_v18 = vmax.f32 %v35_v14, 0.0  ;;  %v40_v19 = vmax.f32 %v36_v15, 0.0 }
   0x9   :  { %v37_v16 = vmax.f32 %v33_v12, 0.0  ;;  %v38_v17 = vmax.f32 %v34_v13, 0.0 }
   0xa   :  { %v91_v21 = vpack.c.bf16 %v40_v19, %v39_v18 }
   0xb   :  { %v86_v20 = vpack.c.bf16 %v38_v17, %v37_v16 }
   0xc   :  { %94 = vst [vmem:[%s130_s2 + $0x8] sm:$0xff] %v91_v21  }
   0xd   :  { %87 = vst [vmem:[%s130_s2] sm:$0xff] %v86_v20  }

// kernel: encoder_forward.23
= control target key start
LH: loop header
LB: loop body
LE: loop exit
PB: predicated region body
PF: predicated region fallthrough
CT: control target
= control target key end

     0   :  { %vm313_vm0 = vcmask 261120   ;;  %vm713_vm1 = vcmask 257024   ;;  %vm622_vm2 = vcmask 1040384   ;;  %vm624_vm3 = vcmask 254976   ;;  %s1275_s1 = inlined_call_operand.vmem [shape: bf16[288,32], index: 1, kind: input, shape index: {}]   ;;  %s1276_s0 = inlined_call_operand.vmem [shape: bf16[128,288], index: 0, kind: input, shape index: {}]   ;;  %s1277_s2 = inlined_call_operand.vmem [shape: f32[1,32], index: 2, kind: input, shape index: {}]   ;;  %s1278_s3 = inlined_call_operand.vmem [shape: bf16[128,32], index: 3, kind: output, shape index: {0}]   ;;  %s1279_s4 = inlined_call_operand.vmem [shape: f32[1,2,32], index: 4, kind: output, shape index: {1}]  }
   0x1   :  { %v931_v0 = vld [vmem:[%s1275_s1 + $0x40] sm:$0xff]   ;;  %v933_v2 = vld [vmem:[%s1275_s1 + $0x48] sm:$0xff]   ;;  %v935_v4 = vld [vmem:[%s1275_s1 + $0x50] sm:$0xff]  }
   0x2   :  { %v932_v1 = vld [vmem:[%s1275_s1] sm:$0xff]   ;;  %821 = vmatprep.subr.bf16.mxu0 %v931_v0  ;;  %915 = vmatprep.subr.bf16.mxu1 %v931_v0  ;;  %v934_v3 = vld [vmem:[%s1275_s1 + $0x8] sm:$0xff]   ;;  %v936_v5 = vld [vmem:[%s1275_s1 + $0x10] sm:$0xff]  }
   0x3   :  { %822 = vmatpush3.bf16.msra.mxu0 %v932_v1  ;;  %923 = vmatpush3.bf16.msra.mxu1 %v932_v1  ;;  %v937_v6 = vld [vmem:[%s1275_s1 + $0x58] sm:$0xff]   ;;  %v939_v8 = vld [vmem:[%s1275_s1 + $0x60] sm:$0xff]   ;;  %v941_v10 = vld [vmem:[%s1275_s1 + $0x68] sm:$0xff]  }
   0x4   :  { %823 = vmatprep.subr.bf16.mxu0 %v933_v2  ;;  %916 = vmatprep.subr.bf16.mxu1 %v933_v2  ;;  %v938_v7 = vld [vmem:[%s1275_s1 + $0x18] sm:$0xff]   ;;  %v940_v9 = vld [vmem:[%s1275_s1 + $0x20] sm:$0xff]   ;;  %v942_v13 = vld [vmem:[%s1275_s1 + $0x28] sm:$0xff]  }
   0x5   :  { %v949_v11 = vld [vmem:[%s1276_s0 + $0x4] ss:$12 sps:$4 sm:$0xff]   ;;  %v952_v12 = vld [vmem:[%s1276_s0 + $0x94] ss:$12 sps:$4 sm:$0xff]   ;;  %v945_v16 = vld [vmem:[%s1275_s1 + $0x78] sm:$0xff]  }
   0x6   :  { %v943_v14 = vld [vmem:[%s1275_s1 + $0x70] sm:$0xff]   ;;  %370 = vmatprep.mubr.bf16.mxu0 %v949_v11  ;;  %418 = vmatprep.mubr.bf16.mxu1 %v952_v12  ;;  %v946_v17 = vld [vmem:[%s1275_s1 + $0x38] sm:$0xff]   ;;  %v947_v18 = vld [vmem:[%s1276_s0] ss:$12 sps:$4 sm:$0xff]  }
   0x7   :  { %824 = vmatpush3.bf16.msra.mxu0 %v934_v3  ;;  %924 = vmatpush3.bf16.msra.mxu1 %v934_v3  ;;  %v944_v15 = vld [vmem:[%s1275_s1 + $0x30] sm:$0xff]   ;;  %v953_v19 = vld [vmem:[%s1275_s1 + $0x80] sm:$0xff]   ;;  %v954_v21 = vld [vmem:[%s1276_s0 + $0x1c] ss:$12 sps:$4 sm:$0xff]  }
   0x8   :  { %825 = vmatprep.subr.bf16.mxu0 %v935_v4  ;;  %917 = vmatprep.subr.bf16.mxu1 %v935_v4  ;;  %v950_v20 = vld [vmem:[%s1276_s0 + $0x90] ss:$12 sps:$4 sm:$0xff]   ;;  %v956_v22 = vld [vmem:[%s1276_s0 + $0xac] ss:$12 sps:$4 sm:$0xff]   ;;  %v959_v25 = vld [vmem:[%s1276_s0 + $0xa8] ss:$12 sps:$4 sm:$0xff]  }
   0x9   :  { %v960_v23 = vld [vmem:[%s1275_s1 + $0x88] sm:$0xff]   ;;  %v958_v24 = vld [vmem:[%s1276_s0 + $0x18] ss:$12 sps:$4 sm:$0xff]   ;;  %v961_v26 = vld [vmem:[%s1276_s0 + $0x34] ss:$12 sps:$4 sm:$0xff]  }
   0xa   :  { %v963_v27 = vld [vmem:[%s1276_s0 + $0x8] ss:$12 sps:$4 sm:$0xff]   ;;  %v964_v28 = vld [vmem:[%s1276_s0 + $0x30] ss:$12 sps:$4 sm:$0xff]   ;;  %v965_v29 = vld [vmem:[%s1276_s0 + $0x20] ss:$12 sps:$4 sm:$0xff]  }
   0xb   :  { %826 = vmatpush3.bf16.msra.mxu0 %v936_v5  ;;  %925 = vmatpush3.bf16.msra.mxu1 %v936_v5  ;;  %v966_v30 = vld [vmem:[%s1276_s0 + $0x4c] ss:$12 sps:$4 sm:$0xff]   ;;  %v969_v32 = vld [vmem:[%s1276_s0 + $0x48] ss:$12 sps:$4 sm:$0xff]   ;;  %v970_v33 = vld [vmem:[%s1276_s0 + $0x50] ss:$12 sps:$4 sm:$0xff]  }
   0xc   :  { %827 = vmatprep.subr.bf16.mxu0 %v937_v6  ;;  %918 = vmatprep.subr.bf16.mxu1 %v937_v6  ;;  %v968_v31 = vld [vmem:[%s1276_s0 + $0x38] ss:$12 sps:$4 sm:$0xff]   ;;  %v973_v35 = vld [vmem:[%s1276_s0 + $0x68] ss:$12 sps:$4 sm:$0xff]   ;;  %v974_v36 = vld [vmem:[%s1276_s0 + $0x60] ss:$12 sps:$4 sm:$0xff]  }
   0xd   :  { %v971_v34 = vld [vmem:[%s1276_s0 + $0x64] ss:$12 sps:$4 sm:$0xff]   ;;  %v975_v37 = vld [vmem:[%s1276_s0 + $0x80] ss:$12 sps:$4 sm:$0xff]   ;;  %v976_v38 = vld [vmem:[%s1276_s0 + $0x7c] ss:$12 sps:$4 sm:$0xff]  }
   0xe   :  { %v978_v39 = vld [vmem:[%s1276_s0 + $0x98] ss:$12 sps:$4 sm:$0xff]   ;;  %v980_v41 = vld [vmem:[%s1276_s0 + $0xb0] ss:$12 sps:$4 sm:$0xff]   ;;  %v1151_v4 = vld [vmem:[%s1277_s2] ss:$0 sm:$0xff] }
   0xf   :  { %828 = vmatpush3.bf16.msra.mxu0 %v938_v7  ;;  %926 = vmatpush3.bf16.msra.mxu1 %v938_v7  ;;  %v979_v40 = vld [vmem:[%s1276_s0 + $0x78] ss:$12 sps:$4 sm:$0xff]  }
  0x10   :  { %829 = vmatprep.subr.bf16.mxu0 %v939_v8  ;;  %919 = vmatprep.subr.bf16.mxu1 %v939_v8 }
  0x13   :  { %830 = vmatpush3.bf16.msra.mxu0 %v940_v9  ;;  %927 = vmatpush3.bf16.msra.mxu1 %v940_v9 }
  0x14   :  { %831 = vmatprep.subr.bf16.mxu0 %v941_v10  ;;  %920 = vmatprep.subr.bf16.mxu1 %v941_v10 }
  0x17   :  { %832 = vmatpush3.bf16.msra.mxu0 %v942_v13  ;;  %928 = vmatpush3.bf16.msra.mxu1 %v942_v13 }
  0x18   :  { %833 = vmatprep.subr.bf16.mxu0 %v943_v14  ;;  %921 = vmatprep.subr.bf16.mxu1 %v943_v14 }
  0x1b   :  { %834 = vmatpush3.bf16.msra.mxu0 %v944_v15  ;;  %929 = vmatpush3.bf16.msra.mxu1 %v944_v15 }
  0x1c   :  { %835 = vmatprep.subr.bf16.mxu0 %v945_v16  ;;  %922 = vmatprep.subr.bf16.mxu1 %v945_v16 }
  0x1f   :  { %836 = vmatpush3.bf16.msra.mxu0 %v946_v17  ;;  %930 = vmatpush3.bf16.msra.mxu1 %v946_v17 }
  0x20   :  { %895 = vmatprep.subr.bf16.mxu1 %v953_v19 }
  0x22   :  { %371 = vmatmul.mubr.bf16.vlgmr.msra.gmra.mrb[0].mxu0 %v947_v18  ;;  %419 = vmatmul.mubr.bf16.vlgmr.msra.gmra.mrb[0].mxu1 %v950_v20 }
  0x23   :  { %896 = vmatpush3.bf16.msra.mxu1 %v953_v19  ;;  %378 = vmatprep.mubr.bf16.mxu0 %v954_v21 }
  0x24   :  { %426 = vmatprep.mubr.bf16.mxu1 %v956_v22  ;;  %897 = vmatprep.subr.bf16.mxu1 %v960_v23 }
  0x27   :  { %898 = vmatpush3.bf16.msra.mxu1 %v960_v23 }
  0x2a   :  { %379 = vmatmul.mubr.bf16.gmra.mrb[4].mxu0 %v958_v24  ;;  %427 = vmatmul.mubr.bf16.gmra.mrb[4].mxu1 %v959_v25 }
  0x2b   :  { %386 = vmatprep.mubr.bf16.mxu0 %v961_v26  ;;  %899 = vmatprep.mubr.msk.bf16.mxu1 %vm313_vm0, %v963_v27 }
  0x32   :  { %387 = vmatmul.mubr.bf16.gmra.mrb[8].mxu0 %v964_v28  ;;  %900 = vmatmul.mubr.msk.bf16.vlgmr.msra.gmra.mrb[8].mxu1 %vm313_vm0, %v965_v29 }
  0x33   :  { %394 = vmatprep.mubr.bf16.mxu0 %v966_v30  ;;  %903 = vmatprep.mubr.msk.bf16.mxu1 %vm313_vm0, %v968_v31 }
  0x3a   :  { %395 = vmatmul.mubr.bf16.gmra.mrb[12].mxu0 %v969_v32  ;;  %904 = vmatmul.mubr.msk.bf16.gmra.mrb[12].mxu1 %vm313_vm0, %v970_v33 }
  0x3b   :  { %402 = vmatprep.mubr.bf16.mxu0 %v971_v34  ;;  %907 = vmatprep.mubr.msk.bf16.mxu1 %vm313_vm0, %v973_v35 }
  0x42   :  { %403 = vmatmul.mubr.bf16.gmra.mrb[16].mxu0 %v974_v36  ;;  %908 = vmatmul.mubr.msk.bf16.gmra.mrb[16].mxu1 %vm313_vm0, %v975_v37 }
  0x43   :  { %410 = vmatprep.mubr.bf16.mxu0 %v976_v38  ;;  %911 = vmatprep.mubr.msk.bf16.mxu1 %vm313_vm0, %v978_v39 }
  0x4a   :  { %411 = vmatmul.mubr.bf16.gmra.mrb[20].mxu0 %v979_v40  ;;  %912 = vmatmul.mubr.msk.bf16.gmra.mrb[20].mxu1 %vm313_vm0, %v980_v41 }
  0xf5   :  { %v837_v42 = vpop.f32.mrb[0].mxu0  ;;  %v873_v43 = vpop.f32.mrb[0].mxu1 }
  0xf6   :  { %v838_v44 = vpop.f32.mrb[1].mxu0  ;;  %v874_v45 = vpop.f32.mrb[1].mxu1 }
  0xf7   :  { %v839_v46 = vadd.f32 %v838_v44, %v837_v42  ;;  %v840_v47 = vpop.f32.mrb[2].mxu0  ;;  %v1140_v48 = vadd.f32 %v874_v45, %v873_v43  ;;  %v876_v49 = vpop.f32.mrb[2].mxu1 }
  0xf8   :  { %v841_v50 = vpop.f32.mrb[3].mxu0  ;;  %v877_v51 = vpop.f32.mrb[3].mxu1 }
  0xf9   :  { %v842_v52 = vadd.f32 %v841_v50, %v840_v47  ;;  %v1142_v53 = vadd.f32 %v877_v51, %v876_v49 }
  0xfd   :  { %v843_v54 = vpop.f32.mrb[4].mxu0  ;;  %v879_v55 = vpop.f32.mrb[4].mxu1 }
  0xfe   :  { %v844_v56 = vpop.f32.mrb[5].mxu0  ;;  %v880_v57 = vpop.f32.mrb[5].mxu1 }
  0xff   :  { %v845_v58 = vadd.f32 %v844_v56, %v843_v54  ;;  %v846_v59 = vpop.f32.mrb[6].mxu0  ;;  %v1144_v60 = vadd.f32 %v880_v57, %v879_v55  ;;  %v882_v61 = vpop.f32.mrb[6].mxu1 }
 0x100   :  { %v847_v62 = vpop.f32.mrb[7].mxu0  ;;  %v883_v63 = vpop.f32.mrb[7].mxu1 }
 0x101   :  { %v848_v0 = vadd.f32 %v847_v62, %v846_v59  ;;  %v1146_v1 = vadd.f32 %v883_v63, %v882_v61 }
 0x105   :  { %v849_v2 = vpop.f32.mrb[8].mxu0  ;;  %v901_v3 = vpop.f32.mrb[8].mxu1 }
 0x106   :  { %v478_v5 = vadd.f32 %v901_v3, %v845_v58  ;;  %v850_v6 = vpop.f32.mrb[9].mxu0  ;;  %v469_v7 = vpop.f32.mrb[9].mxu1 }
 0x107   :  { %v851_v8 = vadd.f32 %v850_v6, %v849_v2  ;;  %v470_v9 = vadd.f32 %v839_v46, %v469_v7  ;;  %v852_v10 = vpop.f32.mrb[10].mxu0  ;;  %v902_v11 = vpop.f32.mrb[10].mxu1 }
 0x108   :  { %v635_v12 = vadd.f32 %v1151_v4, %v478_v5  ;;  %v481_v13 = vadd.f32 %v902_v11, %v848_v0  ;;  %v853_v14 = vpop.f32.mrb[11].mxu0  ;;  %v472_v15 = vpop.f32.mrb[11].mxu1  ;;  %v571_v23 = vmul.f32 %v478_v5, %v478_v5  ;;  %v535_v31 = vsel %vm313_vm0, %v478_v5, 0.0 }
 0x109   :  { %v633_v16 = vadd.f32 %v1151_v4, %v470_v9  ;;  %v854_v17 = vadd.f32 %v853_v14, %v852_v10  ;;  %v569_v19 = vmul.f32 %v470_v9, %v470_v9  ;;  %v473_v22 = vadd.f32 %v842_v52, %v472_v15 }
 0x10a   :  { %v807_v18 = vpack.c.bf16 %v635_v12, %v635_v12  ;;  %v636_v21 = vadd.f32 %v1151_v4, %v481_v13  ;;  %v532_v24 = vsel %vm313_vm0, %v470_v9, 0.0  ;;  %v572_v33 = vmul.f32 %v481_v13, %v481_v13 }
 0x10b   :  { %v805_v20 = vpack.c.bf16 %v633_v16, %v633_v16  ;;  %v533_v26 = vsel %vm313_vm0, %v473_v22, 0.0  ;;  %v570_v27 = vmul.f32 %v473_v22, %v473_v22  ;;  %v634_v28 = vadd.f32 %v1151_v4, %v473_v22 }
 0x10c   :  { %716 = vst.msk [vmem:[%s1278_s3 + $0x8] sm:$0xf] %vm713_vm1, %v807_v18  ;;  %v808_v25 = vpack.c.bf16 %v636_v21, %v636_v21  ;;  %v585_v32 = vsel %vm313_vm0, %v569_v19, 0.0  ;;  %v534_v34 = vadd.f32 %v533_v26, %v532_v24  ;;  %v588_v43 = vsel %vm313_vm0, %v571_v23, 0.0 }
 0x10d   :  { %714 = vst.msk [vmem:[%s1278_s3] sm:$0xf] %vm713_vm1, %v805_v20  ;;  %v855_v29 = vpop.f32.mrb[12].mxu0  ;;  %v905_v30 = vpop.f32.mrb[12].mxu1  ;;  %v586_v37 = vsel %vm313_vm0, %v570_v27, 0.0  ;;  %v806_v38 = vpack.c.bf16 %v634_v28, %v634_v28  ;;  %v537_v44 = vsel %vm313_vm0, %v481_v13, 0.0 }
 0x10e   :  { %v856_v35 = vpop.f32.mrb[13].mxu0  ;;  %v485_v36 = vpop.f32.mrb[13].mxu1  ;;  %717 = vst.msk [vmem:[%s1278_s3 + $0xc] sm:$0xf] %vm713_vm1, %v808_v25  ;;  %v536_v45 = vadd.f32 %v535_v31, %v534_v34  ;;  %v587_v46 = vadd.f32 %v586_v37, %v585_v32  ;;  %v590_v59 = vsel %vm313_vm0, %v572_v33, 0.0 }
 0x10f   :  { %v857_v39 = vadd.f32 %v856_v35, %v855_v29  ;;  %v486_v40 = vadd.f32 %v851_v8, %v485_v36  ;;  %v858_v41 = vpop.f32.mrb[14].mxu0  ;;  %v906_v42 = vpop.f32.mrb[14].mxu1  ;;  %715 = vst.msk [vmem:[%s1278_s3 + $0x4] sm:$0xf] %vm713_vm1, %v806_v38 }
 0x110   :  { %v859_v47 = vpop.f32.mrb[15].mxu0  ;;  %v488_v49 = vpop.f32.mrb[15].mxu1  ;;  %v589_v55 = vadd.f32 %v588_v43, %v587_v46  ;;  %v538_v56 = vadd.f32 %v537_v44, %v536_v45 }
 0x111   :  { %v494_v50 = vadd.f32 %v905_v30, %v857_v39  ;;  %v539_v51 = vsel %vm313_vm0, %v486_v40, 0.0  ;;  %v573_v52 = vmul.f32 %v486_v40, %v486_v40  ;;  %v637_v54 = vadd.f32 %v1151_v4, %v486_v40 }
 0x112   :  { %v860_v57 = vadd.f32 %v859_v47, %v858_v41  ;;  %v489_v58 = vadd.f32 %v854_v17, %v488_v49  ;;  %v540_v0 = vadd.f32 %v539_v51, %v538_v56  ;;  %v591_v2 = vadd.f32 %v590_v59, %v589_v55 }
 0x113   :  { %v575_v61 = vmul.f32 %v494_v50, %v494_v50  ;;  %v639_v62 = vadd.f32 %v1151_v4, %v494_v50  ;;  %v592_v63 = vsel %vm313_vm0, %v573_v52, 0.0  ;;  %v809_v3 = vpack.c.bf16 %v637_v54, %v637_v54 }
 0x114   :  { %v497_v5 = vadd.f32 %v906_v42, %v860_v57  ;;  %v541_v7 = vsel %vm313_vm0, %v489_v58, 0.0  ;;  %v574_v8 = vmul.f32 %v489_v58, %v489_v58  ;;  %v593_v11 = vadd.f32 %v592_v63, %v591_v2 }
 0x115   :  { %v811_v6 = vpack.c.bf16 %v639_v62, %v639_v62  ;;  %v861_v9 = vpop.f32.mrb[16].mxu0  ;;  %v909_v10 = vpop.f32.mrb[16].mxu1  ;;  %718 = vst.msk [vmem:[%s1278_s3 + $0x10] sm:$0xf] %vm713_vm1, %v809_v3  ;;  %v542_v16 = vadd.f32 %v541_v7, %v540_v0  ;;  %v638_v18 = vadd.f32 %v1151_v4, %v489_v58  ;;  %v543_v22 = vsel %vm313_vm0, %v494_v50, 0.0 }
 0x116   :  { %v576_v12 = vmul.f32 %v497_v5, %v497_v5  ;;  %v640_v13 = vadd.f32 %v1151_v4, %v497_v5  ;;  %v862_v14 = vpop.f32.mrb[17].mxu0  ;;  %v501_v15 = vpop.f32.mrb[17].mxu1  ;;  %v594_v17 = vsel %vm313_vm0, %v574_v8, 0.0  ;;  %v596_v23 = vsel %vm313_vm0, %v575_v61, 0.0 }
 0x117   :  { %720 = vst.msk [vmem:[%s1278_s3 + $0x18] sm:$0xf] %vm713_vm1, %v811_v6  ;;  %v863_v19 = vadd.f32 %v862_v14, %v861_v9  ;;  %v864_v20 = vpop.f32.mrb[18].mxu0  ;;  %v1197_v21 = vpop.f32.mrb[18].mxu1  ;;  %v595_v25 = vadd.f32 %v594_v17, %v593_v11  ;;  %v544_v28 = vadd.f32 %v543_v22, %v542_v16  ;;  %v810_v29 = vpack.c.bf16 %v638_v18, %v638_v18 }
 0x118   :  { %v812_v24 = vpack.c.bf16 %v640_v13, %v640_v13  ;;  %v865_v26 = vpop.f32.mrb[19].mxu0  ;;  %v504_v27 = vpop.f32.mrb[19].mxu1  ;;  %v545_v32 = vsel %vm313_vm0, %v497_v5, 0.0  ;;  %v598_v33 = vsel %vm313_vm0, %v576_v12, 0.0 }
 0x119   :  { %v866_v30 = vadd.f32 %v865_v26, %v864_v20  ;;  %v502_v31 = vadd.f32 %v863_v19, %v501_v15  ;;  %v597_v34 = vadd.f32 %v596_v23, %v595_v25  ;;  %719 = vst.msk [vmem:[%s1278_s3 + $0x14] sm:$0xf] %vm713_vm1, %v810_v29  ;;  %v546_v35 = vadd.f32 %v545_v32, %v544_v28 }
 0x11a   :  { %721 = vst.msk [vmem:[%s1278_s3 + $0x1c] sm:$0xf] %vm713_vm1, %v812_v24 }
 0x11b   :  { %v547_v36 = vsel %vm313_vm0, %v502_v31, 0.0  ;;  %v577_v37 = vmul.f32 %v502_v31, %v502_v31  ;;  %v641_v38 = vadd.f32 %v1151_v4, %v502_v31  ;;  %v599_v39 = vadd.f32 %v598_v33, %v597_v34 }
 0x11c   :  { %v505_v40 = vadd.f32 %v866_v30, %v504_v27  ;;  %v548_v41 = vadd.f32 %v547_v36, %v546_v35 }
 0x11d   :  { %v600_v42 = vsel %vm313_vm0, %v577_v37, 0.0  ;;  %v813_v43 = vpack.c.bf16 %v641_v38, %v641_v38  ;;  %v867_v44 = vpop.f32.mrb[20].mxu0  ;;  %v913_v45 = vpop.f32.mrb[20].mxu1 }
 0x11e   :  { %v601_v46 = vadd.f32 %v600_v42, %v599_v39  ;;  %v549_v47 = vsel %vm313_vm0, %v505_v40, 0.0  ;;  %v578_v49 = vmul.f32 %v505_v40, %v505_v40  ;;  %v642_v50 = vadd.f32 %v1151_v4, %v505_v40  ;;  %v868_v51 = vpop.f32.mrb[21].mxu0  ;;  %v517_v52 = vpop.f32.mrb[21].mxu1 }
 0x11f   :  { %722 = vst.msk [vmem:[%s1278_s3 + $0x20] sm:$0xf] %vm713_vm1, %v813_v43  ;;  %v550_v54 = vadd.f32 %v549_v47, %v548_v41  ;;  %v526_v55 = vadd.f32 %v913_v45, %v1144_v60  ;;  %v869_v56 = vadd.f32 %v868_v51, %v867_v44  ;;  %v518_v57 = vadd.f32 %v1140_v48, %v517_v52  ;;  %v870_v58 = vpop.f32.mrb[22].mxu0  ;;  %v914_v59 = vpop.f32.mrb[22].mxu1 }
 0x120   :  { %v602_v61 = vsel %vm313_vm0, %v578_v49, 0.0  ;;  %v814_v62 = vpack.c.bf16 %v642_v50, %v642_v50  ;;  %v529_v63 = vadd.f32 %v914_v59, %v1146_v1  ;;  %v871_v0 = vpop.f32.mrb[23].mxu0  ;;  %v520_v2 = vpop.f32.mrb[23].mxu1 }
 0x121   :  { %v603_v3 = vadd.f32 %v602_v61, %v601_v46  ;;  %v647_v5 = vadd.f32 %v1151_v4, %v526_v55  ;;  %v510_v60 = vadd.f32 %v909_v10, %v869_v56  ;;  %v645_v48 = vadd.f32 %v1151_v4, %v518_v57 }
 0x122   :  { %723 = vst.msk [vmem:[%s1278_s3 + $0x24] sm:$0xf] %vm713_vm1, %v814_v62  ;;  %v648_v12 = vadd.f32 %v1151_v4, %v529_v63  ;;  %v872_v14 = vadd.f32 %v871_v0, %v870_v58  ;;  %v521_v15 = vadd.f32 %v1142_v53, %v520_v2  ;;  %v581_v53 = vmul.f32 %v518_v57, %v518_v57 }
 0x123   :  { %v819_v6 = vpack.c.bf16 %v647_v5, %v647_v5  ;;  %v551_v7 = vsel %vm313_vm0, %v510_v60, 0.0  ;;  %v579_v8 = vmul.f32 %v510_v60, %v510_v60  ;;  %v643_v9 = vadd.f32 %v1151_v4, %v510_v60 }
 0x124   :  { %v552_v1 = vadd.f32 %v551_v7, %v550_v54  ;;  %v817_v11 = vpack.c.bf16 %v645_v48, %v645_v48  ;;  %v820_v17 = vpack.c.bf16 %v648_v12, %v648_v12  ;;  %v513_v18 = vadd.f32 %v1197_v21, %v872_v14 }
 0x125   :  { %728 = vst.msk [vmem:[%s1278_s3 + $0x38] sm:$0xf] %vm713_vm1, %v819_v6  ;;  %v604_v13 = vsel %vm313_vm0, %v579_v8, 0.0  ;;  %v815_v10 = vpack.c.bf16 %v643_v9, %v643_v9  ;;  %v646_v19 = vadd.f32 %v1151_v4, %v521_v15  ;;  %v555_v26 = vsel %vm313_vm0, %v518_v57, 0.0 }
 0x126   :  { %v605_v16 = vadd.f32 %v604_v13, %v603_v3  ;;  %726 = vst.msk [vmem:[%s1278_s3 + $0x30] sm:$0xf] %vm713_vm1, %v817_v11  ;;  %729 = vst.msk [vmem:[%s1278_s3 + $0x3c] sm:$0xf] %vm713_vm1, %v820_v17  ;;  %v553_v20 = vsel %vm313_vm0, %v513_v18, 0.0  ;;  %v580_v22 = vmul.f32 %v513_v18, %v513_v18  ;;  %v644_v23 = vadd.f32 %v1151_v4, %v513_v18 }
 0x127   :  { %724 = vst.msk [vmem:[%s1278_s3 + $0x28] sm:$0xf] %vm713_vm1, %v815_v10  ;;  %v554_v24 = vadd.f32 %v553_v20, %v552_v1  ;;  %v818_v25 = vpack.c.bf16 %v646_v19, %v646_v19  ;;  %v582_v28 = vmul.f32 %v521_v15, %v521_v15  ;;  %v583_v31 = vmul.f32 %v526_v55, %v526_v55 }
 0x128   :  { %v606_v27 = vsel %vm313_vm0, %v580_v22, 0.0  ;;  %v816_v21 = vpack.c.bf16 %v644_v23, %v644_v23  ;;  %v608_v32 = vsel %vm313_vm0, %v581_v53, 0.0  ;;  %v557_v4 = vsel %vm313_vm0, %v521_v15, 0.0 }
 0x129   :  { %v607_v29 = vadd.f32 %v606_v27, %v605_v16  ;;  %v556_v30 = vadd.f32 %v555_v26, %v554_v24  ;;  %727 = vst.msk [vmem:[%s1278_s3 + $0x34] sm:$0xf] %vm713_vm1, %v818_v25  ;;  %v559_v35 = vsel %vm313_vm0, %v526_v55, 0.0  ;;  %v584_v36 = vmul.f32 %v529_v63, %v529_v63 }
 0x12a   :  { %725 = vst.msk [vmem:[%s1278_s3 + $0x2c] sm:$0xf] %vm713_vm1, %v816_v21  ;;  %v610_v37 = vsel %vm313_vm0, %v582_v28, 0.0  ;;  %v612_v40 = vsel %vm313_vm0, %v583_v31, 0.0  ;;  %v561_v41 = vsel %vm313_vm0, %v529_v63, 0.0 }
 0x12b   :  { %v558_v33 = vadd.f32 %v557_v4, %v556_v30  ;;  %v609_v34 = vadd.f32 %v608_v32, %v607_v29  ;;  %v614_v44 = vsel %vm313_vm0, %v584_v36, 0.0 }
 0x12d   :  { %v560_v38 = vadd.f32 %v559_v35, %v558_v33  ;;  %v611_v39 = vadd.f32 %v610_v37, %v609_v34 }
 0x12f   :  { %v562_v42 = vadd.f32 %v561_v41, %v560_v38  ;;  %v613_v43 = vadd.f32 %v612_v40, %v611_v39 }
 0x131   :  { %v563_v45 = vrot.slane %v562_v42, 4  ;;  %v615_v46 = vadd.f32 %v614_v44, %v613_v43 }
 0x133   :  { %v564_v47 = vadd.f32 %v563_v45, %v562_v42  ;;  %v616_v49 = vrot.slane %v615_v46, 4 }
 0x135   :  { %v565_v50 = vrot.slane %v564_v47, 2  ;;  %v617_v51 = vadd.f32 %v616_v49, %v615_v46 }
 0x137   :  { %v566_v52 = vadd.f32 %v565_v50, %v564_v47  ;;  %v618_v54 = vrot.slane %v617_v51, 2 }
 0x139   :  { %v567_v55 = vrot.slane %v566_v52, 1  ;;  %v619_v56 = vadd.f32 %v618_v54, %v617_v51 }
 0x13b   :  { %v620_v57 = vrot.slane %v619_v56, 1  ;;  %v568_v58 = vadd.f32 %v567_v55, %v566_v52 }
 0x13d   :  { %v621_v59 = vadd.f32 %v620_v57, %v619_v56 }
 0x13f   :  { %v623_v61 = vsel %vm622_vm2, %v568_v58, %v621_v59 }
 0x140   :  { %625 = vst.msk [vmem:[%s1279_s4] sm:$0x3] %vm624_vm3, %v623_v61 }

// kernel: encoder_forward.24
= control target key start
LH: loop header
LB: loop body
LE: loop exit
PB: predicated region body
PF: predicated region fallthrough
CT: control target
= control target key end

     0   :  { %s163_s0 = inlined_call_operand.vmem [shape: bf16[32,128], index: 0, kind: input, shape index: {}]   ;;  %s164_s1 = inlined_call_operand.vmem [shape: f32[2,128], index: 1, kind: input, shape index: {}]   ;;  %s165_s2 = inlined_call_operand.vmem [shape: bf16[32,128], index: 2, kind: input, shape index: {}]   ;;  %s166_s3 = inlined_call_operand.vmem [shape: bf16[32,128], index: 3, kind: output, shape index: {}]  }
   0x1   :  { %v80_v0 = vld [vmem:[%s164_s1] ss:$0 sm:$0xff]  ;;  %v116_v5 = vld [vmem:[%s163_s0 + $0x8] sm:$0xff]   ;;  %v81_v7 = vld [vmem:[%s164_s1 + $0x1] ss:$0 sm:$0xff] }
   0x2   :  { %v91_v1 = vld [vmem:[%s163_s0] sm:$0xff]   ;;  %v117_v6 = vld [vmem:[%s165_s2 + $0x8] sm:$0xff]   ;;  %v96_v8 = vunpack.c.l.bf16 %v116_v5  ;;  %v97_v9 = vunpack.c.h.bf16 %v116_v5 }
   0x3   :  { %v92_v2 = vunpack.c.l.bf16 %v91_v1  ;;  %v93_v3 = vunpack.c.h.bf16 %v91_v1  ;;  %v99_v4 = vld [vmem:[%s165_s2] sm:$0xff]   ;;  %v104_v16 = vunpack.c.l.bf16 %v117_v6  ;;  %v105_v17 = vunpack.c.h.bf16 %v117_v6 }
   0x4   :  { %v100_v12 = vunpack.c.l.bf16 %v99_v4  ;;  %v101_v13 = vunpack.c.h.bf16 %v99_v4  ;;  %v30_v14 = vmul.f32 %v96_v8, %v80_v0  ;;  %v31_v15 = vmul.f32 %v97_v9, %v80_v0 }
   0x5   :  { %v28_v10 = vmul.f32 %v92_v2, %v80_v0  ;;  %v29_v11 = vmul.f32 %v93_v3, %v80_v0 }
   0x6   :  { %v38_v20 = vadd.f32 %v81_v7, %v30_v14  ;;  %v39_v21 = vadd.f32 %v81_v7, %v31_v15 }
   0x7   :  { %v36_v18 = vadd.f32 %v81_v7, %v28_v10  ;;  %v37_v19 = vadd.f32 %v81_v7, %v29_v11 }
   0x8   :  { %v50_v24 = vadd.f32 %v104_v16, %v38_v20  ;;  %v51_v25 = vadd.f32 %v105_v17, %v39_v21 }
   0x9   :  { %v48_v22 = vadd.f32 %v100_v12, %v36_v18  ;;  %v49_v23 = vadd.f32 %v101_v13, %v37_v19 }
   0xa   :  { %v54_v28 = vmax.f32 %v50_v24, 0.0  ;;  %v55_v29 = vmax.f32 %v51_v25, 0.0 }
   0xb   :  { %v52_v26 = vmax.f32 %v48_v22, 0.0  ;;  %v53_v27 = vmax.f32 %v49_v23, 0.0 }
   0xc   :  { %v114_v31 = vpack.c.bf16 %v55_v29, %v54_v28 }
   0xd   :  { %v109_v30 = vpack.c.bf16 %v53_v27, %v52_v26 }
   0xe   :  { %118 = vst [vmem:[%s166_s3 + $0x8] sm:$0xff] %v114_v31  }
   0xf   :  { %110 = vst [vmem:[%s166_s3] sm:$0xff] %v109_v30  }

// kernel: encoder_forward.37
= control target key start
LH: loop header
LB: loop body
LE: loop exit
PB: predicated region body
PF: predicated region fallthrough
CT: control target
= control target key end

     0   :  { %s1026_s0 = inlined_call_operand.vmem [shape: bf16[128,288], index: 0, kind: input, shape index: {}]   ;;  %s1027_s1 = inlined_call_operand.vmem [shape: bf16[288,32], index: 1, kind: input, shape index: {}]   ;;  %s1028_s2 = inlined_call_operand.vmem [shape: f32[1,32], index: 2, kind: input, shape index: {}]   ;;  %s1029_s3 = inlined_call_operand.hbm [shape: f32[128,32], index: 3, kind: output, shape index: {}]  }
   0x1   :  { %v734_v0 = vld [vmem:[%s1027_s1 + $0x40] sm:$0xff]   ;;  %v736_v2 = vld [vmem:[%s1027_s1 + $0x48] sm:$0xff]   ;;  %v738_v4 = vld [vmem:[%s1027_s1 + $0x50] sm:$0xff]  }
   0x2   :  { %v735_v1 = vld [vmem:[%s1027_s1] sm:$0xff]   ;;  %621 = vmatprep.subr.bf16.mxu0 %v734_v0  ;;  %715 = vmatprep.subr.bf16.mxu1 %v734_v0  ;;  %v737_v3 = vld [vmem:[%s1027_s1 + $0x8] sm:$0xff]   ;;  %v739_v5 = vld [vmem:[%s1027_s1 + $0x10] sm:$0xff]  }
   0x3   :  { %622 = vmatpush3.bf16.msra.mxu0 %v735_v1  ;;  %723 = vmatpush3.bf16.msra.mxu1 %v735_v1  ;;  %v740_v6 = vld [vmem:[%s1027_s1 + $0x58] sm:$0xff]   ;;  %v742_v8 = vld [vmem:[%s1027_s1 + $0x60] sm:$0xff]   ;;  %v744_v10 = vld [vmem:[%s1027_s1 + $0x68] sm:$0xff]  }
   0x4   :  { %623 = vmatprep.subr.bf16.mxu0 %v736_v2  ;;  %716 = vmatprep.subr.bf16.mxu1 %v736_v2  ;;  %v741_v7 = vld [vmem:[%s1027_s1 + $0x18] sm:$0xff]   ;;  %v743_v9 = vld [vmem:[%s1027_s1 + $0x20] sm:$0xff]   ;;  %v745_v13 = vld [vmem:[%s1027_s1 + $0x28] sm:$0xff]  }
   0x5   :  { %v752_v11 = vld [vmem:[%s1026_s0 + $0x4] ss:$12 sps:$4 sm:$0xff]   ;;  %v755_v12 = vld [vmem:[%s1026_s0 + $0x94] ss:$12 sps:$4 sm:$0xff]   ;;  %v748_v16 = vld [vmem:[%s1027_s1 + $0x78] sm:$0xff]  }
   0x6   :  { %v746_v14 = vld [vmem:[%s1027_s1 + $0x70] sm:$0xff]   ;;  %376 = vmatprep.mubr.bf16.mxu0 %v752_v11  ;;  %424 = vmatprep.mubr.bf16.mxu1 %v755_v12  ;;  %v749_v17 = vld [vmem:[%s1027_s1 + $0x38] sm:$0xff]   ;;  %v750_v18 = vld [vmem:[%s1026_s0] ss:$12 sps:$4 sm:$0xff]  }
   0x7   :  { %624 = vmatpush3.bf16.msra.mxu0 %v737_v3  ;;  %724 = vmatpush3.bf16.msra.mxu1 %v737_v3  ;;  %v747_v15 = vld [vmem:[%s1027_s1 + $0x30] sm:$0xff]   ;;  %v756_v19 = vld [vmem:[%s1027_s1 + $0x80] sm:$0xff]   ;;  %v757_v21 = vld [vmem:[%s1026_s0 + $0x1c] ss:$12 sps:$4 sm:$0xff]  }
   0x8   :  { %625 = vmatprep.subr.bf16.mxu0 %v738_v4  ;;  %717 = vmatprep.subr.bf16.mxu1 %v738_v4  ;;  %v753_v20 = vld [vmem:[%s1026_s0 + $0x90] ss:$12 sps:$4 sm:$0xff]   ;;  %v759_v22 = vld [vmem:[%s1026_s0 + $0xac] ss:$12 sps:$4 sm:$0xff]  }
   0x9   :  { %v763_v23 = vld [vmem:[%s1027_s1 + $0x88] sm:$0xff]  }
   0xb   :  { %626 = vmatpush3.bf16.msra.mxu0 %v739_v5  ;;  %725 = vmatpush3.bf16.msra.mxu1 %v739_v5 }
   0xc   :  { %627 = vmatprep.subr.bf16.mxu0 %v740_v6  ;;  %718 = vmatprep.subr.bf16.mxu1 %v740_v6 }
   0xf   :  { %628 = vmatpush3.bf16.msra.mxu0 %v741_v7  ;;  %726 = vmatpush3.bf16.msra.mxu1 %v741_v7 }
  0x10   :  { %629 = vmatprep.subr.bf16.mxu0 %v742_v8  ;;  %719 = vmatprep.subr.bf16.mxu1 %v742_v8 }
  0x13   :  { %630 = vmatpush3.bf16.msra.mxu0 %v743_v9  ;;  %727 = vmatpush3.bf16.msra.mxu1 %v743_v9 }
  0x14   :  { %631 = vmatprep.subr.bf16.mxu0 %v744_v10  ;;  %720 = vmatprep.subr.bf16.mxu1 %v744_v10 }
  0x17   :  { %632 = vmatpush3.bf16.msra.mxu0 %v745_v13  ;;  %728 = vmatpush3.bf16.msra.mxu1 %v745_v13 }
  0x18   :  { %633 = vmatprep.subr.bf16.mxu0 %v746_v14  ;;  %721 = vmatprep.subr.bf16.mxu1 %v746_v14 }
  0x1b   :  { %634 = vmatpush3.bf16.msra.mxu0 %v747_v15  ;;  %729 = vmatpush3.bf16.msra.mxu1 %v747_v15 }
  0x1c   :  { %635 = vmatprep.subr.bf16.mxu0 %v748_v16  ;;  %722 = vmatprep.subr.bf16.mxu1 %v748_v16 }
  0x1f   :  { %636 = vmatpush3.bf16.msra.mxu0 %v749_v17  ;;  %730 = vmatpush3.bf16.msra.mxu1 %v749_v17 }
  0x20   :  { %695 = vmatprep.subr.bf16.mxu1 %v756_v19 }
  0x22   :  { %377 = vmatmul.mubr.bf16.vlgmr.msra.gmra.mrb[0].mxu0 %v750_v18  ;;  %425 = vmatmul.mubr.bf16.vlgmr.msra.gmra.mrb[0].mxu1 %v753_v20 }
  0x23   :  { %696 = vmatpush3.bf16.msra.mxu1 %v756_v19  ;;  %384 = vmatprep.mubr.bf16.mxu0 %v757_v21 }
  0x24   :  { %432 = vmatprep.mubr.bf16.mxu1 %v759_v22  ;;  %697 = vmatprep.subr.bf16.mxu1 %v763_v23 }
  0x25   :  { %8 = vsyncpa [#allocation3], 0  ;;  %v761_v24 = vld [vmem:[%s1026_s0 + $0x18] ss:$12 sps:$4 sm:$0xff]   ;;  %v762_v25 = vld [vmem:[%s1026_s0 + $0xa8] ss:$12 sps:$4 sm:$0xff]  }
  0x26   :  { %v764_v26 = vld [vmem:[%s1026_s0 + $0x34] ss:$12 sps:$4 sm:$0xff]   ;;  %vm319_vm0 = vcmask 261120   ;;  %v767_v28 = vld [vmem:[%s1026_s0 + $0x30] ss:$12 sps:$4 sm:$0xff]  }
  0x27   :  { %698 = vmatpush3.bf16.msra.mxu1 %v763_v23  ;;  %v766_v27 = vld [vmem:[%s1026_s0 + $0x8] ss:$12 sps:$4 sm:$0xff]   ;;  %v768_v29 = vld [vmem:[%s1026_s0 + $0x20] ss:$12 sps:$4 sm:$0xff]   ;;  %v771_v31 = vld [vmem:[%s1026_s0 + $0x38] ss:$12 sps:$4 sm:$0xff]  }
  0x28   :  { %v769_v30 = vld [vmem:[%s1026_s0 + $0x4c] ss:$12 sps:$4 sm:$0xff]   ;;  %v772_v32 = vld [vmem:[%s1026_s0 + $0x48] ss:$12 sps:$4 sm:$0xff]   ;;  %v773_v33 = vld [vmem:[%s1026_s0 + $0x50] ss:$12 sps:$4 sm:$0xff]  }
  0x29   :  { %v774_v34 = vld [vmem:[%s1026_s0 + $0x64] ss:$12 sps:$4 sm:$0xff]   ;;  %v776_v35 = vld [vmem:[%s1026_s0 + $0x68] ss:$12 sps:$4 sm:$0xff]   ;;  %v777_v36 = vld [vmem:[%s1026_s0 + $0x60] ss:$12 sps:$4 sm:$0xff]  }
  0x2a   :  { %385 = vmatmul.mubr.bf16.gmra.mrb[4].mxu0 %v761_v24  ;;  %433 = vmatmul.mubr.bf16.gmra.mrb[4].mxu1 %v762_v25  ;;  %v778_v37 = vld [vmem:[%s1026_s0 + $0x80] ss:$12 sps:$4 sm:$0xff]   ;;  %v779_v38 = vld [vmem:[%s1026_s0 + $0x7c] ss:$12 sps:$4 sm:$0xff]   ;;  %v781_v39 = vld [vmem:[%s1026_s0 + $0x98] ss:$12 sps:$4 sm:$0xff]  }
  0x2b   :  { %392 = vmatprep.mubr.bf16.mxu0 %v764_v26  ;;  %699 = vmatprep.mubr.msk.bf16.mxu1 %vm319_vm0, %v766_v27  ;;  %v782_v40 = vld [vmem:[%s1026_s0 + $0x78] ss:$12 sps:$4 sm:$0xff]   ;;  %v783_v41 = vld [vmem:[%s1026_s0 + $0xb0] ss:$12 sps:$4 sm:$0xff]   ;;  %v976_v2 = vld [vmem:[%s1028_s2] ss:$0 sm:$0xff] }
  0x2c   :  { %s808_s2 = smov [#allocation2]  }
  0x2d   :  { %s559_s14 = sshll.u32 %s808_s2, 4  ;;  %s560_s14 = int_to_ptr.vmem [resolvable:$true] %s559_s14 }
  0x2e   :  { %s784_s15 = scalar_lea.vmem %s560_s14, 2048  ;;  %p789_p1 = scmp.lt.s32.totalorder %s560_s14, %s560_s14 }
  0x2f   :  { %p785_p0 = scmp.ne.s32.totalorder %s560_s14, %s784_s15  ;;  %p790_p2 = scmp.lt.s32.totalorder %s784_s15, %s784_s15 }
  0x31   :  { %p791_p3 = por %p790_p2, %p789_p1 }
  0x32   :  { %393 = vmatmul.mubr.bf16.gmra.mrb[8].mxu0 %v767_v28  ;;  %700 = vmatmul.mubr.msk.bf16.vlgmr.msra.gmra.mrb[8].mxu1 %vm319_vm0, %v768_v29 }
  0x33   :  { %400 = vmatprep.mubr.bf16.mxu0 %v769_v30  ;;  %703 = vmatprep.mubr.msk.bf16.mxu1 %vm319_vm0, %v771_v31  ;;  %p792_p4 = pnand %p791_p3, %p785_p0 }
  0x3a   :  { %401 = vmatmul.mubr.bf16.gmra.mrb[12].mxu0 %v772_v32  ;;  %704 = vmatmul.mubr.msk.bf16.gmra.mrb[12].mxu1 %vm319_vm0, %v773_v33 }
  0x3b   :  { %408 = vmatprep.mubr.bf16.mxu0 %v774_v34  ;;  %707 = vmatprep.mubr.msk.bf16.mxu1 %vm319_vm0, %v776_v35 }
  0x42   :  { %409 = vmatmul.mubr.bf16.gmra.mrb[16].mxu0 %v777_v36  ;;  %708 = vmatmul.mubr.msk.bf16.gmra.mrb[16].mxu1 %vm319_vm0, %v778_v37 }
  0x43   :  { %416 = vmatprep.mubr.bf16.mxu0 %v779_v38  ;;  %711 = vmatprep.mubr.msk.bf16.mxu1 %vm319_vm0, %v781_v39 }
  0x4a   :  { %417 = vmatmul.mubr.bf16.gmra.mrb[20].mxu0 %v782_v40  ;;  %712 = vmatmul.mubr.msk.bf16.gmra.mrb[20].mxu1 %vm319_vm0, %v783_v41 }
  0xf5   :  { %v637_v42 = vpop.f32.mrb[0].mxu0  ;;  %v673_v43 = vpop.f32.mrb[0].mxu1 }
  0xf6   :  { %v638_v44 = vpop.f32.mrb[1].mxu0  ;;  %v674_v45 = vpop.f32.mrb[1].mxu1 }
  0xf7   :  { %v639_v46 = vadd.f32 %v638_v44, %v637_v42  ;;  %v640_v47 = vpop.f32.mrb[2].mxu0  ;;  %v965_v48 = vadd.f32 %v674_v45, %v673_v43  ;;  %v676_v49 = vpop.f32.mrb[2].mxu1 }
  0xf8   :  { %v641_v50 = vpop.f32.mrb[3].mxu0  ;;  %v677_v51 = vpop.f32.mrb[3].mxu1 }
  0xf9   :  { %v642_v52 = vadd.f32 %v641_v50, %v640_v47  ;;  %v967_v53 = vadd.f32 %v677_v51, %v676_v49  ;;  %v379_v6 = vadd.f32 %v639_v46, %v976_v2 }
  0xfb   :  { %v382_v15 = vadd.f32 %v642_v52, %v976_v2 }
  0xfd   :  { %v643_v54 = vpop.f32.mrb[4].mxu0  ;;  %v679_v55 = vpop.f32.mrb[4].mxu1 }
  0xfe   :  { %v644_v56 = vpop.f32.mrb[5].mxu0  ;;  %v680_v57 = vpop.f32.mrb[5].mxu1 }
  0xff   :  { %v645_v58 = vadd.f32 %v644_v56, %v643_v54  ;;  %v646_v59 = vpop.f32.mrb[6].mxu0  ;;  %v969_v60 = vadd.f32 %v680_v57, %v679_v55  ;;  %v682_v61 = vpop.f32.mrb[6].mxu1 }
 0x100   :  { %v647_v62 = vpop.f32.mrb[7].mxu0  ;;  %v683_v63 = vpop.f32.mrb[7].mxu1 }
 0x101   :  { %v648_v0 = vadd.f32 %v647_v62, %v646_v59  ;;  %v971_v1 = vadd.f32 %v683_v63, %v682_v61  ;;  %v387_v3 = vadd.f32 %v645_v58, %v976_v2  ;;  %v435_v54 = vadd.f32 %v969_v60, %v976_v2 }
 0x102   :  { %v427_v58 = vadd.f32 %v965_v48, %v976_v2 }
 0x103   :  { %v390_v10 = vadd.f32 %v648_v0, %v976_v2  ;;  %v438_v63 = vadd.f32 %v971_v1, %v976_v2 }
 0x105   :  { %v649_v4 = vpop.f32.mrb[8].mxu0  ;;  %v701_v5 = vpop.f32.mrb[8].mxu1 }
 0x106   :  { %v484_v7 = vadd.f32 %v701_v5, %v387_v3  ;;  %v650_v8 = vpop.f32.mrb[9].mxu0  ;;  %v475_v9 = vpop.f32.mrb[9].mxu1  ;;  %v430_v5 = vadd.f32 %v967_v53, %v976_v2 }
 0x107   :  { %v651_v11 = vadd.f32 %v650_v8, %v649_v4  ;;  %v476_v12 = vadd.f32 %v475_v9, %v379_v6  ;;  %v652_v13 = vpop.f32.mrb[10].mxu0  ;;  %v702_v14 = vpop.f32.mrb[10].mxu1 }
 0x108   :  { %540 = vst.msk [vmem:[#allocation2 + $0x10] sm:$0xff] %vm319_vm0, %v484_v7  ;;  %v487_v16 = vadd.f32 %v702_v14, %v390_v10  ;;  %v653_v17 = vpop.f32.mrb[11].mxu0  ;;  %v478_v18 = vpop.f32.mrb[11].mxu1 }
 0x109   :  { %538 = vst.msk [vmem:[#allocation2] sm:$0xff] %vm319_vm0, %v476_v12  ;;  %v654_v19 = vadd.f32 %v653_v17, %v652_v13  ;;  %v479_v20 = vadd.f32 %v478_v18, %v382_v15  ;;  %v395_v23 = vadd.f32 %v651_v11, %v976_v2 }
 0x10a   :  { %541 = vst.msk [vmem:[#allocation2 + $0x18] sm:$0xff] %vm319_vm0, %v487_v16 }
 0x10b   :  { %539 = vst.msk [vmem:[#allocation2 + $0x8] sm:$0xff] %vm319_vm0, %v479_v20  ;;  %v398_v30 = vadd.f32 %v654_v19, %v976_v2 }
 0x10d   :  { %v655_v21 = vpop.f32.mrb[12].mxu0  ;;  %v705_v22 = vpop.f32.mrb[12].mxu1 }
 0x10e   :  { %v656_v24 = vpop.f32.mrb[13].mxu0  ;;  %v491_v25 = vpop.f32.mrb[13].mxu1 }
 0x10f   :  { %v657_v26 = vadd.f32 %v656_v24, %v655_v21  ;;  %v492_v27 = vadd.f32 %v491_v25, %v395_v23  ;;  %v658_v28 = vpop.f32.mrb[14].mxu0  ;;  %v706_v29 = vpop.f32.mrb[14].mxu1 }
 0x110   :  { %v659_v31 = vpop.f32.mrb[15].mxu0  ;;  %v494_v32 = vpop.f32.mrb[15].mxu1 }
 0x111   :  { %v403_v33 = vadd.f32 %v657_v26, %v976_v2  ;;  %542 = vst.msk [vmem:[#allocation2 + $0x20] sm:$0xff] %vm319_vm0, %v492_v27  ;;  %v660_v34 = vadd.f32 %v659_v31, %v658_v28  ;;  %v495_v35 = vadd.f32 %v494_v32, %v398_v30 }
 0x113   :  { %v500_v36 = vadd.f32 %v705_v22, %v403_v33  ;;  %v406_v37 = vadd.f32 %v660_v34, %v976_v2  ;;  %543 = vst.msk [vmem:[#allocation2 + $0x28] sm:$0xff] %vm319_vm0, %v495_v35 }
 0x115   :  { %544 = vst.msk [vmem:[#allocation2 + $0x30] sm:$0xff] %vm319_vm0, %v500_v36  ;;  %v503_v38 = vadd.f32 %v706_v29, %v406_v37  ;;  %v661_v39 = vpop.f32.mrb[16].mxu0  ;;  %v709_v40 = vpop.f32.mrb[16].mxu1 }
 0x116   :  { %v662_v41 = vpop.f32.mrb[17].mxu0  ;;  %v507_v42 = vpop.f32.mrb[17].mxu1 }
 0x117   :  { %545 = vst.msk [vmem:[#allocation2 + $0x38] sm:$0xff] %vm319_vm0, %v503_v38  ;;  %v663_v43 = vadd.f32 %v662_v41, %v661_v39  ;;  %v664_v44 = vpop.f32.mrb[18].mxu0  ;;  %v710_v45 = vpop.f32.mrb[18].mxu1 }
 0x118   :  { %v665_v46 = vpop.f32.mrb[19].mxu0  ;;  %v510_v47 = vpop.f32.mrb[19].mxu1 }
 0x119   :  { %v411_v49 = vadd.f32 %v663_v43, %v976_v2  ;;  %v666_v50 = vadd.f32 %v665_v46, %v664_v44 }
 0x11b   :  { %v508_v51 = vadd.f32 %v507_v42, %v411_v49  ;;  %v414_v52 = vadd.f32 %v666_v50, %v976_v2 }
 0x11d   :  { %546 = vst.msk [vmem:[#allocation2 + $0x40] sm:$0xff] %vm319_vm0, %v508_v51  ;;  %v511_v55 = vadd.f32 %v510_v47, %v414_v52  ;;  %v667_v56 = vpop.f32.mrb[20].mxu0  ;;  %v713_v57 = vpop.f32.mrb[20].mxu1 }
 0x11e   :  { %v532_v59 = vadd.f32 %v713_v57, %v435_v54  ;;  %v668_v61 = vpop.f32.mrb[21].mxu0  ;;  %v523_v62 = vpop.f32.mrb[21].mxu1 }
 0x11f   :  { %547 = vst.msk [vmem:[#allocation2 + $0x48] sm:$0xff] %vm319_vm0, %v511_v55  ;;  %v669_v0 = vadd.f32 %v668_v61, %v667_v56  ;;  %v524_v3 = vadd.f32 %v523_v62, %v427_v58  ;;  %v670_v4 = vpop.f32.mrb[22].mxu0  ;;  %v714_v60 = vpop.f32.mrb[22].mxu1 }
 0x120   :  { %552 = vst.msk [vmem:[#allocation2 + $0x70] sm:$0xff] %vm319_vm0, %v532_v59  ;;  %v535_v6 = vadd.f32 %v714_v60, %v438_v63  ;;  %v671_v7 = vpop.f32.mrb[23].mxu0  ;;  %v526_v48 = vpop.f32.mrb[23].mxu1 }
 0x121   :  { %v419_v8 = vadd.f32 %v669_v0, %v976_v2  ;;  %550 = vst.msk [vmem:[#allocation2 + $0x60] sm:$0xff] %vm319_vm0, %v524_v3  ;;  %v672_v9 = vadd.f32 %v671_v7, %v670_v4  ;;  %v527_v1 = vadd.f32 %v526_v48, %v430_v5 }
 0x122   :  { %553 = vst.msk [vmem:[#allocation2 + $0x78] sm:$0xff] %vm319_vm0, %v535_v6 }
 0x123   :  { %v516_v10 = vadd.f32 %v709_v40, %v419_v8  ;;  %v422_v11 = vadd.f32 %v672_v9, %v976_v2  ;;  %551 = vst.msk [vmem:[#allocation2 + $0x68] sm:$0xff] %vm319_vm0, %v527_v1 }
 0x125   :  { %548 = vst.msk [vmem:[#allocation2 + $0x50] sm:$0xff] %vm319_vm0, %v516_v10  ;;  %v519_v53 = vadd.f32 %v710_v45, %v422_v11 }
 0x127   :  { %549 = vst.msk [vmem:[#allocation2 + $0x58] sm:$0xff] %vm319_vm0, %v519_v53 }
 0x128   :  { %795 = shalt.err (!%p792_p4)
}
 0x129   :  { %s796_s18 = scalar_lea.hbm %s1029_s3, 2048 }
 0x12a   :  { %p797_p5 = scmp.ne.s32.totalorder %s1029_s3, %s796_s18  ;;  %p800_p6 = scmp.lt.u32.totalorder %s796_s18, %s1029_s3 }
 0x12c   :  { %p802_p7 = pnand %p800_p6, %p797_p5 }
 0x12e   :  { %805 = shalt.err (!%p802_p7)
}
 0x12f   :  { %s809_s23 = smov 128   ;;  %s810_s24 = smov 8  }
 0x130   :  { %565 = dma.vmem_to_hbm [thread:$0]  %s560_s14, 2048, %s1029_s3, [#allocation3], %s809_s23, %s809_s23, %s810_s24  }
 0x131   :  { %806 = dma.done.wait [#allocation3], 2048  }
 0x132   :  { %807 = vsyncadd [#allocation3], 4294965248 }
 0x133   :  { %569 = vsyncpa [#allocation3], 1 }

</bundles_post_ra>
